<compile_context>
chip_gen: v7x
topology: tpu7x:2x2x1
jax: 0.10.0
libtpu: 0.0.40
codegen_flags: <defaults>
</compile_context>

<pallas_src>
import functools
from typing import NamedTuple

import jax
import jax.numpy as jnp
from jax.experimental import pallas as pl
from jax.experimental.pallas import tpu as pltpu

MAX_TM = 512        # GEMM row tile (bigger tiles -> closer to HBM roofline)
MAX_TN = 256        # GEMM output-channel tile
MAX_TK_CONV = 640   # conv reduction tile (covers K = 256 / 512 / 640 in 1 step)
MAX_TK_FC = 1664    # fused-FC reduction tile (128-aligned; 2 K steps over 3328)
MIN_M_SPLIT = 256   # split M into >=2 parallel tiles above this (v7x: 2 TCs)


def _round_up(x, m):
    return (x + m - 1) // m * m


def _padded_dim(d, max_tile, align=128):
    """Pad dim `d` to a tileable, 128-aligned size. Returns (padded, tile)."""
    dp = _round_up(d, align)
    if dp <= max_tile:
        return dp, dp
    return _round_up(d, max_tile), max_tile


def _m_tiling(m, max_tile=MAX_TM, align=16, min_split=MIN_M_SPLIT):
    """Row tiling: 16-aligned tm (bf16 sublane packing), minimal padding, and
    >=2 M tiles once m is large enough so both v7x TensorCores get work."""
    n_tiles = max(1, -(-m // max_tile))
    if n_tiles == 1 and m >= min_split:
        n_tiles = 2
    tm = _round_up(-(-m // n_tiles), align)
    return n_tiles * tm, tm


def _pad2d(a, rows, cols):
    pr, pc = rows - a.shape[0], cols - a.shape[1]
    if pr == 0 and pc == 0:
        return a
    return jnp.pad(a, ((0, pr), (0, pc)))


def _pad_mat(x, rows, cols, dtype):
    """One-time (pack-side) zero-pad of a weight / bias matrix."""
    out = jnp.zeros((rows, cols), dtype)
    return out.at[: x.shape[0], : x.shape[1]].set(x.astype(dtype))


# ---------------------------------------------------------------------------
# Pallas kernel 1: tiled GEMM + bias + optional ReLU.
#   grid = (M_tiles, N_tiles, K_tiles); K is the reduction ("arbitrary") axis.
# ---------------------------------------------------------------------------
def _gemm_bias_act_kernel(a_ref, w_ref, b_ref, o_ref, acc_ref, *, apply_relu):
    @pl.when(pl.program_id(2) == 0)
    def _():
        acc_ref[...] = jnp.zeros_like(acc_ref)

    acc_ref[...] += jnp.dot(a_ref[...], w_ref[...],
                            preferred_element_type=jnp.float32)

    @pl.when(pl.program_id(2) == pl.num_programs(2) - 1)
    def _():
        y = acc_ref[...] + b_ref[0:1, :]       # (1, TN) broadcasts over TM
        if apply_relu:
            y = jnp.maximum(y, 0.0)
        o_ref[...] = y.astype(o_ref.dtype)     # bf16 narrowing happens here


# ---------------------------------------------------------------------------
# Pallas kernel 2: fused  out = relu(A @ W1 + b1) @ W2 + b2
#   grid = (M_tiles, K1_tiles); fc2 runs in the epilogue of the last K step.
# ---------------------------------------------------------------------------
def _fused_fc_kernel(a_ref, w1_ref, b1_ref, w2_ref, b2_ref, o_ref, acc_ref):
    @pl.when(pl.program_id(1) == 0)
    def _():
        acc_ref[...] = jnp.zeros_like(acc_ref)

    acc_ref[...] += jnp.dot(a_ref[...], w1_ref[...],
                            preferred_element_type=jnp.float32)

    @pl.when(pl.program_id(1) == pl.num_programs(1) - 1)
    def _():
        h = jnp.maximum(acc_ref[...] + b1_ref[0:1, :], 0.0).astype(jnp.bfloat16)
        y = jnp.dot(h, w2_ref[...], preferred_element_type=jnp.float32)
        o_ref[...] = (y + b2_ref[0:1, :]).astype(o_ref.dtype)


# ---------------------------------------------------------------------------
# Wrappers
# ---------------------------------------------------------------------------
def pallas_conv_gemm(a, w_p, b_p, n_true, tk, tn, *, relu=True):
    """y = relu(a @ w_p + b_p). a is bf16; w_p/b_p pre-padded bf16/f32."""
    M, _ = a.shape
    Kp, Np = w_p.shape
    Mp, tm = _m_tiling(M)
    a_p = _pad2d(a, Mp, Kp)                    # pad only when actually needed

    grid = (Mp // tm, Np // tn, Kp // tk)
    out = pl.pallas_call(
        functools.partial(_gemm_bias_act_kernel, apply_relu=relu),
        out_shape=jax.ShapeDtypeStruct((Mp, Np), jnp.bfloat16),
        grid_spec=pltpu.PrefetchScalarGridSpec(
            num_scalar_prefetch=0,
            grid=grid,
            in_specs=[
                pl.BlockSpec((tm, tk), lambda m, n, k: (m, k)),
                pl.BlockSpec((tk, tn), lambda m, n, k: (k, n)),
                pl.BlockSpec((8, tn), lambda m, n, k: (0, n)),
            ],
            out_specs=pl.BlockSpec((tm, tn), lambda m, n, k: (m, n)),
            scratch_shapes=[pltpu.VMEM((tm, tn), jnp.float32)],
        ),
        compiler_params=pltpu.CompilerParams(
            dimension_semantics=("parallel", "parallel", "arbitrary")),
    )(a_p, w_p, b_p)
    return out[:M, :n_true]


def pallas_fused_fc(a, w1_p, b1_p, w2_p, b2_p, n_true, tk):
    """out = relu(a @ w1 + b1) @ w2 + b2 in a single pallas_call (f32 out)."""
    M, _ = a.shape
    K1p, H = w1_p.shape
    _, Ap = w2_p.shape
    Mp, tm = _m_tiling(M)
    a_p = _pad2d(a, Mp, K1p)

    grid = (Mp // tm, K1p // tk)
    out = pl.pallas_call(
        _fused_fc_kernel,
        out_shape=jax.ShapeDtypeStruct((Mp, Ap), jnp.float32),
        grid_spec=pltpu.PrefetchScalarGridSpec(
            num_scalar_prefetch=0,
            grid=grid,
            in_specs=[
                pl.BlockSpec((tm, tk), lambda m, k: (m, k)),
                pl.BlockSpec((tk, H), lambda m, k: (k, 0)),
                pl.BlockSpec((8, H), lambda m, k: (0, 0)),
                pl.BlockSpec((H, Ap), lambda m, k: (0, 0)),
                pl.BlockSpec((8, Ap), lambda m, k: (0, 0)),
            ],
            out_specs=pl.BlockSpec((tm, Ap), lambda m, k: (m, 0)),
            scratch_shapes=[pltpu.VMEM((tm, H), jnp.float32)],
        ),
        compiler_params=pltpu.CompilerParams(
            dimension_semantics=("parallel", "arbitrary")),
    )(a_p, w1_p, b1_p, w2_p, b2_p)
    return out[:M, :n_true]


# ---------------------------------------------------------------------------
# Glue: im2col (patch extraction) so each conv becomes one GEMM.  Runs in the
# activation dtype (bf16).  conv1 consumes NCHW directly; conv2/conv3 NHWC.
# ---------------------------------------------------------------------------
def _im2col_nchw(x, kh, kw, stride):
    """Rows: (b, oh, ow); cols: (c, kh, kw) — matches w.reshape(O, C*kh*kw)."""
    B, C, H, W = x.shape
    oh = (H - kh) // stride + 1
    ow = (W - kw) // stride + 1
    patches = []
    for i in range(kh):
        for j in range(kw):
            patches.append(
                x[:, :, i:i + stride * oh:stride, j:j + stride * ow:stride])
    p = jnp.stack(patches, axis=2)                    # (B, C, kh*kw, oh, ow)
    p = jnp.transpose(p, (0, 3, 4, 1, 2))             # (B, oh, ow, C, kh*kw)
    return p.reshape(B * oh * ow, C * kh * kw), oh, ow


def _im2col_nhwc(x, kh, kw, stride):
    """Rows: (b, oh, ow); cols: (kh, kw, c) — matches transpose(w,(2,3,1,0))."""
    B, H, W, C = x.shape
    oh = (H - kh) // stride + 1
    ow = (W - kw) // stride + 1
    patches = []
    for i in range(kh):
        for j in range(kw):
            patches.append(
                x[:, i:i + stride * oh:stride, j:j + stride * ow:stride, :])
    p = jnp.stack(patches, axis=3)                    # (B, oh, ow, kh*kw, C)
    return p.reshape(B * oh * ow, kh * kw * C), oh, ow


# ---------------------------------------------------------------------------
# One-time weight packing (hoisted out of the forward pass).
# ---------------------------------------------------------------------------
class ConvMeta(NamedTuple):
    kh: int
    kw: int
    stride: int
    out_ch: int
    tk: int
    tn: int


class FCMeta(NamedTuple):
    tk: int
    num_actions: int


def pack_params(params, input_hw=84):
    arrays = {}
    meta = {}

    def pack_conv(name, w, b, col_order):
        O, I, kh, kw = w.shape
        K = I * kh * kw
        if col_order == "c_kh_kw":     # conv1: NCHW input path
            w_mat = w.reshape(O, K).T
        else:                          # conv2/conv3: NHWC activations
            w_mat = jnp.transpose(w, (2, 3, 1, 0)).reshape(K, O)
        Kp, tk = _padded_dim(K, MAX_TK_CONV)
        Np, tn = _padded_dim(O, MAX_TN)
        arrays[name + "_w"] = _pad_mat(w_mat, Kp, Np, jnp.bfloat16)
        b_row = _pad_mat(b.reshape(1, O), 1, Np, jnp.float32)
        arrays[name + "_b"] = jnp.tile(b_row, (8, 1))   # sublane-8 bias tile
        return tk, tn

    strides = {"conv1": 4, "conv2": 2, "conv3": 1}
    orders = {"conv1": "c_kh_kw", "conv2": "kh_kw_c", "conv3": "kh_kw_c"}
    hw = input_hw
    for name in ("conv1", "conv2", "conv3"):
        w, b = params[name + "_w"], params[name + "_b"]
        O, I, kh, kw = w.shape
        tk, tn = pack_conv(name, w, b, orders[name])
        meta[name] = ConvMeta(kh, kw, strides[name], O, tk, tn)
        hw = (hw - kh) // strides[name] + 1

    # fc1: permute K axis from PyTorch's NCHW flatten order (c,h,w) to NHWC
    # flatten order (h,w,c) so the runtime flatten is a pure reshape.
    w1, b1 = params["fc1_w"], params["fc1_b"]
    w2, b2 = params["fc2_w"], params["fc2_b"]
    H, K1 = w1.shape
    A = w2.shape[0]
    C3 = meta["conv3"].out_ch
    assert K1 == C3 * hw * hw, (K1, C3, hw)
    w1_nhwc = jnp.transpose(w1.reshape(H, C3, hw, hw), (0, 2, 3, 1)).reshape(H, K1)
    K1p, tk1 = _padded_dim(K1, MAX_TK_FC)
    Ap, _ = _padded_dim(A, MAX_TN)
    arrays["fc1_w"] = _pad_mat(w1_nhwc.T, K1p, H, jnp.bfloat16)
    arrays["fc1_b"] = jnp.tile(_pad_mat(b1.reshape(1, H), 1, H, jnp.float32), (8, 1))
    arrays["fc2_w"] = _pad_mat(w2.T, H, Ap, jnp.bfloat16)
    arrays["fc2_b"] = jnp.tile(_pad_mat(b2.reshape(1, A), 1, Ap, jnp.float32), (8, 1))
    meta["fc"] = FCMeta(tk1, A)
    return arrays, meta


# ---------------------------------------------------------------------------
# Parameter construction (deterministic, in-script).  Shapes follow QNetwork.
# ---------------------------------------------------------------------------
def init_params(key, num_actions):
    ks = jax.random.split(key, 10)

    def w(k, shape, fan_in):
        return jax.random.normal(k, shape, jnp.float32) / jnp.sqrt(fan_in)

    return {
        "conv1_w": w(ks[0], (32, 4, 8, 8), 4 * 8 * 8),
        "conv1_b": w(ks[1], (32,), 4 * 8 * 8),
        "conv2_w": w(ks[2], (64, 32, 4, 4), 32 * 4 * 4),
        "conv2_b": w(ks[3], (64,), 32 * 4 * 4),
        "conv3_w": w(ks[4], (64, 64, 3, 3), 64 * 3 * 3),
        "conv3_b": w(ks[5], (64,), 64 * 3 * 3),
        "fc1_w": w(ks[6], (512, 3136), 3136),   # PyTorch Linear: (out, in)
        "fc1_b": w(ks[7], (512,), 3136),
        "fc2_w": w(ks[8], (num_actions, 512), 512),
        "fc2_b": w(ks[9], (num_actions,), 512),
    }


# ---------------------------------------------------------------------------
# Full forward pass (matches QNetwork.forward).
# ---------------------------------------------------------------------------
def qnetwork_forward(meta, arrays, x_nchw):
    x = x_nchw.astype(jnp.bfloat16)            # bf16 activations end-to-end
    B = x.shape[0]

    # conv1 reads the NCHW input directly (weights packed in (C,kh,kw) order),
    # so there is no per-forward NCHW->NHWC transpose of the input.
    m = meta["conv1"]
    a, oh, ow = _im2col_nchw(x, m.kh, m.kw, m.stride)
    y = pallas_conv_gemm(a, arrays["conv1_w"], arrays["conv1_b"],
                         m.out_ch, m.tk, m.tn)
    x = y.reshape(B, oh, ow, m.out_ch)          # NHWC, bf16

    for name in ("conv2", "conv3"):
        m = meta[name]
        a, oh, ow = _im2col_nhwc(x, m.kh, m.kw, m.stride)
        y = pallas_conv_gemm(a, arrays[name + "_w"], arrays[name + "_b"],
                             m.out_ch, m.tk, m.tn)
        x = y.reshape(B, oh, ow, m.out_ch)

    # Pure reshape: fc1_w's K axis was permuted to NHWC order at pack time.
    x = x.reshape(B, -1)                        # (B, 3136) bf16

    fcm = meta["fc"]
    return pallas_fused_fc(x, arrays["fc1_w"], arrays["fc1_b"],
                           arrays["fc2_w"], arrays["fc2_b"],
                           fcm.num_actions, fcm.tk)


# ---------------------------------------------------------------------------
# Pure-JAX f32 reference (PyTorch semantics) for a tolerance check.
# ---------------------------------------------------------------------------
def reference_forward(params, x):
    def conv(x, w, b, stride):
        y = jax.lax.conv_general_dilated(
            x, w, (stride, stride), "VALID",
            dimension_numbers=("NCHW", "OIHW", "NCHW"))
        return jax.nn.relu(y + b[None, :, None, None])

    x = conv(x, params["conv1_w"], params["conv1_b"], 4)
    x = conv(x, params["conv2_w"], params["conv2_b"], 2)
    x = conv(x, params["conv3_w"], params["conv3_b"], 1)
    x = x.reshape(x.shape[0], -1)                        # NCHW flatten (c,h,w)
    x = jax.nn.relu(x @ params["fc1_w"].T + params["fc1_b"])
    return x @ params["fc2_w"].T + params["fc2_b"]


if __name__ == "__main__":
    key = jax.random.PRNGKey(0)
    k_params, k_x = jax.random.split(key)

    num_actions = 6  # len(options.get('actions'))
    params = init_params(k_params, num_actions)
    arrays, meta = pack_params(params)          # one-time packing (hoisted)

    # fc1 expects 3136 = 64*7*7 inputs, which fixes the spatial size to 84x84.
    batch = 2
    x = jax.random.uniform(k_x, (batch, 4, 84, 84), jnp.float32)   # NCHW

    fwd = jax.jit(functools.partial(qnetwork_forward, meta))
    out = jax.block_until_ready(fwd(arrays, x))

    assert out.shape == (batch, num_actions), out.shape
    assert bool(jnp.all(jnp.isfinite(out)))

    # Tolerance check vs the f32 reference (bf16 path -> loose tolerance that
    # still catches any weight-ordering / layout bug, which would be O(1) off).
    ref = reference_forward(params, x)
    max_err = float(jnp.max(jnp.abs(out - ref)))
    assert max_err < 0.2, f"max abs error vs f32 reference: {max_err}"

    print("KERNEL_OK")
</pallas_src>

<mosaic_0001>
module attributes {stable_mosaic.version = 11 : i64} {
  func.func @_gemm_bias_act_kernel(%arg0: i32, %arg1: i32, %arg2: i32, %arg3: memref<400x256xbf16, #tpu.memory_space<vmem>>, %arg4: memref<256x128xbf16, #tpu.memory_space<vmem>>, %arg5: memref<8x128xf32, #tpu.memory_space<vmem>>, %arg6: memref<400x128xbf16, #tpu.memory_space<vmem>>, %arg7: memref<400x128xf32, #tpu.memory_space<vmem>>) attributes {dimension_semantics = [#tpu.dimension_semantics<parallel>, #tpu.dimension_semantics<parallel>, #tpu.dimension_semantics<arbitrary>], iteration_bounds = array<i64: 2, 1, 1>, scalar_prefetch = 0 : i64, scratch_operands = 1 : i64, tpu.core_type = #tpu.core_type<tc>, window_params = [{transform_indices = @transform_0, window_bounds = array<i64: 400, 256>}, {transform_indices = @transform_1, window_bounds = array<i64: 256, 128>}, {transform_indices = @transform_2, window_bounds = array<i64: 8, 128>}, {transform_indices = @transform_3, window_bounds = array<i64: 400, 128>}]} {
    %c0_i32 = arith.constant 0 : i32
    %0 = arith.cmpi eq, %arg2, %c0_i32 : i32
    %1 = arith.extui %0 : i1 to i32
    %c0_i32_0 = arith.constant 0 : i32
    %2 = arith.cmpi ne, %1, %c0_i32_0 : i32
    scf.if %2 {
      %cst_10 = arith.constant 0.000000e+00 : f32
      %12 = vector.broadcast %cst_10 : f32 to vector<400x128xf32>
      %c0_11 = arith.constant 0 : index
      %c0_12 = arith.constant 0 : index
      %13 = vector.load %arg7[%c0_11, %c0_12] : memref<400x128xf32, #tpu.memory_space<vmem>>, vector<400x128xf32>
      tpu.vector_store %arg7[%c0_11, %c0_12], %12 {strides = array<i32>} : memref<400x128xf32, #tpu.memory_space<vmem>>, vector<400x128xf32>,
    } else {
    }
    %c0 = arith.constant 0 : index
    %c0_1 = arith.constant 0 : index
    %3 = vector.load %arg7[%c0, %c0_1] : memref<400x128xf32, #tpu.memory_space<vmem>>, vector<400x128xf32>
    %c0_2 = arith.constant 0 : index
    %c0_3 = arith.constant 0 : index
    %4 = vector.load %arg3[%c0_2, %c0_3] : memref<400x256xbf16, #tpu.memory_space<vmem>>, vector<400x256xbf16>
    %c0_4 = arith.constant 0 : index
    %c0_5 = arith.constant 0 : index
    %5 = vector.load %arg4[%c0_4, %c0_5] : memref<256x128xbf16, #tpu.memory_space<vmem>>, vector<256x128xbf16>
    %cst = arith.constant dense<0.000000e+00> : vector<400x128xf32>
    %6 = tpu.matmul %4, %5, %cst {dimension_numbers = #tpu.dot_dimension_numbers<[1], [0], [0], [1], [0, 0, 1, 1], [], []>} : vector<400x256xbf16>, vector<256x128xbf16>, vector<400x128xf32> -> vector<400x128xf32>
    %7 = arith.addf %3, %6 : vector<400x128xf32>
    %c0_6 = arith.constant 0 : index
    %c0_7 = arith.constant 0 : index
    %8 = vector.load %arg7[%c0_6, %c0_7] : memref<400x128xf32, #tpu.memory_space<vmem>>, vector<400x128xf32>
    tpu.vector_store %arg7[%c0_6, %c0_7], %7 {strides = array<i32>} : memref<400x128xf32, #tpu.memory_space<vmem>>, vector<400x128xf32>,
    %c0_i32_8 = arith.constant 0 : i32
    %9 = arith.cmpi eq, %arg2, %c0_i32_8 : i32
    %10 = arith.extui %9 : i1 to i32
    %c0_i32_9 = arith.constant 0 : i32
    %11 = arith.cmpi ne, %10, %c0_i32_9 : i32
    scf.if %11 {
      %c0_10 = arith.constant 0 : index
      %c0_11 = arith.constant 0 : index
      %12 = vector.load %arg7[%c0_10, %c0_11] : memref<400x128xf32, #tpu.memory_space<vmem>>, vector<400x128xf32>
      %c0_12 = arith.constant 0 : index
      %c0_13 = arith.constant 0 : index
      %13 = vector.load %arg5[%c0_12, %c0_13] : memref<8x128xf32, #tpu.memory_space<vmem>>, vector<1x128xf32>
      %14 = vector.broadcast %13 : vector<1x128xf32> to vector<400x128xf32>
      %15 = arith.addf %12, %14 : vector<400x128xf32>
      %cst_14 = arith.constant 0.000000e+00 : f32
      %16 = vector.broadcast %cst_14 : f32 to vector<400x128xf32>
      %17 = arith.maximumf %15, %16 : vector<400x128xf32>
      %18 = arith.truncf %17 : vector<400x128xf32> to vector<400x128xbf16>
      %c0_15 = arith.constant 0 : index
      %c0_16 = arith.constant 0 : index
      %19 = vector.load %arg6[%c0_15, %c0_16] : memref<400x128xbf16, #tpu.memory_space<vmem>>, vector<400x128xbf16>
      tpu.vector_store %arg6[%c0_15, %c0_16], %18 {strides = array<i32>} : memref<400x128xbf16, #tpu.memory_space<vmem>>, vector<400x128xbf16>,
    } else {
    }
    return
  }
  func.func @transform_0(%arg0: i32, %arg1: i32, %arg2: i32) -> (i32, i32) {
    %c0_i32 = arith.constant 0 : i32
    return %arg0, %arg2 : i32, i32
  }
  func.func @transform_1(%arg0: i32, %arg1: i32, %arg2: i32) -> (i32, i32) {
    %c0_i32 = arith.constant 0 : i32
    return %arg2, %arg1 : i32, i32
  }
  func.func @transform_2(%arg0: i32, %arg1: i32, %arg2: i32) -> (i32, i32) {
    %c0_i32 = arith.constant 0 : i32
    %c0_i32_0 = arith.constant 0 : i32
    return %c0_i32, %arg1 : i32, i32
  }
  func.func @transform_3(%arg0: i32, %arg1: i32, %arg2: i32) -> (i32, i32) {
    %c0_i32 = arith.constant 0 : i32
    return %arg0, %arg1 : i32, i32
  }
}

module attributes {stable_mosaic.version = 11 : i64} {
  func.func @_gemm_bias_act_kernel(%arg0: i32, %arg1: i32, %arg2: i32, %arg3: memref<176x512xbf16, #tpu.memory_space<vmem>>, %arg4: memref<512x128xbf16, #tpu.memory_space<vmem>>, %arg5: memref<8x128xf32, #tpu.memory_space<vmem>>, %arg6: memref<176x128xbf16, #tpu.memory_space<vmem>>, %arg7: memref<176x128xf32, #tpu.memory_space<vmem>>) attributes {dimension_semantics = [#tpu.dimension_semantics<parallel>, #tpu.dimension_semantics<parallel>, #tpu.dimension_semantics<arbitrary>], iteration_bounds = array<i64: 1, 1, 1>, scalar_prefetch = 0 : i64, scratch_operands = 1 : i64, tpu.core_type = #tpu.core_type<tc>, window_params = [{transform_indices = @transform_0, window_bounds = array<i64: 176, 512>}, {transform_indices = @transform_1, window_bounds = array<i64: 512, 128>}, {transform_indices = @transform_2, window_bounds = array<i64: 8, 128>}, {transform_indices = @transform_3, window_bounds = array<i64: 176, 128>}]} {
    %c0_i32 = arith.constant 0 : i32
    %0 = arith.cmpi eq, %arg2, %c0_i32 : i32
    %1 = arith.extui %0 : i1 to i32
    %c0_i32_0 = arith.constant 0 : i32
    %2 = arith.cmpi ne, %1, %c0_i32_0 : i32
    scf.if %2 {
      %cst_10 = arith.constant 0.000000e+00 : f32
      %12 = vector.broadcast %cst_10 : f32 to vector<176x128xf32>
      %c0_11 = arith.constant 0 : index
      %c0_12 = arith.constant 0 : index
      %13 = vector.load %arg7[%c0_11, %c0_12] : memref<176x128xf32, #tpu.memory_space<vmem>>, vector<176x128xf32>
      tpu.vector_store %arg7[%c0_11, %c0_12], %12 {strides = array<i32>} : memref<176x128xf32, #tpu.memory_space<vmem>>, vector<176x128xf32>,
    } else {
    }
    %c0 = arith.constant 0 : index
    %c0_1 = arith.constant 0 : index
    %3 = vector.load %arg7[%c0, %c0_1] : memref<176x128xf32, #tpu.memory_space<vmem>>, vector<176x128xf32>
    %c0_2 = arith.constant 0 : index
    %c0_3 = arith.constant 0 : index
    %4 = vector.load %arg3[%c0_2, %c0_3] : memref<176x512xbf16, #tpu.memory_space<vmem>>, vector<176x512xbf16>
    %c0_4 = arith.constant 0 : index
    %c0_5 = arith.constant 0 : index
    %5 = vector.load %arg4[%c0_4, %c0_5] : memref<512x128xbf16, #tpu.memory_space<vmem>>, vector<512x128xbf16>
    %cst = arith.constant dense<0.000000e+00> : vector<176x128xf32>
    %6 = tpu.matmul %4, %5, %cst {dimension_numbers = #tpu.dot_dimension_numbers<[1], [0], [0], [1], [0, 0, 1, 1], [], []>} : vector<176x512xbf16>, vector<512x128xbf16>, vector<176x128xf32> -> vector<176x128xf32>
    %7 = arith.addf %3, %6 : vector<176x128xf32>
    %c0_6 = arith.constant 0 : index
    %c0_7 = arith.constant 0 : index
    %8 = vector.load %arg7[%c0_6, %c0_7] : memref<176x128xf32, #tpu.memory_space<vmem>>, vector<176x128xf32>
    tpu.vector_store %arg7[%c0_6, %c0_7], %7 {strides = array<i32>} : memref<176x128xf32, #tpu.memory_space<vmem>>, vector<176x128xf32>,
    %c0_i32_8 = arith.constant 0 : i32
    %9 = arith.cmpi eq, %arg2, %c0_i32_8 : i32
    %10 = arith.extui %9 : i1 to i32
    %c0_i32_9 = arith.constant 0 : i32
    %11 = arith.cmpi ne, %10, %c0_i32_9 : i32
    scf.if %11 {
      %c0_10 = arith.constant 0 : index
      %c0_11 = arith.constant 0 : index
      %12 = vector.load %arg7[%c0_10, %c0_11] : memref<176x128xf32, #tpu.memory_space<vmem>>, vector<176x128xf32>
      %c0_12 = arith.constant 0 : index
      %c0_13 = arith.constant 0 : index
      %13 = vector.load %arg5[%c0_12, %c0_13] : memref<8x128xf32, #tpu.memory_space<vmem>>, vector<1x128xf32>
      %14 = vector.broadcast %13 : vector<1x128xf32> to vector<176x128xf32>
      %15 = arith.addf %12, %14 : vector<176x128xf32>
      %cst_14 = arith.constant 0.000000e+00 : f32
      %16 = vector.broadcast %cst_14 : f32 to vector<176x128xf32>
      %17 = arith.maximumf %15, %16 : vector<176x128xf32>
      %18 = arith.truncf %17 : vector<176x128xf32> to vector<176x128xbf16>
      %c0_15 = arith.constant 0 : index
      %c0_16 = arith.constant 0 : index
      %19 = vector.load %arg6[%c0_15, %c0_16] : memref<176x128xbf16, #tpu.memory_space<vmem>>, vector<176x128xbf16>
      tpu.vector_store %arg6[%c0_15, %c0_16], %18 {strides = array<i32>} : memref<176x128xbf16, #tpu.memory_space<vmem>>, vector<176x128xbf16>,
    } else {
    }
    return
  }
  func.func @transform_0(%arg0: i32, %arg1: i32, %arg2: i32) -> (i32, i32) {
    %c0_i32 = arith.constant 0 : i32
    return %arg0, %arg2 : i32, i32
  }
  func.func @transform_1(%arg0: i32, %arg1: i32, %arg2: i32) -> (i32, i32) {
    %c0_i32 = arith.constant 0 : i32
    return %arg2, %arg1 : i32, i32
  }
  func.func @transform_2(%arg0: i32, %arg1: i32, %arg2: i32) -> (i32, i32) {
    %c0_i32 = arith.constant 0 : i32
    %c0_i32_0 = arith.constant 0 : i32
    return %c0_i32, %arg1 : i32, i32
  }
  func.func @transform_3(%arg0: i32, %arg1: i32, %arg2: i32) -> (i32, i32) {
    %c0_i32 = arith.constant 0 : i32
    return %arg0, %arg1 : i32, i32
  }
}

module attributes {stable_mosaic.version = 11 : i64} {
  func.func @_gemm_bias_act_kernel(%arg0: i32, %arg1: i32, %arg2: i32, %arg3: memref<112x640xbf16, #tpu.memory_space<vmem>>, %arg4: memref<640x128xbf16, #tpu.memory_space<vmem>>, %arg5: memref<8x128xf32, #tpu.memory_space<vmem>>, %arg6: memref<112x128xbf16, #tpu.memory_space<vmem>>, %arg7: memref<112x128xf32, #tpu.memory_space<vmem>>) attributes {dimension_semantics = [#tpu.dimension_semantics<parallel>, #tpu.dimension_semantics<parallel>, #tpu.dimension_semantics<arbitrary>], iteration_bounds = array<i64: 1, 1, 1>, scalar_prefetch = 0 : i64, scratch_operands = 1 : i64, tpu.core_type = #tpu.core_type<tc>, window_params = [{transform_indices = @transform_0, window_bounds = array<i64: 112, 640>}, {transform_indices = @transform_1, window_bounds = array<i64: 640, 128>}, {transform_indices = @transform_2, window_bounds = array<i64: 8, 128>}, {transform_indices = @transform_3, window_bounds = array<i64: 112, 128>}]} {
    %c0_i32 = arith.constant 0 : i32
    %0 = arith.cmpi eq, %arg2, %c0_i32 : i32
    %1 = arith.extui %0 : i1 to i32
    %c0_i32_0 = arith.constant 0 : i32
    %2 = arith.cmpi ne, %1, %c0_i32_0 : i32
    scf.if %2 {
      %cst_10 = arith.constant 0.000000e+00 : f32
      %12 = vector.broadcast %cst_10 : f32 to vector<112x128xf32>
      %c0_11 = arith.constant 0 : index
      %c0_12 = arith.constant 0 : index
      %13 = vector.load %arg7[%c0_11, %c0_12] : memref<112x128xf32, #tpu.memory_space<vmem>>, vector<112x128xf32>
      tpu.vector_store %arg7[%c0_11, %c0_12], %12 {strides = array<i32>} : memref<112x128xf32, #tpu.memory_space<vmem>>, vector<112x128xf32>,
    } else {
    }
    %c0 = arith.constant 0 : index
    %c0_1 = arith.constant 0 : index
    %3 = vector.load %arg7[%c0, %c0_1] : memref<112x128xf32, #tpu.memory_space<vmem>>, vector<112x128xf32>
    %c0_2 = arith.constant 0 : index
    %c0_3 = arith.constant 0 : index
    %4 = vector.load %arg3[%c0_2, %c0_3] : memref<112x640xbf16, #tpu.memory_space<vmem>>, vector<112x640xbf16>
    %c0_4 = arith.constant 0 : index
    %c0_5 = arith.constant 0 : index
    %5 = vector.load %arg4[%c0_4, %c0_5] : memref<640x128xbf16, #tpu.memory_space<vmem>>, vector<640x128xbf16>
    %cst = arith.constant dense<0.000000e+00> : vector<112x128xf32>
    %6 = tpu.matmul %4, %5, %cst {dimension_numbers = #tpu.dot_dimension_numbers<[1], [0], [0], [1], [0, 0, 1, 1], [], []>} : vector<112x640xbf16>, vector<640x128xbf16>, vector<112x128xf32> -> vector<112x128xf32>
    %7 = arith.addf %3, %6 : vector<112x128xf32>
    %c0_6 = arith.constant 0 : index
    %c0_7 = arith.constant 0 : index
    %8 = vector.load %arg7[%c0_6, %c0_7] : memref<112x128xf32, #tpu.memory_space<vmem>>, vector<112x128xf32>
    tpu.vector_store %arg7[%c0_6, %c0_7], %7 {strides = array<i32>} : memref<112x128xf32, #tpu.memory_space<vmem>>, vector<112x128xf32>,
    %c0_i32_8 = arith.constant 0 : i32
    %9 = arith.cmpi eq, %arg2, %c0_i32_8 : i32
    %10 = arith.extui %9 : i1 to i32
    %c0_i32_9 = arith.constant 0 : i32
    %11 = arith.cmpi ne, %10, %c0_i32_9 : i32
    scf.if %11 {
      %c0_10 = arith.constant 0 : index
      %c0_11 = arith.constant 0 : index
      %12 = vector.load %arg7[%c0_10, %c0_11] : memref<112x128xf32, #tpu.memory_space<vmem>>, vector<112x128xf32>
      %c0_12 = arith.constant 0 : index
      %c0_13 = arith.constant 0 : index
      %13 = vector.load %arg5[%c0_12, %c0_13] : memref<8x128xf32, #tpu.memory_space<vmem>>, vector<1x128xf32>
      %14 = vector.broadcast %13 : vector<1x128xf32> to vector<112x128xf32>
      %15 = arith.addf %12, %14 : vector<112x128xf32>
      %cst_14 = arith.constant 0.000000e+00 : f32
      %16 = vector.broadcast %cst_14 : f32 to vector<112x128xf32>
      %17 = arith.maximumf %15, %16 : vector<112x128xf32>
      %18 = arith.truncf %17 : vector<112x128xf32> to vector<112x128xbf16>
      %c0_15 = arith.constant 0 : index
      %c0_16 = arith.constant 0 : index
      %19 = vector.load %arg6[%c0_15, %c0_16] : memref<112x128xbf16, #tpu.memory_space<vmem>>, vector<112x128xbf16>
      tpu.vector_store %arg6[%c0_15, %c0_16], %18 {strides = array<i32>} : memref<112x128xbf16, #tpu.memory_space<vmem>>, vector<112x128xbf16>,
    } else {
    }
    return
  }
  func.func @transform_0(%arg0: i32, %arg1: i32, %arg2: i32) -> (i32, i32) {
    %c0_i32 = arith.constant 0 : i32
    return %arg0, %arg2 : i32, i32
  }
  func.func @transform_1(%arg0: i32, %arg1: i32, %arg2: i32) -> (i32, i32) {
    %c0_i32 = arith.constant 0 : i32
    return %arg2, %arg1 : i32, i32
  }
  func.func @transform_2(%arg0: i32, %arg1: i32, %arg2: i32) -> (i32, i32) {
    %c0_i32 = arith.constant 0 : i32
    %c0_i32_0 = arith.constant 0 : i32
    return %c0_i32, %arg1 : i32, i32
  }
  func.func @transform_3(%arg0: i32, %arg1: i32, %arg2: i32) -> (i32, i32) {
    %c0_i32 = arith.constant 0 : i32
    return %arg0, %arg1 : i32, i32
  }
}

module attributes {stable_mosaic.version = 11 : i64} {
  func.func @_fused_fc_kernel(%arg0: i32, %arg1: i32, %arg2: memref<16x1664xbf16, #tpu.memory_space<vmem>>, %arg3: memref<1664x512xbf16, #tpu.memory_space<vmem>>, %arg4: memref<8x512xf32, #tpu.memory_space<vmem>>, %arg5: memref<512x128xbf16, #tpu.memory_space<vmem>>, %arg6: memref<8x128xf32, #tpu.memory_space<vmem>>, %arg7: memref<16x128xf32, #tpu.memory_space<vmem>>, %arg8: memref<16x512xf32, #tpu.memory_space<vmem>>) attributes {dimension_semantics = [#tpu.dimension_semantics<parallel>, #tpu.dimension_semantics<arbitrary>], iteration_bounds = array<i64: 1, 2>, scalar_prefetch = 0 : i64, scratch_operands = 1 : i64, tpu.core_type = #tpu.core_type<tc>, window_params = [{transform_indices = @transform_0, window_bounds = array<i64: 16, 1664>}, {transform_indices = @transform_1, window_bounds = array<i64: 1664, 512>}, {pipeline_mode = #tpu.pipeline_mode<synchronous>, transform_indices = @transform_2, window_bounds = array<i64: 8, 512>}, {pipeline_mode = #tpu.pipeline_mode<synchronous>, transform_indices = @transform_3, window_bounds = array<i64: 512, 128>}, {pipeline_mode = #tpu.pipeline_mode<synchronous>, transform_indices = @transform_4, window_bounds = array<i64: 8, 128>}, {transform_indices = @transform_5, window_bounds = array<i64: 16, 128>}]} {
    %c0_i32 = arith.constant 0 : i32
    %0 = arith.cmpi eq, %arg1, %c0_i32 : i32
    %1 = arith.extui %0 : i1 to i32
    %c0_i32_0 = arith.constant 0 : i32
    %2 = arith.cmpi ne, %1, %c0_i32_0 : i32
    scf.if %2 {
      %cst_9 = arith.constant 0.000000e+00 : f32
      %12 = vector.broadcast %cst_9 : f32 to vector<16x512xf32>
      %c0_10 = arith.constant 0 : index
      %c0_11 = arith.constant 0 : index
      %13 = vector.load %arg8[%c0_10, %c0_11] : memref<16x512xf32, #tpu.memory_space<vmem>>, vector<16x512xf32>
      tpu.vector_store %arg8[%c0_10, %c0_11], %12 {strides = array<i32>} : memref<16x512xf32, #tpu.memory_space<vmem>>, vector<16x512xf32>,
    } else {
    }
    %c0 = arith.constant 0 : index
    %c0_1 = arith.constant 0 : index
    %3 = vector.load %arg8[%c0, %c0_1] : memref<16x512xf32, #tpu.memory_space<vmem>>, vector<16x512xf32>
    %c0_2 = arith.constant 0 : index
    %c0_3 = arith.constant 0 : index
    %4 = vector.load %arg2[%c0_2, %c0_3] : memref<16x1664xbf16, #tpu.memory_space<vmem>>, vector<16x1664xbf16>
    %c0_4 = arith.constant 0 : index
    %c0_5 = arith.constant 0 : index
    %5 = vector.load %arg3[%c0_4, %c0_5] : memref<1664x512xbf16, #tpu.memory_space<vmem>>, vector<1664x512xbf16>
    %cst = arith.constant dense<0.000000e+00> : vector<16x512xf32>
    %6 = tpu.matmul %4, %5, %cst {dimension_numbers = #tpu.dot_dimension_numbers<[1], [0], [0], [1], [0, 0, 1, 1], [], []>} : vector<16x1664xbf16>, vector<1664x512xbf16>, vector<16x512xf32> -> vector<16x512xf32>
    %7 = arith.addf %3, %6 : vector<16x512xf32>
    %c0_6 = arith.constant 0 : index
    %c0_7 = arith.constant 0 : index
    %8 = vector.load %arg8[%c0_6, %c0_7] : memref<16x512xf32, #tpu.memory_space<vmem>>, vector<16x512xf32>
    tpu.vector_store %arg8[%c0_6, %c0_7], %7 {strides = array<i32>} : memref<16x512xf32, #tpu.memory_space<vmem>>, vector<16x512xf32>,
    %c1_i32 = arith.constant 1 : i32
    %9 = arith.cmpi eq, %arg1, %c1_i32 : i32
    %10 = arith.extui %9 : i1 to i32
    %c0_i32_8 = arith.constant 0 : i32
    %11 = arith.cmpi ne, %10, %c0_i32_8 : i32
    scf.if %11 {
      %c0_9 = arith.constant 0 : index
      %c0_10 = arith.constant 0 : index
      %12 = vector.load %arg8[%c0_9, %c0_10] : memref<16x512xf32, #tpu.memory_space<vmem>>, vector<16x512xf32>
      %c0_11 = arith.constant 0 : index
      %c0_12 = arith.constant 0 : index
      %13 = vector.load %arg4[%c0_11, %c0_12] : memref<8x512xf32, #tpu.memory_space<vmem>>, vector<1x512xf32>
      %14 = vector.broadcast %13 : vector<1x512xf32> to vector<16x512xf32>
      %15 = arith.addf %12, %14 : vector<16x512xf32>
      %cst_13 = arith.constant 0.000000e+00 : f32
      %16 = vector.broadcast %cst_13 : f32 to vector<16x512xf32>
      %17 = arith.maximumf %15, %16 : vector<16x512xf32>
      %18 = arith.truncf %17 : vector<16x512xf32> to vector<16x512xbf16>
      %c0_14 = arith.constant 0 : index
      %c0_15 = arith.constant 0 : index
      %19 = vector.load %arg5[%c0_14, %c0_15] : memref<512x128xbf16, #tpu.memory_space<vmem>>, vector<512x128xbf16>
      %cst_16 = arith.constant dense<0.000000e+00> : vector<16x128xf32>
      %20 = tpu.matmul %18, %19, %cst_16 {dimension_numbers = #tpu.dot_dimension_numbers<[1], [0], [0], [1], [0, 0, 1, 1], [], []>} : vector<16x512xbf16>, vector<512x128xbf16>, vector<16x128xf32> -> vector<16x128xf32>
      %c0_17 = arith.constant 0 : index
      %c0_18 = arith.constant 0 : index
      %21 = vector.load %arg6[%c0_17, %c0_18] : memref<8x128xf32, #tpu.memory_space<vmem>>, vector<1x128xf32>
      %22 = vector.broadcast %21 : vector<1x128xf32> to vector<16x128xf32>
      %23 = arith.addf %20, %22 : vector<16x128xf32>
      %c0_19 = arith.constant 0 : index
      %c0_20 = arith.constant 0 : index
      %24 = vector.load %arg7[%c0_19, %c0_20] : memref<16x128xf32, #tpu.memory_space<vmem>>, vector<16x128xf32>
      tpu.vector_store %arg7[%c0_19, %c0_20], %23 {strides = array<i32>} : memref<16x128xf32, #tpu.memory_space<vmem>>, vector<16x128xf32>,
    } else {
    }
    return
  }
  func.func @transform_0(%arg0: i32, %arg1: i32) -> (i32, i32) {
    %c0_i32 = arith.constant 0 : i32
    return %arg0, %arg1 : i32, i32
  }
  func.func @transform_1(%arg0: i32, %arg1: i32) -> (i32, i32) {
    %c0_i32 = arith.constant 0 : i32
    %c0_i32_0 = arith.constant 0 : i32
    return %arg1, %c0_i32 : i32, i32
  }
  func.func @transform_2(%arg0: i32, %arg1: i32) -> (i32, i32) {
    %c0_i32 = arith.constant 0 : i32
    %c0_i32_0 = arith.constant 0 : i32
    %c0_i32_1 = arith.constant 0 : i32
    return %c0_i32, %c0_i32_0 : i32, i32
  }
  func.func @transform_3(%arg0: i32, %arg1: i32) -> (i32, i32) {
    %c0_i32 = arith.constant 0 : i32
    %c0_i32_0 = arith.constant 0 : i32
    %c0_i32_1 = arith.constant 0 : i32
    return %c0_i32, %c0_i32_0 : i32, i32
  }
  func.func @transform_4(%arg0: i32, %arg1: i32) -> (i32, i32) {
    %c0_i32 = arith.constant 0 : i32
    %c0_i32_0 = arith.constant 0 : i32
    %c0_i32_1 = arith.constant 0 : i32
    return %c0_i32, %c0_i32_0 : i32, i32
  }
  func.func @transform_5(%arg0: i32, %arg1: i32) -> (i32, i32) {
    %c0_i32 = arith.constant 0 : i32
    %c0_i32_0 = arith.constant 0 : i32
    return %arg0, %c0_i32 : i32, i32
  }
}

</mosaic_0001>

<bundles_post_ra>
// kernel: qnetwork_forward.4
= control target key start
LH: loop header
LB: loop body
LE: loop exit
PB: predicated region body
PF: predicated region fallthrough
CT: control target
= control target key end

     0   :  { %s2183_s12 = smov 0   ;;  %s2185_s13 = smov 0   ;;  %s2434_s0 = inlined_call_operand.vmem [shape: bf16[800,256], index: 0, kind: input, shape index: {}]   ;;  %s2435_s1 = inlined_call_operand.vmem [shape: bf16[256,128], index: 1, kind: input, shape index: {}]   ;;  %s2436_s2 = inlined_call_operand.vmem [shape: f32[8,128], index: 2, kind: input, shape index: {}]   ;;  %s2437_s3 = inlined_call_operand.vmem [shape: bf16[800,128], index: 3, kind: output, shape index: {}]  }
   0x1   :  { %s2187_s14 = smov 0  }
   0x2 LB: > { %s32_s15 = sadd.s32 1, %s2156_s13  ;;  %p1667_p0 = scmp.ge.s32.totalorder %s2160_s14, 1  ;;  %s2160_s14 = sphi %s2187_s14, %s13_s14   ;;  %s2156_s13 = sphi %s2185_s13, %s2439_s13   ;;  %s2152_s12 = sphi %s2183_s12, %s2438_s12  }
   0x3   : > { %p34_p1 = scmp.ge.s32.totalorder %s32_s15, 2  ;;  %p192_p2 = scmp.lt.s32.totalorder %s2160_s14, 3 }
   0x5   : > { %s2441_s15 = smov (%p34_p1, %s32_s15), 0  ;;  %p193_p3 = pnand %p1667_p0, %p192_p2 }
   0x6   : > { %v2047_v0 = vld [vmem:[%s2435_s1] sm:$0xff] (!%p193_p3)   ;;  %v2162_v1 = vmov (!%p193_p3), 0   ;;  %s236_s18 = smul.u32 (!%p193_p3), 50, %s2152_s12  ;;  %v2048_v2 = vld [vmem:[%s2435_s1 + $0x8] sm:$0xff] (!%p193_p3)   ;;  %v2049_v3 = vld [vmem:[%s2435_s1 + $0x10] sm:$0xff] (!%p193_p3)  }
   0x7   : > { %196 = sbr.rel (%p193_p3) target bundleno = 388 (0x184), region = 32  ;;  %803 = vmatprep.subr.bf16.mxu0 (!%p193_p3), %v2162_v1  ;;  %1990 = vmatprep.subr.bf16.mxu1 (!%p193_p3), %v2162_v1  ;;  %v2050_v4 = vld [vmem:[%s2435_s1 + $0x18] sm:$0xff] (!%p193_p3)   ;;  %v2051_v5 = vld [vmem:[%s2435_s1 + $0x20] sm:$0xff] (!%p193_p3)   ;;  %v2052_v7 = vld [vmem:[%s2435_s1 + $0x28] sm:$0xff] (!%p193_p3)  }
   0x8   : > { %804 = vmatpush1.bf16.msra.mxu0 (!%p193_p3), %v2047_v0  ;;  %2006 = vmatpush1.bf16.msra.mxu1 (!%p193_p3), %v2047_v0  ;;  %p238_p4 = scmp.lt.s32.totalorder (!%p193_p3), %s236_s18, 99  ;;  %v2053_v9 = vld [vmem:[%s2435_s1 + $0x30] sm:$0xff] (!%p193_p3)   ;;  %v2054_v10 = vld [vmem:[%s2435_s1 + $0x38] sm:$0xff] (!%p193_p3)   ;;  %v2055_v11 = vld [vmem:[%s2435_s1 + $0x40] sm:$0xff] (!%p193_p3)  }
   0x9   : > { %805 = vmatprep.subr.bf16.mxu0 (!%p193_p3), %v2162_v1  ;;  %1991 = vmatprep.subr.bf16.mxu1 (!%p193_p3), %v2162_v1  ;;  %v2056_v12 = vld [vmem:[%s2435_s1 + $0x48] sm:$0xff] (!%p193_p3)   ;;  %v2057_v13 = vld [vmem:[%s2435_s1 + $0x50] sm:$0xff] (!%p193_p3)   ;;  %v2058_v14 = vld [vmem:[%s2435_s1 + $0x58] sm:$0xff] (!%p193_p3)  }
   0xa   : > { %v2059_v15 = vld [vmem:[%s2435_s1 + $0x60] sm:$0xff] (!%p193_p3)   ;;  %v2060_v16 = vld [vmem:[%s2435_s1 + $0x68] sm:$0xff] (!%p193_p3)   ;;  %v2061_v17 = vld [vmem:[%s2435_s1 + $0x70] sm:$0xff] (!%p193_p3)  }
   0xb   : > { %v2062_v18 = vld [vmem:[%s2435_s1 + $0x78] sm:$0xff] (!%p193_p3)  }
   0xc   : > { %806 = vmatpush1.bf16.msra.mxu0 (!%p193_p3), %v2048_v2  ;;  %2007 = vmatpush1.bf16.msra.mxu1 (!%p193_p3), %v2048_v2 }
   0xd   : > { %807 = vmatprep.subr.bf16.mxu0 (!%p193_p3), %v2162_v1  ;;  %1992 = vmatprep.subr.bf16.mxu1 (!%p193_p3), %v2162_v1 }
   0xe   : > { %s2443_s18 = smov (!%p238_p4, %s236_s18), 99 }
   0xf   : > { %s1790_s25 = sshll.u32 %s2443_s18, 3  ;;  %s1670_s6 = sshll.u32 %s2443_s18, 2 }
  0x10   : > { %808 = vmatpush1.bf16.msra.mxu0 %v2049_v3  ;;  %2008 = vmatpush1.bf16.msra.mxu1 %v2049_v3  ;;  %s2230_s30 = scalar_lea.vmem %s2434_s0, %s1790_s25  ;;  %v2342_v3 = vld [vmem:[%s2436_s2] ss:$0 sm:$0xff]  ;;  %s2352_s8 = scalar_lea.vmem %s2437_s3, %s1670_s6 }
  0x11   : > { %809 = vmatprep.subr.bf16.mxu0 %v2162_v1  ;;  %1993 = vmatprep.subr.bf16.mxu1 %v2162_v1  ;;  %v2065_v6 = vld [vmem:[%s2230_s30 + $0x4] ss:$8 sps:$4 sm:$0xff]   ;;  %v2068_v8 = vld [vmem:[%s2230_s30 + $0xd4] ss:$8 sps:$4 sm:$0xff]   ;;  %v2063_v19 = vld [vmem:[%s2230_s30] ss:$8 sps:$4 sm:$0xff]  }
  0x12   : > { %835 = vmatprep.mubr.bf16.mxu0 %v2065_v6  ;;  %939 = vmatprep.mubr.bf16.mxu1 %v2068_v8  ;;  %v2066_v20 = vld [vmem:[%s2230_s30 + $0xd0] ss:$8 sps:$4 sm:$0xff]   ;;  %v2069_v21 = vld [vmem:[%s2230_s30 + $0x14] ss:$8 sps:$4 sm:$0xff]   ;;  %v2072_v22 = vld [vmem:[%s2230_s30 + $0xe4] ss:$8 sps:$4 sm:$0xff]  }
  0x13   : > { %v2071_v23 = vld [vmem:[%s2230_s30 + $0x10] ss:$8 sps:$4 sm:$0xff]   ;;  %v2074_v24 = vld [vmem:[%s2230_s30 + $0xe0] ss:$8 sps:$4 sm:$0xff]   ;;  %v2075_v25 = vld [vmem:[%s2230_s30 + $0x24] ss:$8 sps:$4 sm:$0xff]  }
  0x14   : > { %810 = vmatpush1.bf16.msra.mxu0 %v2050_v4  ;;  %2009 = vmatpush1.bf16.msra.mxu1 %v2050_v4  ;;  %v2078_v26 = vld [vmem:[%s2230_s30 + $0xf4] ss:$8 sps:$4 sm:$0xff]   ;;  %v2077_v27 = vld [vmem:[%s2230_s30 + $0x20] ss:$8 sps:$4 sm:$0xff]   ;;  %v2080_v28 = vld [vmem:[%s2230_s30 + $0xf0] ss:$8 sps:$4 sm:$0xff]  }
  0x15   : > { %811 = vmatprep.subr.bf16.mxu0 %v2162_v1  ;;  %1994 = vmatprep.subr.bf16.mxu1 %v2162_v1  ;;  %v2081_v29 = vld [vmem:[%s2230_s30 + $0x34] ss:$8 sps:$4 sm:$0xff]   ;;  %v2084_v30 = vld [vmem:[%s2230_s30 + $0x104] ss:$8 sps:$4 sm:$0xff]   ;;  %v2083_v31 = vld [vmem:[%s2230_s30 + $0x30] ss:$8 sps:$4 sm:$0xff]  }
  0x16   : > { %v2086_v32 = vld [vmem:[%s2230_s30 + $0x100] ss:$8 sps:$4 sm:$0xff]   ;;  %v2087_v33 = vld [vmem:[%s2230_s30 + $0x44] ss:$8 sps:$4 sm:$0xff]   ;;  %v2090_v34 = vld [vmem:[%s2230_s30 + $0x114] ss:$8 sps:$4 sm:$0xff]  }
  0x17   : > { %v2089_v35 = vld [vmem:[%s2230_s30 + $0x40] ss:$8 sps:$4 sm:$0xff]   ;;  %v2092_v36 = vld [vmem:[%s2230_s30 + $0x110] ss:$8 sps:$4 sm:$0xff]   ;;  %v2093_v37 = vld [vmem:[%s2230_s30 + $0x54] ss:$8 sps:$4 sm:$0xff]  }
  0x18   : > { %812 = vmatpush1.bf16.msra.mxu0 %v2051_v5  ;;  %2010 = vmatpush1.bf16.msra.mxu1 %v2051_v5  ;;  %v2096_v38 = vld [vmem:[%s2230_s30 + $0x124] ss:$8 sps:$4 sm:$0xff]   ;;  %v2095_v39 = vld [vmem:[%s2230_s30 + $0x50] ss:$8 sps:$4 sm:$0xff]   ;;  %v2098_v40 = vld [vmem:[%s2230_s30 + $0x120] ss:$8 sps:$4 sm:$0xff]  }
  0x19   : > { %813 = vmatprep.subr.bf16.mxu0 %v2162_v1  ;;  %1995 = vmatprep.subr.bf16.mxu1 %v2162_v1  ;;  %v2099_v41 = vld [vmem:[%s2230_s30 + $0x64] ss:$8 sps:$4 sm:$0xff]   ;;  %v2102_v42 = vld [vmem:[%s2230_s30 + $0x134] ss:$8 sps:$4 sm:$0xff]   ;;  %v2101_v43 = vld [vmem:[%s2230_s30 + $0x60] ss:$8 sps:$4 sm:$0xff]  }
  0x1a   : > { %v2104_v44 = vld [vmem:[%s2230_s30 + $0x130] ss:$8 sps:$4 sm:$0xff]   ;;  %v2105_v45 = vld [vmem:[%s2230_s30 + $0x74] ss:$8 sps:$4 sm:$0xff]   ;;  %v2108_v46 = vld [vmem:[%s2230_s30 + $0x144] ss:$8 sps:$4 sm:$0xff]  }
  0x1b   : > { %v2107_v47 = vld [vmem:[%s2230_s30 + $0x70] ss:$8 sps:$4 sm:$0xff]   ;;  %v2110_v48 = vld [vmem:[%s2230_s30 + $0x140] ss:$8 sps:$4 sm:$0xff]   ;;  %v2111_v49 = vld [vmem:[%s2230_s30 + $0x84] ss:$8 sps:$4 sm:$0xff]  }
  0x1c   : > { %814 = vmatpush1.bf16.msra.mxu0 %v2052_v7  ;;  %2011 = vmatpush1.bf16.msra.mxu1 %v2052_v7  ;;  %v2114_v50 = vld [vmem:[%s2230_s30 + $0x154] ss:$8 sps:$4 sm:$0xff]   ;;  %v2113_v51 = vld [vmem:[%s2230_s30 + $0x80] ss:$8 sps:$4 sm:$0xff]   ;;  %v2116_v52 = vld [vmem:[%s2230_s30 + $0x150] ss:$8 sps:$4 sm:$0xff]  }
  0x1d   : > { %815 = vmatprep.subr.bf16.mxu0 %v2162_v1  ;;  %1996 = vmatprep.subr.bf16.mxu1 %v2162_v1  ;;  %v2117_v53 = vld [vmem:[%s2230_s30 + $0x94] ss:$8 sps:$4 sm:$0xff]   ;;  %v2120_v54 = vld [vmem:[%s2230_s30 + $0x164] ss:$8 sps:$4 sm:$0xff]   ;;  %v2119_v55 = vld [vmem:[%s2230_s30 + $0x90] ss:$8 sps:$4 sm:$0xff]  }
  0x1e   : > { %v2122_v56 = vld [vmem:[%s2230_s30 + $0x160] ss:$8 sps:$4 sm:$0xff]   ;;  %v2123_v57 = vld [vmem:[%s2230_s30 + $0xa4] ss:$8 sps:$4 sm:$0xff]   ;;  %v2126_v58 = vld [vmem:[%s2230_s30 + $0x174] ss:$8 sps:$4 sm:$0xff]  }
  0x1f   : > { %v2125_v59 = vld [vmem:[%s2230_s30 + $0xa0] ss:$8 sps:$4 sm:$0xff]   ;;  %v2128_v60 = vld [vmem:[%s2230_s30 + $0x170] ss:$8 sps:$4 sm:$0xff]   ;;  %v2129_v61 = vld [vmem:[%s2230_s30 + $0xb4] ss:$8 sps:$4 sm:$0xff]  }
  0x20   : > { %816 = vmatpush1.bf16.msra.mxu0 %v2053_v9  ;;  %2012 = vmatpush1.bf16.msra.mxu1 %v2053_v9  ;;  %v2132_v62 = vld [vmem:[%s2230_s30 + $0x184] ss:$8 sps:$4 sm:$0xff]   ;;  %v2131_v63 = vld [vmem:[%s2230_s30 + $0xb0] ss:$8 sps:$4 sm:$0xff]   ;;  %v2134_v0 = vld [vmem:[%s2230_s30 + $0x180] ss:$8 sps:$4 sm:$0xff]  }
  0x21   : > { %817 = vmatprep.subr.bf16.mxu0 %v2162_v1  ;;  %1997 = vmatprep.subr.bf16.mxu1 %v2162_v1  ;;  %v2137_v2 = vld [vmem:[%s2230_s30 + $0xc0] ss:$8 sps:$4 sm:$0xff]  }
  0x24   : > { %818 = vmatpush1.bf16.msra.mxu0 %v2054_v10  ;;  %2013 = vmatpush1.bf16.msra.mxu1 %v2054_v10 }
  0x25   : > { %819 = vmatprep.subr.bf16.mxu0 %v2162_v1  ;;  %1998 = vmatprep.subr.bf16.mxu1 %v2162_v1 }
  0x28   : > { %820 = vmatpush1.bf16.msra.mxu0 %v2055_v11  ;;  %2014 = vmatpush1.bf16.msra.mxu1 %v2055_v11 }
  0x29   : > { %821 = vmatprep.subr.bf16.mxu0 %v2162_v1  ;;  %1999 = vmatprep.subr.bf16.mxu1 %v2162_v1 }
  0x2c   : > { %822 = vmatpush1.bf16.msra.mxu0 %v2056_v12  ;;  %2015 = vmatpush1.bf16.msra.mxu1 %v2056_v12 }
  0x2d   : > { %823 = vmatprep.subr.bf16.mxu0 %v2162_v1  ;;  %2000 = vmatprep.subr.bf16.mxu1 %v2162_v1 }
  0x30   : > { %824 = vmatpush1.bf16.msra.mxu0 %v2057_v13  ;;  %2016 = vmatpush1.bf16.msra.mxu1 %v2057_v13 }
  0x31   : > { %825 = vmatprep.subr.bf16.mxu0 %v2162_v1  ;;  %2001 = vmatprep.subr.bf16.mxu1 %v2162_v1 }
  0x34   : > { %826 = vmatpush1.bf16.msra.mxu0 %v2058_v14  ;;  %2017 = vmatpush1.bf16.msra.mxu1 %v2058_v14 }
  0x35   : > { %827 = vmatprep.subr.bf16.mxu0 %v2162_v1  ;;  %2002 = vmatprep.subr.bf16.mxu1 %v2162_v1 }
  0x38   : > { %828 = vmatpush1.bf16.msra.mxu0 %v2059_v15  ;;  %2018 = vmatpush1.bf16.msra.mxu1 %v2059_v15 }
  0x39   : > { %829 = vmatprep.subr.bf16.mxu0 %v2162_v1  ;;  %2003 = vmatprep.subr.bf16.mxu1 %v2162_v1 }
  0x3c   : > { %830 = vmatpush1.bf16.msra.mxu0 %v2060_v16  ;;  %2019 = vmatpush1.bf16.msra.mxu1 %v2060_v16 }
  0x3d   : > { %831 = vmatprep.subr.bf16.mxu0 %v2162_v1  ;;  %2004 = vmatprep.subr.bf16.mxu1 %v2162_v1 }
  0x40   : > { %832 = vmatpush1.bf16.msra.mxu0 %v2061_v17  ;;  %2020 = vmatpush1.bf16.msra.mxu1 %v2061_v17 }
  0x41   : > { %833 = vmatprep.subr.bf16.mxu0 %v2162_v1  ;;  %2005 = vmatprep.subr.bf16.mxu1 %v2162_v1  ;;  %v2135_v1 = vld [vmem:[%s2230_s30 + $0xc4] ss:$8 sps:$4 sm:$0xff]  }
  0x44   : > { %834 = vmatpush1.bf16.msra.mxu0 %v2062_v18  ;;  %2021 = vmatpush1.bf16.msra.mxu1 %v2062_v18 }
  0x47   : > { %836 = vmatmul.mubr.bf16.vlgmr.msra.gmra.mrb[0].mxu0 %v2063_v19  ;;  %940 = vmatmul.mubr.bf16.vlgmr.msra.gmra.mrb[0].mxu1 %v2066_v20 }
  0x48   : > { %843 = vmatprep.mubr.bf16.mxu0 %v2069_v21  ;;  %947 = vmatprep.mubr.bf16.mxu1 %v2072_v22 }
  0x4f   : > { %844 = vmatmul.mubr.bf16.gmra.mrb[4].mxu0 %v2071_v23  ;;  %948 = vmatmul.mubr.bf16.gmra.mrb[4].mxu1 %v2074_v24 }
  0x50   : > { %851 = vmatprep.mubr.bf16.mxu0 %v2075_v25  ;;  %955 = vmatprep.mubr.bf16.mxu1 %v2078_v26 }
  0x57   : > { %852 = vmatmul.mubr.bf16.gmra.mrb[8].mxu0 %v2077_v27  ;;  %956 = vmatmul.mubr.bf16.gmra.mrb[8].mxu1 %v2080_v28 }
  0x58   : > { %859 = vmatprep.mubr.bf16.mxu0 %v2081_v29  ;;  %963 = vmatprep.mubr.bf16.mxu1 %v2084_v30 }
  0x5f   : > { %860 = vmatmul.mubr.bf16.gmra.mrb[12].mxu0 %v2083_v31  ;;  %964 = vmatmul.mubr.bf16.gmra.mrb[12].mxu1 %v2086_v32 }
  0x60   : > { %867 = vmatprep.mubr.bf16.mxu0 %v2087_v33  ;;  %971 = vmatprep.mubr.bf16.mxu1 %v2090_v34 }
  0x67   : > { %868 = vmatmul.mubr.bf16.gmra.mrb[16].mxu0 %v2089_v35  ;;  %972 = vmatmul.mubr.bf16.gmra.mrb[16].mxu1 %v2092_v36 }
  0x68   : > { %875 = vmatprep.mubr.bf16.mxu0 %v2093_v37  ;;  %979 = vmatprep.mubr.bf16.mxu1 %v2096_v38 }
  0x6f   : > { %876 = vmatmul.mubr.bf16.gmra.mrb[20].mxu0 %v2095_v39  ;;  %980 = vmatmul.mubr.bf16.gmra.mrb[20].mxu1 %v2098_v40 }
  0x70   : > { %883 = vmatprep.mubr.bf16.mxu0 %v2099_v41  ;;  %987 = vmatprep.mubr.bf16.mxu1 %v2102_v42 }
  0x77   : > { %884 = vmatmul.mubr.bf16.gmra.mrb[24].mxu0 %v2101_v43  ;;  %988 = vmatmul.mubr.bf16.gmra.mrb[24].mxu1 %v2104_v44 }
  0x78   : > { %891 = vmatprep.mubr.bf16.mxu0 %v2105_v45  ;;  %995 = vmatprep.mubr.bf16.mxu1 %v2108_v46 }
  0x7f   : > { %892 = vmatmul.mubr.bf16.gmra.mrb[28].mxu0 %v2107_v47  ;;  %996 = vmatmul.mubr.bf16.gmra.mrb[28].mxu1 %v2110_v48 }
  0x80   : > { %899 = vmatprep.mubr.bf16.mxu0 %v2111_v49  ;;  %1003 = vmatprep.mubr.bf16.mxu1 %v2114_v50 }
  0x87   : > { %900 = vmatmul.mubr.bf16.gmra.mrb[32].mxu0 %v2113_v51  ;;  %1004 = vmatmul.mubr.bf16.gmra.mrb[32].mxu1 %v2116_v52 }
  0x88   : > { %907 = vmatprep.mubr.bf16.mxu0 %v2117_v53  ;;  %1011 = vmatprep.mubr.bf16.mxu1 %v2120_v54 }
  0x8f   : > { %908 = vmatmul.mubr.bf16.gmra.mrb[36].mxu0 %v2119_v55  ;;  %1012 = vmatmul.mubr.bf16.gmra.mrb[36].mxu1 %v2122_v56 }
  0x90   : > { %915 = vmatprep.mubr.bf16.mxu0 %v2123_v57  ;;  %1019 = vmatprep.mubr.bf16.mxu1 %v2126_v58 }
  0x97   : > { %916 = vmatmul.mubr.bf16.gmra.mrb[40].mxu0 %v2125_v59  ;;  %1020 = vmatmul.mubr.bf16.gmra.mrb[40].mxu1 %v2128_v60 }
  0x98   : > { %923 = vmatprep.mubr.bf16.mxu0 %v2129_v61  ;;  %1027 = vmatprep.mubr.bf16.mxu1 %v2132_v62 }
  0x9f   : > { %924 = vmatmul.mubr.bf16.gmra.mrb[44].mxu0 %v2131_v63  ;;  %1028 = vmatmul.mubr.bf16.gmra.mrb[44].mxu1 %v2134_v0 }
  0xa0   : > { %931 = vmatprep.mubr.bf16.mxu0 %v2135_v1 }
  0xa7   : > { %932 = vmatmul.mubr.bf16.gmra.mrb[48].mxu0 %v2137_v2 }
 0x11a   : > { %v837_v4 = vpop.f32.mrb[0].mxu0  ;;  %v941_v5 = vpop.f32.mrb[0].mxu1 }
 0x11b   : > { %v1194_v6 = vadd.f32 %v2342_v3, %v837_v4  ;;  %v839_v7 = vpop.f32.mrb[1].mxu0  ;;  %v1220_v8 = vadd.f32 %v2342_v3, %v941_v5  ;;  %v943_v9 = vpop.f32.mrb[1].mxu1 }
 0x11c   : > { %v840_v10 = vpop.f32.mrb[2].mxu0  ;;  %v944_v11 = vpop.f32.mrb[2].mxu1 }
 0x11d   : > { %v1195_v12 = vadd.f32 %v2342_v3, %v840_v10  ;;  %v842_v13 = vpop.f32.mrb[3].mxu0  ;;  %v1270_v14 = vmax.f32 %v1220_v8, 0.0  ;;  %v1221_v15 = vadd.f32 %v2342_v3, %v944_v11  ;;  %v946_v16 = vpop.f32.mrb[3].mxu1  ;;  %v1244_v17 = vmax.f32 %v1194_v6, 0.0 }
 0x11f   : > { %v1245_v18 = vmax.f32 %v1195_v12, 0.0  ;;  %v1271_v19 = vmax.f32 %v1221_v15, 0.0 }
 0x121   : > { %v1844_v20 = vpack.c.bf16 %v1245_v18, %v1244_v17  ;;  %v1909_v21 = vpack.c.bf16 %v1271_v19, %v1270_v14 }
 0x122   : > { %v845_v22 = vpop.f32.mrb[4].mxu0  ;;  %v949_v23 = vpop.f32.mrb[4].mxu1 }
 0x123   : > { %1845 = vst [vmem:[%s2352_s8] sm:$0xff] %v1844_v20   ;;  %1978 = vst [vmem:[%s2352_s8 + $0x68] sm:$0xff] %v1909_v21   ;;  %v1196_v24 = vadd.f32 %v2342_v3, %v845_v22  ;;  %v847_v25 = vpop.f32.mrb[5].mxu0  ;;  %v1222_v26 = vadd.f32 %v2342_v3, %v949_v23  ;;  %v951_v27 = vpop.f32.mrb[5].mxu1 }
 0x124   : > { %v848_v28 = vpop.f32.mrb[6].mxu0  ;;  %v952_v29 = vpop.f32.mrb[6].mxu1 }
 0x125   : > { %v1197_v30 = vadd.f32 %v2342_v3, %v848_v28  ;;  %v850_v31 = vpop.f32.mrb[7].mxu0  ;;  %v1272_v32 = vmax.f32 %v1222_v26, 0.0  ;;  %v1223_v33 = vadd.f32 %v2342_v3, %v952_v29  ;;  %v954_v34 = vpop.f32.mrb[7].mxu1  ;;  %v1246_v35 = vmax.f32 %v1196_v24, 0.0 }
 0x127   : > { %v1247_v36 = vmax.f32 %v1197_v30, 0.0  ;;  %v1273_v37 = vmax.f32 %v1223_v33, 0.0 }
 0x129   : > { %v1849_v38 = vpack.c.bf16 %v1247_v36, %v1246_v35  ;;  %v1914_v39 = vpack.c.bf16 %v1273_v37, %v1272_v32 }
 0x12a   : > { %v853_v40 = vpop.f32.mrb[8].mxu0  ;;  %v957_v41 = vpop.f32.mrb[8].mxu1 }
 0x12b   : > { %1966 = vst [vmem:[%s2352_s8 + $0x8] sm:$0xff] %v1849_v38   ;;  %1979 = vst [vmem:[%s2352_s8 + $0x70] sm:$0xff] %v1914_v39   ;;  %v1198_v42 = vadd.f32 %v2342_v3, %v853_v40  ;;  %v855_v43 = vpop.f32.mrb[9].mxu0  ;;  %v1224_v44 = vadd.f32 %v2342_v3, %v957_v41  ;;  %v959_v45 = vpop.f32.mrb[9].mxu1 }
 0x12c   : > { %v856_v46 = vpop.f32.mrb[10].mxu0  ;;  %v960_v47 = vpop.f32.mrb[10].mxu1 }
 0x12d   : > { %v1199_v48 = vadd.f32 %v2342_v3, %v856_v46  ;;  %v858_v49 = vpop.f32.mrb[11].mxu0  ;;  %v1274_v50 = vmax.f32 %v1224_v44, 0.0  ;;  %v1225_v51 = vadd.f32 %v2342_v3, %v960_v47  ;;  %v962_v52 = vpop.f32.mrb[11].mxu1  ;;  %v1248_v53 = vmax.f32 %v1198_v42, 0.0 }
 0x12f   : > { %v1249_v54 = vmax.f32 %v1199_v48, 0.0  ;;  %v1275_v55 = vmax.f32 %v1225_v51, 0.0 }
 0x131   : > { %v1854_v56 = vpack.c.bf16 %v1249_v54, %v1248_v53  ;;  %v1919_v57 = vpack.c.bf16 %v1275_v55, %v1274_v50 }
 0x132   : > { %v861_v58 = vpop.f32.mrb[12].mxu0  ;;  %v965_v59 = vpop.f32.mrb[12].mxu1 }
 0x133   : > { %1967 = vst [vmem:[%s2352_s8 + $0x10] sm:$0xff] %v1854_v56   ;;  %1980 = vst [vmem:[%s2352_s8 + $0x78] sm:$0xff] %v1919_v57   ;;  %v1200_v60 = vadd.f32 %v2342_v3, %v861_v58  ;;  %v863_v61 = vpop.f32.mrb[13].mxu0  ;;  %v1226_v62 = vadd.f32 %v2342_v3, %v965_v59  ;;  %v967_v63 = vpop.f32.mrb[13].mxu1 }
 0x134   : > { %v864_v0 = vpop.f32.mrb[14].mxu0  ;;  %v968_v1 = vpop.f32.mrb[14].mxu1 }
 0x135   : > { %v1201_v2 = vadd.f32 %v2342_v3, %v864_v0  ;;  %v866_v4 = vpop.f32.mrb[15].mxu0  ;;  %v1276_v5 = vmax.f32 %v1226_v62, 0.0  ;;  %v1227_v6 = vadd.f32 %v2342_v3, %v968_v1  ;;  %v970_v7 = vpop.f32.mrb[15].mxu1  ;;  %v1250_v8 = vmax.f32 %v1200_v60, 0.0 }
 0x137   : > { %v1251_v9 = vmax.f32 %v1201_v2, 0.0  ;;  %v1277_v10 = vmax.f32 %v1227_v6, 0.0 }
 0x139   : > { %v1859_v11 = vpack.c.bf16 %v1251_v9, %v1250_v8  ;;  %v1924_v12 = vpack.c.bf16 %v1277_v10, %v1276_v5 }
 0x13a   : > { %v869_v13 = vpop.f32.mrb[16].mxu0  ;;  %v973_v14 = vpop.f32.mrb[16].mxu1 }
 0x13b   : > { %1968 = vst [vmem:[%s2352_s8 + $0x18] sm:$0xff] %v1859_v11   ;;  %1981 = vst [vmem:[%s2352_s8 + $0x80] sm:$0xff] %v1924_v12   ;;  %v1202_v15 = vadd.f32 %v2342_v3, %v869_v13  ;;  %v871_v16 = vpop.f32.mrb[17].mxu0  ;;  %v1228_v17 = vadd.f32 %v2342_v3, %v973_v14  ;;  %v975_v18 = vpop.f32.mrb[17].mxu1 }
 0x13c   : > { %v872_v19 = vpop.f32.mrb[18].mxu0  ;;  %v976_v20 = vpop.f32.mrb[18].mxu1 }
 0x13d   : > { %v1203_v21 = vadd.f32 %v2342_v3, %v872_v19  ;;  %v874_v22 = vpop.f32.mrb[19].mxu0  ;;  %v1278_v23 = vmax.f32 %v1228_v17, 0.0  ;;  %v1229_v24 = vadd.f32 %v2342_v3, %v976_v20  ;;  %v978_v25 = vpop.f32.mrb[19].mxu1  ;;  %v1252_v26 = vmax.f32 %v1202_v15, 0.0 }
 0x13f   : > { %v1253_v27 = vmax.f32 %v1203_v21, 0.0  ;;  %v1279_v28 = vmax.f32 %v1229_v24, 0.0 }
 0x141   : > { %v1864_v29 = vpack.c.bf16 %v1253_v27, %v1252_v26  ;;  %v1929_v30 = vpack.c.bf16 %v1279_v28, %v1278_v23 }
 0x142   : > { %v877_v31 = vpop.f32.mrb[20].mxu0  ;;  %v981_v32 = vpop.f32.mrb[20].mxu1 }
 0x143   : > { %1969 = vst [vmem:[%s2352_s8 + $0x20] sm:$0xff] %v1864_v29   ;;  %1982 = vst [vmem:[%s2352_s8 + $0x88] sm:$0xff] %v1929_v30   ;;  %v1204_v33 = vadd.f32 %v2342_v3, %v877_v31  ;;  %v879_v34 = vpop.f32.mrb[21].mxu0  ;;  %v1230_v35 = vadd.f32 %v2342_v3, %v981_v32  ;;  %v983_v36 = vpop.f32.mrb[21].mxu1 }
 0x144   : > { %v880_v37 = vpop.f32.mrb[22].mxu0  ;;  %v984_v38 = vpop.f32.mrb[22].mxu1 }
 0x145   : > { %v1205_v39 = vadd.f32 %v2342_v3, %v880_v37  ;;  %v882_v40 = vpop.f32.mrb[23].mxu0  ;;  %v1280_v41 = vmax.f32 %v1230_v35, 0.0  ;;  %v1231_v42 = vadd.f32 %v2342_v3, %v984_v38  ;;  %v986_v43 = vpop.f32.mrb[23].mxu1  ;;  %v1254_v44 = vmax.f32 %v1204_v33, 0.0 }
 0x147   : > { %v1255_v45 = vmax.f32 %v1205_v39, 0.0  ;;  %v1281_v46 = vmax.f32 %v1231_v42, 0.0 }
 0x149   : > { %v1869_v47 = vpack.c.bf16 %v1255_v45, %v1254_v44  ;;  %v1934_v48 = vpack.c.bf16 %v1281_v46, %v1280_v41 }
 0x14a   : > { %v885_v49 = vpop.f32.mrb[24].mxu0  ;;  %v989_v50 = vpop.f32.mrb[24].mxu1 }
 0x14b   : > { %1970 = vst [vmem:[%s2352_s8 + $0x28] sm:$0xff] %v1869_v47   ;;  %1983 = vst [vmem:[%s2352_s8 + $0x90] sm:$0xff] %v1934_v48   ;;  %v1206_v51 = vadd.f32 %v2342_v3, %v885_v49  ;;  %v887_v52 = vpop.f32.mrb[25].mxu0  ;;  %v1232_v53 = vadd.f32 %v2342_v3, %v989_v50  ;;  %v991_v54 = vpop.f32.mrb[25].mxu1 }
 0x14c   : > { %v888_v55 = vpop.f32.mrb[26].mxu0  ;;  %v992_v56 = vpop.f32.mrb[26].mxu1 }
 0x14d   : > { %v1207_v57 = vadd.f32 %v2342_v3, %v888_v55  ;;  %v890_v58 = vpop.f32.mrb[27].mxu0  ;;  %v1282_v59 = vmax.f32 %v1232_v53, 0.0  ;;  %v1233_v60 = vadd.f32 %v2342_v3, %v992_v56  ;;  %v994_v61 = vpop.f32.mrb[27].mxu1  ;;  %v1256_v62 = vmax.f32 %v1206_v51, 0.0 }
 0x14f   : > { %v1257_v63 = vmax.f32 %v1207_v57, 0.0  ;;  %v1283_v0 = vmax.f32 %v1233_v60, 0.0 }
 0x151   : > { %v1874_v1 = vpack.c.bf16 %v1257_v63, %v1256_v62  ;;  %v1939_v2 = vpack.c.bf16 %v1283_v0, %v1282_v59 }
 0x152   : > { %v893_v4 = vpop.f32.mrb[28].mxu0  ;;  %v997_v5 = vpop.f32.mrb[28].mxu1 }
 0x153   : > { %1971 = vst [vmem:[%s2352_s8 + $0x30] sm:$0xff] %v1874_v1   ;;  %1984 = vst [vmem:[%s2352_s8 + $0x98] sm:$0xff] %v1939_v2   ;;  %v1208_v6 = vadd.f32 %v2342_v3, %v893_v4  ;;  %v895_v7 = vpop.f32.mrb[29].mxu0  ;;  %v1234_v8 = vadd.f32 %v2342_v3, %v997_v5  ;;  %v999_v9 = vpop.f32.mrb[29].mxu1 }
 0x154   : > { %v896_v10 = vpop.f32.mrb[30].mxu0  ;;  %v1000_v11 = vpop.f32.mrb[30].mxu1 }
 0x155   : > { %v1209_v12 = vadd.f32 %v2342_v3, %v896_v10  ;;  %v898_v13 = vpop.f32.mrb[31].mxu0  ;;  %v1284_v14 = vmax.f32 %v1234_v8, 0.0  ;;  %v1235_v15 = vadd.f32 %v2342_v3, %v1000_v11  ;;  %v1002_v16 = vpop.f32.mrb[31].mxu1  ;;  %v1258_v17 = vmax.f32 %v1208_v6, 0.0 }
 0x157   : > { %v1259_v18 = vmax.f32 %v1209_v12, 0.0  ;;  %v1285_v19 = vmax.f32 %v1235_v15, 0.0 }
 0x159   : > { %v1879_v20 = vpack.c.bf16 %v1259_v18, %v1258_v17  ;;  %v1944_v21 = vpack.c.bf16 %v1285_v19, %v1284_v14 }
 0x15a   : > { %v901_v22 = vpop.f32.mrb[32].mxu0  ;;  %v1005_v23 = vpop.f32.mrb[32].mxu1 }
 0x15b   : > { %1972 = vst [vmem:[%s2352_s8 + $0x38] sm:$0xff] %v1879_v20   ;;  %1985 = vst [vmem:[%s2352_s8 + $0xa0] sm:$0xff] %v1944_v21   ;;  %v1210_v24 = vadd.f32 %v2342_v3, %v901_v22  ;;  %v903_v25 = vpop.f32.mrb[33].mxu0  ;;  %v1236_v26 = vadd.f32 %v2342_v3, %v1005_v23  ;;  %v1007_v27 = vpop.f32.mrb[33].mxu1 }
 0x15c   : > { %v904_v28 = vpop.f32.mrb[34].mxu0  ;;  %v1008_v29 = vpop.f32.mrb[34].mxu1 }
 0x15d   : > { %v1211_v30 = vadd.f32 %v2342_v3, %v904_v28  ;;  %v906_v31 = vpop.f32.mrb[35].mxu0  ;;  %v1286_v32 = vmax.f32 %v1236_v26, 0.0  ;;  %v1237_v33 = vadd.f32 %v2342_v3, %v1008_v29  ;;  %v1010_v34 = vpop.f32.mrb[35].mxu1  ;;  %v1260_v35 = vmax.f32 %v1210_v24, 0.0 }
 0x15f   : > { %v1261_v36 = vmax.f32 %v1211_v30, 0.0  ;;  %v1287_v37 = vmax.f32 %v1237_v33, 0.0 }
 0x161   : > { %v1884_v38 = vpack.c.bf16 %v1261_v36, %v1260_v35  ;;  %v1949_v39 = vpack.c.bf16 %v1287_v37, %v1286_v32 }
 0x162   : > { %v909_v40 = vpop.f32.mrb[36].mxu0  ;;  %v1013_v41 = vpop.f32.mrb[36].mxu1 }
 0x163   : > { %1973 = vst [vmem:[%s2352_s8 + $0x40] sm:$0xff] %v1884_v38   ;;  %1986 = vst [vmem:[%s2352_s8 + $0xa8] sm:$0xff] %v1949_v39   ;;  %v1212_v42 = vadd.f32 %v2342_v3, %v909_v40  ;;  %v911_v43 = vpop.f32.mrb[37].mxu0  ;;  %v1238_v44 = vadd.f32 %v2342_v3, %v1013_v41  ;;  %v1015_v45 = vpop.f32.mrb[37].mxu1 }
 0x164   : > { %v912_v46 = vpop.f32.mrb[38].mxu0  ;;  %v1016_v47 = vpop.f32.mrb[38].mxu1 }
 0x165   : > { %v1213_v48 = vadd.f32 %v2342_v3, %v912_v46  ;;  %v914_v49 = vpop.f32.mrb[39].mxu0  ;;  %v1288_v50 = vmax.f32 %v1238_v44, 0.0  ;;  %v1239_v51 = vadd.f32 %v2342_v3, %v1016_v47  ;;  %v1018_v52 = vpop.f32.mrb[39].mxu1  ;;  %v1262_v53 = vmax.f32 %v1212_v42, 0.0 }
 0x167   : > { %v1263_v54 = vmax.f32 %v1213_v48, 0.0  ;;  %v1289_v55 = vmax.f32 %v1239_v51, 0.0 }
 0x169   : > { %v1889_v56 = vpack.c.bf16 %v1263_v54, %v1262_v53  ;;  %v1954_v57 = vpack.c.bf16 %v1289_v55, %v1288_v50 }
 0x16a   : > { %v917_v58 = vpop.f32.mrb[40].mxu0  ;;  %v1021_v59 = vpop.f32.mrb[40].mxu1 }
 0x16b   : > { %1974 = vst [vmem:[%s2352_s8 + $0x48] sm:$0xff] %v1889_v56   ;;  %1987 = vst [vmem:[%s2352_s8 + $0xb0] sm:$0xff] %v1954_v57   ;;  %v1214_v60 = vadd.f32 %v2342_v3, %v917_v58  ;;  %v919_v61 = vpop.f32.mrb[41].mxu0  ;;  %v1240_v62 = vadd.f32 %v2342_v3, %v1021_v59  ;;  %v1023_v63 = vpop.f32.mrb[41].mxu1 }
 0x16c   : > { %v920_v0 = vpop.f32.mrb[42].mxu0  ;;  %v1024_v1 = vpop.f32.mrb[42].mxu1 }
 0x16d   : > { %v1215_v2 = vadd.f32 %v2342_v3, %v920_v0  ;;  %v922_v4 = vpop.f32.mrb[43].mxu0  ;;  %v1290_v5 = vmax.f32 %v1240_v62, 0.0  ;;  %v1241_v6 = vadd.f32 %v2342_v3, %v1024_v1  ;;  %v1026_v7 = vpop.f32.mrb[43].mxu1  ;;  %v1264_v8 = vmax.f32 %v1214_v60, 0.0 }
 0x16f   : > { %v1265_v9 = vmax.f32 %v1215_v2, 0.0  ;;  %v1291_v10 = vmax.f32 %v1241_v6, 0.0 }
 0x171   : > { %v1894_v11 = vpack.c.bf16 %v1265_v9, %v1264_v8  ;;  %v1959_v12 = vpack.c.bf16 %v1291_v10, %v1290_v5 }
 0x172   : > { %v925_v13 = vpop.f32.mrb[44].mxu0  ;;  %v1029_v14 = vpop.f32.mrb[44].mxu1 }
 0x173   : > { %1975 = vst [vmem:[%s2352_s8 + $0x50] sm:$0xff] %v1894_v11   ;;  %1988 = vst [vmem:[%s2352_s8 + $0xb8] sm:$0xff] %v1959_v12   ;;  %v1216_v15 = vadd.f32 %v2342_v3, %v925_v13  ;;  %v927_v16 = vpop.f32.mrb[45].mxu0  ;;  %v1242_v17 = vadd.f32 %v2342_v3, %v1029_v14  ;;  %v1031_v18 = vpop.f32.mrb[45].mxu1 }
 0x174   : > { %v928_v19 = vpop.f32.mrb[46].mxu0  ;;  %v1032_v20 = vpop.f32.mrb[46].mxu1 }
 0x175   : > { %v1217_v21 = vadd.f32 %v2342_v3, %v928_v19  ;;  %v930_v22 = vpop.f32.mrb[47].mxu0  ;;  %v1292_v23 = vmax.f32 %v1242_v17, 0.0  ;;  %v1243_v24 = vadd.f32 %v2342_v3, %v1032_v20  ;;  %v1034_v25 = vpop.f32.mrb[47].mxu1  ;;  %v1266_v26 = vmax.f32 %v1216_v15, 0.0 }
 0x177   : > { %v1267_v27 = vmax.f32 %v1217_v21, 0.0  ;;  %v1293_v28 = vmax.f32 %v1243_v24, 0.0 }
 0x179   : > { %v1899_v29 = vpack.c.bf16 %v1267_v27, %v1266_v26  ;;  %v1964_v30 = vpack.c.bf16 %v1293_v28, %v1292_v23 }
 0x17a   : > { %v933_v31 = vpop.f32.mrb[48].mxu0 }
 0x17b   : > { %1976 = vst [vmem:[%s2352_s8 + $0x58] sm:$0xff] %v1899_v29   ;;  %1989 = vst [vmem:[%s2352_s8 + $0xc0] sm:$0xff] %v1964_v30   ;;  %v1218_v32 = vadd.f32 %v2342_v3, %v933_v31  ;;  %v935_v33 = vpop.f32.mrb[49].mxu0 }
 0x17c   : > { %v936_v34 = vpop.f32.mrb[50].mxu0 }
 0x17d   : > { %v1219_v35 = vadd.f32 %v2342_v3, %v936_v34  ;;  %v938_v36 = vpop.f32.mrb[51].mxu0  ;;  %v1268_v37 = vmax.f32 %v1218_v32, 0.0 }
 0x17f   : > { %v1269_v38 = vmax.f32 %v1219_v35, 0.0 }
 0x181   : > { %v1904_v39 = vpack.c.bf16 %v1269_v38, %v1268_v37 }
 0x183   : > { %1977 = vst [vmem:[%s2352_s8 + $0x60] sm:$0xff] %v1904_v39  }
 0x184 PF: > { %s13_s14 = sadd.s32 1, %s2160_s14   ;;  %s2438_s12 = smov %s2156_s13 }
 0x185   : > { %p10_p5 = scmp.ge.s32.totalorder %s13_s14, 4   ;;  %s2439_s13 = smov %s2441_s15 }
 0x187   :  { %12 = sbr.rel (!%p10_p5) target bundleno = 2 (0x2), region = 76 }

// kernel: qnetwork_forward.5
= control target key start
LH: loop header
LB: loop body
LE: loop exit
PB: predicated region body
PF: predicated region fallthrough
CT: control target
= control target key end

     0   :  { %s1813_s1 = inlined_call_operand.vmem [shape: bf16[512,128], index: 1, kind: input, shape index: {}]   ;;  %s1814_s0 = inlined_call_operand.vmem [shape: bf16[176,512], index: 0, kind: input, shape index: {}]   ;;  %s1815_s2 = inlined_call_operand.vmem [shape: f32[8,128], index: 2, kind: input, shape index: {}]   ;;  %s1816_s3 = inlined_call_operand.vmem [shape: bf16[176,128], index: 3, kind: output, shape index: {}]  }
   0x1   :  { %v1407_v0 = vld [vmem:[%s1813_s1 + $0x40] sm:$0xff]   ;;  %v1411_v4 = vld [vmem:[%s1813_s1 + $0x48] sm:$0xff]   ;;  %v1415_v8 = vld [vmem:[%s1813_s1 + $0x50] sm:$0xff]  }
   0x2   :  { %v1408_v1 = vld [vmem:[%s1813_s1 + $0xc0] sm:$0xff]   ;;  %1243 = vmatprep.subr.bf16.mxu0 %v1407_v0  ;;  %v1412_v5 = vld [vmem:[%s1813_s1 + $0xc8] sm:$0xff]   ;;  %v1416_v9 = vld [vmem:[%s1813_s1 + $0xd0] sm:$0xff]  }
   0x3   :  { %v1409_v2 = vld [vmem:[%s1813_s1] sm:$0xff]   ;;  %1325 = vmatprep.subr.bf16.mxu1 %v1408_v1  ;;  %v1413_v6 = vld [vmem:[%s1813_s1 + $0x8] sm:$0xff]   ;;  %v1417_v10 = vld [vmem:[%s1813_s1 + $0x10] sm:$0xff]  }
   0x4   :  { %v1410_v3 = vld [vmem:[%s1813_s1 + $0x80] sm:$0xff]   ;;  %1244 = vmatpush3.bf16.msra.mxu0 %v1409_v2  ;;  %v1414_v7 = vld [vmem:[%s1813_s1 + $0x88] sm:$0xff]   ;;  %v1418_v11 = vld [vmem:[%s1813_s1 + $0x90] sm:$0xff]  }
   0x5   :  { %1326 = vmatpush3.bf16.msra.mxu1 %v1410_v3  ;;  %1245 = vmatprep.subr.bf16.mxu0 %v1411_v4  ;;  %v1419_v12 = vld [vmem:[%s1813_s1 + $0x58] sm:$0xff]   ;;  %v1423_v16 = vld [vmem:[%s1813_s1 + $0x60] sm:$0xff]   ;;  %v1427_v20 = vld [vmem:[%s1813_s1 + $0x68] sm:$0xff]  }
   0x6   :  { %1327 = vmatprep.subr.bf16.mxu1 %v1412_v5  ;;  %v1420_v13 = vld [vmem:[%s1813_s1 + $0xd8] sm:$0xff]   ;;  %v1424_v17 = vld [vmem:[%s1813_s1 + $0xe0] sm:$0xff]   ;;  %v1428_v21 = vld [vmem:[%s1813_s1 + $0xe8] sm:$0xff]  }
   0x7   :  { %v1421_v14 = vld [vmem:[%s1813_s1 + $0x18] sm:$0xff]   ;;  %v1425_v18 = vld [vmem:[%s1813_s1 + $0x20] sm:$0xff]   ;;  %v1429_v22 = vld [vmem:[%s1813_s1 + $0x28] sm:$0xff]  }
   0x8   :  { %1246 = vmatpush3.bf16.msra.mxu0 %v1413_v6  ;;  %v1422_v15 = vld [vmem:[%s1813_s1 + $0x98] sm:$0xff]   ;;  %v1426_v19 = vld [vmem:[%s1813_s1 + $0xa0] sm:$0xff]   ;;  %v1430_v23 = vld [vmem:[%s1813_s1 + $0xa8] sm:$0xff]  }
   0x9   :  { %1328 = vmatpush3.bf16.msra.mxu1 %v1414_v7  ;;  %1247 = vmatprep.subr.bf16.mxu0 %v1415_v8  ;;  %v1431_v24 = vld [vmem:[%s1813_s1 + $0x70] sm:$0xff]   ;;  %v1435_v28 = vld [vmem:[%s1813_s1 + $0x78] sm:$0xff]  }
   0xa   :  { %1329 = vmatprep.subr.bf16.mxu1 %v1416_v9  ;;  %v1432_v25 = vld [vmem:[%s1813_s1 + $0xf0] sm:$0xff]   ;;  %v1436_v29 = vld [vmem:[%s1813_s1 + $0xf8] sm:$0xff]  }
   0xb   :  { %v1433_v26 = vld [vmem:[%s1813_s1 + $0x30] sm:$0xff]   ;;  %v1437_v30 = vld [vmem:[%s1813_s1 + $0x38] sm:$0xff]  }
   0xc   :  { %1248 = vmatpush3.bf16.msra.mxu0 %v1417_v10  ;;  %v1434_v27 = vld [vmem:[%s1813_s1 + $0xb0] sm:$0xff]   ;;  %v1438_v31 = vld [vmem:[%s1813_s1 + $0xb8] sm:$0xff]  }
   0xd   :  { %1330 = vmatpush3.bf16.msra.mxu1 %v1418_v11  ;;  %1249 = vmatprep.subr.bf16.mxu0 %v1419_v12  ;;  %v1439_v32 = vld [vmem:[%s1814_s0] ss:$16 sps:$4 sm:$0xff]   ;;  %v1441_v33 = vld [vmem:[%s1814_s0 + $0x4] ss:$16 sps:$4 sm:$0xff]   ;;  %v1442_v34 = vld [vmem:[%s1814_s0 + $0x8] ss:$16 sps:$4 sm:$0xff]  }
   0xe   :  { %1331 = vmatprep.subr.bf16.mxu1 %v1420_v13  ;;  %v1444_v35 = vld [vmem:[%s1814_s0 + $0xc] ss:$16 sps:$4 sm:$0xff]   ;;  %615 = vmatprep.mubr.bf16.mxu0 %v1441_v33  ;;  %v1445_v36 = vld [vmem:[%s1814_s0 + $0x24] ss:$16 sps:$4 sm:$0xff]   ;;  %v1449_v38 = vld [vmem:[%s1814_s0 + $0x20] ss:$16 sps:$4 sm:$0xff]  }
   0xf   :  { %736 = vmatprep.mubr.bf16.mxu1 %v1444_v35  ;;  %v1447_v37 = vld [vmem:[%s1814_s0 + $0x2c] ss:$16 sps:$4 sm:$0xff]   ;;  %v1450_v39 = vld [vmem:[%s1814_s0 + $0x28] ss:$16 sps:$4 sm:$0xff]   ;;  %v1451_v40 = vld [vmem:[%s1814_s0 + $0x44] ss:$16 sps:$4 sm:$0xff]  }
  0x10   :  { %1250 = vmatpush3.bf16.msra.mxu0 %v1421_v14  ;;  %v1453_v41 = vld [vmem:[%s1814_s0 + $0x4c] ss:$16 sps:$4 sm:$0xff]   ;;  %v1455_v42 = vld [vmem:[%s1814_s0 + $0x40] ss:$16 sps:$4 sm:$0xff]   ;;  %v1456_v43 = vld [vmem:[%s1814_s0 + $0x48] ss:$16 sps:$4 sm:$0xff]  }
  0x11   :  { %1332 = vmatpush3.bf16.msra.mxu1 %v1422_v15  ;;  %1251 = vmatprep.subr.bf16.mxu0 %v1423_v16  ;;  %v1457_v44 = vld [vmem:[%s1814_s0 + $0x64] ss:$16 sps:$4 sm:$0xff]   ;;  %v1459_v45 = vld [vmem:[%s1814_s0 + $0x6c] ss:$16 sps:$4 sm:$0xff]   ;;  %v1461_v46 = vld [vmem:[%s1814_s0 + $0x60] ss:$16 sps:$4 sm:$0xff]  }
  0x12   :  { %1333 = vmatprep.subr.bf16.mxu1 %v1424_v17  ;;  %v1462_v47 = vld [vmem:[%s1814_s0 + $0x68] ss:$16 sps:$4 sm:$0xff]   ;;  %v1463_v48 = vld [vmem:[%s1814_s0 + $0x84] ss:$16 sps:$4 sm:$0xff]   ;;  %v1465_v49 = vld [vmem:[%s1814_s0 + $0x8c] ss:$16 sps:$4 sm:$0xff]  }
  0x13   :  { %v1467_v50 = vld [vmem:[%s1814_s0 + $0x80] ss:$16 sps:$4 sm:$0xff]   ;;  %v1468_v51 = vld [vmem:[%s1814_s0 + $0x88] ss:$16 sps:$4 sm:$0xff]   ;;  %v1469_v52 = vld [vmem:[%s1814_s0 + $0xa4] ss:$16 sps:$4 sm:$0xff]  }
  0x14   :  { %1252 = vmatpush3.bf16.msra.mxu0 %v1425_v18  ;;  %v1471_v53 = vld [vmem:[%s1814_s0 + $0xac] ss:$16 sps:$4 sm:$0xff]   ;;  %v1473_v54 = vld [vmem:[%s1814_s0 + $0xa0] ss:$16 sps:$4 sm:$0xff]   ;;  %v1474_v55 = vld [vmem:[%s1814_s0 + $0xa8] ss:$16 sps:$4 sm:$0xff]  }
  0x15   :  { %1334 = vmatpush3.bf16.msra.mxu1 %v1426_v19  ;;  %1253 = vmatprep.subr.bf16.mxu0 %v1427_v20  ;;  %v1475_v56 = vld [vmem:[%s1814_s0 + $0xc4] ss:$16 sps:$4 sm:$0xff]   ;;  %v1477_v57 = vld [vmem:[%s1814_s0 + $0xcc] ss:$16 sps:$4 sm:$0xff]   ;;  %v1479_v58 = vld [vmem:[%s1814_s0 + $0xc0] ss:$16 sps:$4 sm:$0xff]  }
  0x16   :  { %1335 = vmatprep.subr.bf16.mxu1 %v1428_v21  ;;  %v1480_v59 = vld [vmem:[%s1814_s0 + $0xc8] ss:$16 sps:$4 sm:$0xff]   ;;  %v1481_v60 = vld [vmem:[%s1814_s0 + $0xe4] ss:$16 sps:$4 sm:$0xff]   ;;  %v1483_v61 = vld [vmem:[%s1814_s0 + $0xec] ss:$16 sps:$4 sm:$0xff]  }
  0x17   :  { %v1485_v62 = vld [vmem:[%s1814_s0 + $0xe0] ss:$16 sps:$4 sm:$0xff]   ;;  %v1486_v63 = vld [vmem:[%s1814_s0 + $0xe8] ss:$16 sps:$4 sm:$0xff]   ;;  %v1487_v0 = vld [vmem:[%s1814_s0 + $0x104] ss:$16 sps:$4 sm:$0xff]  }
  0x18   :  { %1254 = vmatpush3.bf16.msra.mxu0 %v1429_v22  ;;  %v1489_v1 = vld [vmem:[%s1814_s0 + $0x10c] ss:$16 sps:$4 sm:$0xff]   ;;  %v1491_v2 = vld [vmem:[%s1814_s0 + $0x100] ss:$16 sps:$4 sm:$0xff]   ;;  %v1492_v3 = vld [vmem:[%s1814_s0 + $0x108] ss:$16 sps:$4 sm:$0xff]  }
  0x19   :  { %1336 = vmatpush3.bf16.msra.mxu1 %v1430_v23  ;;  %1255 = vmatprep.subr.bf16.mxu0 %v1431_v24  ;;  %v1493_v4 = vld [vmem:[%s1814_s0 + $0x124] ss:$16 sps:$4 sm:$0xff]   ;;  %v1495_v5 = vld [vmem:[%s1814_s0 + $0x12c] ss:$16 sps:$4 sm:$0xff]   ;;  %v1497_v6 = vld [vmem:[%s1814_s0 + $0x120] ss:$16 sps:$4 sm:$0xff]  }
  0x1a   :  { %1337 = vmatprep.subr.bf16.mxu1 %v1432_v25  ;;  %v1498_v7 = vld [vmem:[%s1814_s0 + $0x128] ss:$16 sps:$4 sm:$0xff]   ;;  %v1499_v8 = vld [vmem:[%s1814_s0 + $0x144] ss:$16 sps:$4 sm:$0xff]   ;;  %v1501_v9 = vld [vmem:[%s1814_s0 + $0x14c] ss:$16 sps:$4 sm:$0xff]  }
  0x1b   :  { %v1503_v10 = vld [vmem:[%s1814_s0 + $0x140] ss:$16 sps:$4 sm:$0xff]   ;;  %v1504_v11 = vld [vmem:[%s1814_s0 + $0x148] ss:$16 sps:$4 sm:$0xff]  }
  0x1c   :  { %1256 = vmatpush3.bf16.msra.mxu0 %v1433_v26  ;;  %v1756_v21 = vld [vmem:[%s1815_s2] ss:$0 sm:$0xff] }
  0x1d   :  { %1338 = vmatpush3.bf16.msra.mxu1 %v1434_v27  ;;  %1257 = vmatprep.subr.bf16.mxu0 %v1435_v28 }
  0x1e   :  { %1339 = vmatprep.subr.bf16.mxu1 %v1436_v29 }
  0x20   :  { %1258 = vmatpush3.bf16.msra.mxu0 %v1437_v30 }
  0x21   :  { %1340 = vmatpush3.bf16.msra.mxu1 %v1438_v31 }
  0x23   :  { %616 = vmatmul.mubr.bf16.vlgmr.msra.gmra.mrb[0].mxu0 %v1439_v32 }
  0x24   :  { %737 = vmatmul.mubr.bf16.vlgmr.msra.gmra.mrb[0].mxu1 %v1442_v34  ;;  %623 = vmatprep.mubr.bf16.mxu0 %v1445_v36 }
  0x25   :  { %744 = vmatprep.mubr.bf16.mxu1 %v1447_v37 }
  0x2b   :  { %624 = vmatmul.mubr.bf16.gmra.mrb[4].mxu0 %v1449_v38 }
  0x2c   :  { %745 = vmatmul.mubr.bf16.gmra.mrb[4].mxu1 %v1450_v39  ;;  %631 = vmatprep.mubr.bf16.mxu0 %v1451_v40 }
  0x2d   :  { %752 = vmatprep.mubr.bf16.mxu1 %v1453_v41 }
  0x33   :  { %632 = vmatmul.mubr.bf16.gmra.mrb[8].mxu0 %v1455_v42 }
  0x34   :  { %753 = vmatmul.mubr.bf16.gmra.mrb[8].mxu1 %v1456_v43  ;;  %639 = vmatprep.mubr.bf16.mxu0 %v1457_v44 }
  0x35   :  { %760 = vmatprep.mubr.bf16.mxu1 %v1459_v45 }
  0x3b   :  { %640 = vmatmul.mubr.bf16.gmra.mrb[12].mxu0 %v1461_v46 }
  0x3c   :  { %761 = vmatmul.mubr.bf16.gmra.mrb[12].mxu1 %v1462_v47  ;;  %647 = vmatprep.mubr.bf16.mxu0 %v1463_v48 }
  0x3d   :  { %768 = vmatprep.mubr.bf16.mxu1 %v1465_v49 }
  0x43   :  { %648 = vmatmul.mubr.bf16.gmra.mrb[16].mxu0 %v1467_v50 }
  0x44   :  { %769 = vmatmul.mubr.bf16.gmra.mrb[16].mxu1 %v1468_v51  ;;  %655 = vmatprep.mubr.bf16.mxu0 %v1469_v52 }
  0x45   :  { %776 = vmatprep.mubr.bf16.mxu1 %v1471_v53 }
  0x4b   :  { %656 = vmatmul.mubr.bf16.gmra.mrb[20].mxu0 %v1473_v54 }
  0x4c   :  { %777 = vmatmul.mubr.bf16.gmra.mrb[20].mxu1 %v1474_v55  ;;  %663 = vmatprep.mubr.bf16.mxu0 %v1475_v56 }
  0x4d   :  { %784 = vmatprep.mubr.bf16.mxu1 %v1477_v57 }
  0x53   :  { %664 = vmatmul.mubr.bf16.gmra.mrb[24].mxu0 %v1479_v58 }
  0x54   :  { %785 = vmatmul.mubr.bf16.gmra.mrb[24].mxu1 %v1480_v59  ;;  %671 = vmatprep.mubr.bf16.mxu0 %v1481_v60 }
  0x55   :  { %792 = vmatprep.mubr.bf16.mxu1 %v1483_v61 }
  0x5b   :  { %672 = vmatmul.mubr.bf16.gmra.mrb[28].mxu0 %v1485_v62 }
  0x5c   :  { %793 = vmatmul.mubr.bf16.gmra.mrb[28].mxu1 %v1486_v63  ;;  %679 = vmatprep.mubr.bf16.mxu0 %v1487_v0 }
  0x5d   :  { %800 = vmatprep.mubr.bf16.mxu1 %v1489_v1 }
  0x63   :  { %680 = vmatmul.mubr.bf16.gmra.mrb[32].mxu0 %v1491_v2 }
  0x64   :  { %801 = vmatmul.mubr.bf16.gmra.mrb[32].mxu1 %v1492_v3  ;;  %687 = vmatprep.mubr.bf16.mxu0 %v1493_v4 }
  0x65   :  { %808 = vmatprep.mubr.bf16.mxu1 %v1495_v5 }
  0x6b   :  { %688 = vmatmul.mubr.bf16.gmra.mrb[36].mxu0 %v1497_v6 }
  0x6c   :  { %809 = vmatmul.mubr.bf16.gmra.mrb[36].mxu1 %v1498_v7  ;;  %695 = vmatprep.mubr.bf16.mxu0 %v1499_v8 }
  0x6d   :  { %816 = vmatprep.mubr.bf16.mxu1 %v1501_v9 }
  0x73   :  { %696 = vmatmul.mubr.bf16.gmra.mrb[40].mxu0 %v1503_v10 }
  0x74   :  { %817 = vmatmul.mubr.bf16.gmra.mrb[40].mxu1 %v1504_v11 }
  0xf6   :  { %v1259_v12 = vpop.f32.mrb[0].mxu0 }
  0xf7   :  { %v1341_v13 = vpop.f32.mrb[0].mxu1  ;;  %v1260_v14 = vpop.f32.mrb[1].mxu0 }
  0xf8   :  { %v1261_v15 = vadd.f32 %v1260_v14, %v1259_v12  ;;  %v1342_v16 = vpop.f32.mrb[1].mxu1  ;;  %v1262_v17 = vpop.f32.mrb[2].mxu0 }
  0xf9   :  { %v1343_v18 = vadd.f32 %v1342_v16, %v1341_v13  ;;  %v1344_v19 = vpop.f32.mrb[2].mxu1  ;;  %v1263_v20 = vpop.f32.mrb[3].mxu0 }
  0xfa   :  { %v1264_v22 = vadd.f32 %v1263_v20, %v1262_v17  ;;  %v1345_v23 = vpop.f32.mrb[3].mxu1 }
  0xfb   :  { %v739_v24 = vadd.f32 %v1343_v18, %v1261_v15  ;;  %v1346_v25 = vadd.f32 %v1345_v23, %v1344_v19 }
  0xfd   :  { %v899_v26 = vadd.f32 %v1756_v21, %v739_v24  ;;  %v742_v27 = vadd.f32 %v1346_v25, %v1264_v22 }
  0xfe   :  { %v1265_v28 = vpop.f32.mrb[4].mxu0 }
  0xff   :  { %v900_v29 = vadd.f32 %v1756_v21, %v742_v27  ;;  %v1347_v30 = vpop.f32.mrb[4].mxu1  ;;  %v1266_v31 = vpop.f32.mrb[5].mxu0  ;;  %v921_v35 = vmax.f32 %v899_v26, 0.0 }
 0x100   :  { %v1267_v32 = vadd.f32 %v1266_v31, %v1265_v28  ;;  %v1348_v33 = vpop.f32.mrb[5].mxu1  ;;  %v1268_v34 = vpop.f32.mrb[6].mxu0 }
 0x101   :  { %v922_v36 = vmax.f32 %v900_v29, 0.0  ;;  %v1349_v37 = vadd.f32 %v1348_v33, %v1347_v30  ;;  %v1350_v38 = vpop.f32.mrb[6].mxu1  ;;  %v1269_v39 = vpop.f32.mrb[7].mxu0 }
 0x102   :  { %v1270_v40 = vadd.f32 %v1269_v39, %v1268_v34  ;;  %v1351_v41 = vpop.f32.mrb[7].mxu1 }
 0x103   :  { %v1181_v42 = vpack.c.bf16 %v922_v36, %v921_v35  ;;  %v747_v43 = vadd.f32 %v1349_v37, %v1267_v32  ;;  %v1352_v44 = vadd.f32 %v1351_v41, %v1350_v38 }
 0x105   :  { %1182 = vst [vmem:[%s1816_s3] sm:$0xff] %v1181_v42   ;;  %v901_v45 = vadd.f32 %v1756_v21, %v747_v43  ;;  %v750_v46 = vadd.f32 %v1352_v44, %v1270_v40 }
 0x106   :  { %v1271_v47 = vpop.f32.mrb[8].mxu0 }
 0x107   :  { %v902_v48 = vadd.f32 %v1756_v21, %v750_v46  ;;  %v1353_v49 = vpop.f32.mrb[8].mxu1  ;;  %v1272_v50 = vpop.f32.mrb[9].mxu0  ;;  %v923_v54 = vmax.f32 %v901_v45, 0.0 }
 0x108   :  { %v1273_v51 = vadd.f32 %v1272_v50, %v1271_v47  ;;  %v1354_v52 = vpop.f32.mrb[9].mxu1  ;;  %v1274_v53 = vpop.f32.mrb[10].mxu0 }
 0x109   :  { %v924_v55 = vmax.f32 %v902_v48, 0.0  ;;  %v1355_v56 = vadd.f32 %v1354_v52, %v1353_v49  ;;  %v1356_v57 = vpop.f32.mrb[10].mxu1  ;;  %v1275_v58 = vpop.f32.mrb[11].mxu0 }
 0x10a   :  { %v1276_v59 = vadd.f32 %v1275_v58, %v1274_v53  ;;  %v1357_v60 = vpop.f32.mrb[11].mxu1 }
 0x10b   :  { %v1186_v61 = vpack.c.bf16 %v924_v55, %v923_v54  ;;  %v755_v62 = vadd.f32 %v1355_v56, %v1273_v51  ;;  %v1358_v63 = vadd.f32 %v1357_v60, %v1356_v57 }
 0x10d   :  { %1233 = vst [vmem:[%s1816_s3 + $0x8] sm:$0xff] %v1186_v61   ;;  %v903_v0 = vadd.f32 %v1756_v21, %v755_v62  ;;  %v758_v1 = vadd.f32 %v1358_v63, %v1276_v59 }
 0x10e   :  { %v1277_v2 = vpop.f32.mrb[12].mxu0 }
 0x10f   :  { %v904_v3 = vadd.f32 %v1756_v21, %v758_v1  ;;  %v1359_v4 = vpop.f32.mrb[12].mxu1  ;;  %v1278_v5 = vpop.f32.mrb[13].mxu0  ;;  %v925_v9 = vmax.f32 %v903_v0, 0.0 }
 0x110   :  { %v1279_v6 = vadd.f32 %v1278_v5, %v1277_v2  ;;  %v1360_v7 = vpop.f32.mrb[13].mxu1  ;;  %v1280_v8 = vpop.f32.mrb[14].mxu0 }
 0x111   :  { %v926_v10 = vmax.f32 %v904_v3, 0.0  ;;  %v1361_v11 = vadd.f32 %v1360_v7, %v1359_v4  ;;  %v1362_v12 = vpop.f32.mrb[14].mxu1  ;;  %v1281_v13 = vpop.f32.mrb[15].mxu0 }
 0x112   :  { %v1282_v14 = vadd.f32 %v1281_v13, %v1280_v8  ;;  %v1363_v15 = vpop.f32.mrb[15].mxu1 }
 0x113   :  { %v1191_v16 = vpack.c.bf16 %v926_v10, %v925_v9  ;;  %v763_v17 = vadd.f32 %v1361_v11, %v1279_v6  ;;  %v1364_v18 = vadd.f32 %v1363_v15, %v1362_v12 }
 0x115   :  { %1234 = vst [vmem:[%s1816_s3 + $0x10] sm:$0xff] %v1191_v16   ;;  %v905_v19 = vadd.f32 %v1756_v21, %v763_v17  ;;  %v766_v20 = vadd.f32 %v1364_v18, %v1282_v14 }
 0x116   :  { %v1283_v22 = vpop.f32.mrb[16].mxu0 }
 0x117   :  { %v906_v23 = vadd.f32 %v1756_v21, %v766_v20  ;;  %v1365_v24 = vpop.f32.mrb[16].mxu1  ;;  %v1284_v25 = vpop.f32.mrb[17].mxu0  ;;  %v927_v29 = vmax.f32 %v905_v19, 0.0 }
 0x118   :  { %v1285_v26 = vadd.f32 %v1284_v25, %v1283_v22  ;;  %v1366_v27 = vpop.f32.mrb[17].mxu1  ;;  %v1286_v28 = vpop.f32.mrb[18].mxu0 }
 0x119   :  { %v928_v30 = vmax.f32 %v906_v23, 0.0  ;;  %v1367_v31 = vadd.f32 %v1366_v27, %v1365_v24  ;;  %v1368_v32 = vpop.f32.mrb[18].mxu1  ;;  %v1287_v33 = vpop.f32.mrb[19].mxu0 }
 0x11a   :  { %v1288_v34 = vadd.f32 %v1287_v33, %v1286_v28  ;;  %v1369_v35 = vpop.f32.mrb[19].mxu1 }
 0x11b   :  { %v1196_v36 = vpack.c.bf16 %v928_v30, %v927_v29  ;;  %v771_v37 = vadd.f32 %v1367_v31, %v1285_v26  ;;  %v1370_v38 = vadd.f32 %v1369_v35, %v1368_v32 }
 0x11d   :  { %1235 = vst [vmem:[%s1816_s3 + $0x18] sm:$0xff] %v1196_v36   ;;  %v907_v39 = vadd.f32 %v1756_v21, %v771_v37  ;;  %v774_v40 = vadd.f32 %v1370_v38, %v1288_v34 }
 0x11e   :  { %v1289_v41 = vpop.f32.mrb[20].mxu0 }
 0x11f   :  { %v908_v42 = vadd.f32 %v1756_v21, %v774_v40  ;;  %v1371_v43 = vpop.f32.mrb[20].mxu1  ;;  %v1290_v44 = vpop.f32.mrb[21].mxu0  ;;  %v929_v48 = vmax.f32 %v907_v39, 0.0 }
 0x120   :  { %v1291_v45 = vadd.f32 %v1290_v44, %v1289_v41  ;;  %v1372_v46 = vpop.f32.mrb[21].mxu1  ;;  %v1292_v47 = vpop.f32.mrb[22].mxu0 }
 0x121   :  { %v930_v49 = vmax.f32 %v908_v42, 0.0  ;;  %v1373_v50 = vadd.f32 %v1372_v46, %v1371_v43  ;;  %v1374_v51 = vpop.f32.mrb[22].mxu1  ;;  %v1293_v52 = vpop.f32.mrb[23].mxu0 }
 0x122   :  { %v1294_v53 = vadd.f32 %v1293_v52, %v1292_v47  ;;  %v1375_v54 = vpop.f32.mrb[23].mxu1 }
 0x123   :  { %v1201_v55 = vpack.c.bf16 %v930_v49, %v929_v48  ;;  %v779_v56 = vadd.f32 %v1373_v50, %v1291_v45  ;;  %v1376_v57 = vadd.f32 %v1375_v54, %v1374_v51 }
 0x125   :  { %1236 = vst [vmem:[%s1816_s3 + $0x20] sm:$0xff] %v1201_v55   ;;  %v909_v58 = vadd.f32 %v1756_v21, %v779_v56  ;;  %v782_v59 = vadd.f32 %v1376_v57, %v1294_v53 }
 0x126   :  { %v1295_v60 = vpop.f32.mrb[24].mxu0 }
 0x127   :  { %v910_v61 = vadd.f32 %v1756_v21, %v782_v59  ;;  %v1377_v62 = vpop.f32.mrb[24].mxu1  ;;  %v1296_v63 = vpop.f32.mrb[25].mxu0  ;;  %v931_v3 = vmax.f32 %v909_v58, 0.0 }
 0x128   :  { %v1297_v0 = vadd.f32 %v1296_v63, %v1295_v60  ;;  %v1378_v1 = vpop.f32.mrb[25].mxu1  ;;  %v1298_v2 = vpop.f32.mrb[26].mxu0 }
 0x129   :  { %v932_v4 = vmax.f32 %v910_v61, 0.0  ;;  %v1379_v5 = vadd.f32 %v1378_v1, %v1377_v62  ;;  %v1380_v6 = vpop.f32.mrb[26].mxu1  ;;  %v1299_v7 = vpop.f32.mrb[27].mxu0 }
 0x12a   :  { %v1300_v8 = vadd.f32 %v1299_v7, %v1298_v2  ;;  %v1381_v9 = vpop.f32.mrb[27].mxu1 }
 0x12b   :  { %v1206_v10 = vpack.c.bf16 %v932_v4, %v931_v3  ;;  %v787_v11 = vadd.f32 %v1379_v5, %v1297_v0  ;;  %v1382_v12 = vadd.f32 %v1381_v9, %v1380_v6 }
 0x12d   :  { %1237 = vst [vmem:[%s1816_s3 + $0x28] sm:$0xff] %v1206_v10   ;;  %v911_v13 = vadd.f32 %v1756_v21, %v787_v11  ;;  %v790_v14 = vadd.f32 %v1382_v12, %v1300_v8 }
 0x12e   :  { %v1301_v15 = vpop.f32.mrb[28].mxu0 }
 0x12f   :  { %v912_v16 = vadd.f32 %v1756_v21, %v790_v14  ;;  %v1383_v17 = vpop.f32.mrb[28].mxu1  ;;  %v1302_v18 = vpop.f32.mrb[29].mxu0  ;;  %v933_v23 = vmax.f32 %v911_v13, 0.0 }
 0x130   :  { %v1303_v19 = vadd.f32 %v1302_v18, %v1301_v15  ;;  %v1384_v20 = vpop.f32.mrb[29].mxu1  ;;  %v1304_v22 = vpop.f32.mrb[30].mxu0 }
 0x131   :  { %v934_v24 = vmax.f32 %v912_v16, 0.0  ;;  %v1385_v25 = vadd.f32 %v1384_v20, %v1383_v17  ;;  %v1386_v26 = vpop.f32.mrb[30].mxu1  ;;  %v1305_v27 = vpop.f32.mrb[31].mxu0 }
 0x132   :  { %v1306_v28 = vadd.f32 %v1305_v27, %v1304_v22  ;;  %v1387_v29 = vpop.f32.mrb[31].mxu1 }
 0x133   :  { %v1211_v30 = vpack.c.bf16 %v934_v24, %v933_v23  ;;  %v795_v31 = vadd.f32 %v1385_v25, %v1303_v19  ;;  %v1388_v32 = vadd.f32 %v1387_v29, %v1386_v26 }
 0x135   :  { %1238 = vst [vmem:[%s1816_s3 + $0x30] sm:$0xff] %v1211_v30   ;;  %v913_v33 = vadd.f32 %v1756_v21, %v795_v31  ;;  %v798_v34 = vadd.f32 %v1388_v32, %v1306_v28 }
 0x136   :  { %v1307_v35 = vpop.f32.mrb[32].mxu0 }
 0x137   :  { %v914_v36 = vadd.f32 %v1756_v21, %v798_v34  ;;  %v1389_v37 = vpop.f32.mrb[32].mxu1  ;;  %v1308_v38 = vpop.f32.mrb[33].mxu0  ;;  %v935_v42 = vmax.f32 %v913_v33, 0.0 }
 0x138   :  { %v1309_v39 = vadd.f32 %v1308_v38, %v1307_v35  ;;  %v1390_v40 = vpop.f32.mrb[33].mxu1  ;;  %v1310_v41 = vpop.f32.mrb[34].mxu0 }
 0x139   :  { %v936_v43 = vmax.f32 %v914_v36, 0.0  ;;  %v1391_v44 = vadd.f32 %v1390_v40, %v1389_v37  ;;  %v1392_v45 = vpop.f32.mrb[34].mxu1  ;;  %v1311_v46 = vpop.f32.mrb[35].mxu0 }
 0x13a   :  { %v1312_v47 = vadd.f32 %v1311_v46, %v1310_v41  ;;  %v1393_v48 = vpop.f32.mrb[35].mxu1 }
 0x13b   :  { %v1216_v49 = vpack.c.bf16 %v936_v43, %v935_v42  ;;  %v803_v50 = vadd.f32 %v1391_v44, %v1309_v39  ;;  %v1394_v51 = vadd.f32 %v1393_v48, %v1392_v45 }
 0x13d   :  { %1239 = vst [vmem:[%s1816_s3 + $0x38] sm:$0xff] %v1216_v49   ;;  %v915_v52 = vadd.f32 %v1756_v21, %v803_v50  ;;  %v806_v53 = vadd.f32 %v1394_v51, %v1312_v47 }
 0x13e   :  { %v1313_v54 = vpop.f32.mrb[36].mxu0 }
 0x13f   :  { %v916_v55 = vadd.f32 %v1756_v21, %v806_v53  ;;  %v1395_v56 = vpop.f32.mrb[36].mxu1  ;;  %v1314_v57 = vpop.f32.mrb[37].mxu0  ;;  %v937_v61 = vmax.f32 %v915_v52, 0.0 }
 0x140   :  { %v1315_v58 = vadd.f32 %v1314_v57, %v1313_v54  ;;  %v1396_v59 = vpop.f32.mrb[37].mxu1  ;;  %v1316_v60 = vpop.f32.mrb[38].mxu0 }
 0x141   :  { %v938_v62 = vmax.f32 %v916_v55, 0.0  ;;  %v1397_v63 = vadd.f32 %v1396_v59, %v1395_v56  ;;  %v1398_v0 = vpop.f32.mrb[38].mxu1  ;;  %v1317_v1 = vpop.f32.mrb[39].mxu0 }
 0x142   :  { %v1318_v2 = vadd.f32 %v1317_v1, %v1316_v60  ;;  %v1399_v3 = vpop.f32.mrb[39].mxu1 }
 0x143   :  { %v1221_v4 = vpack.c.bf16 %v938_v62, %v937_v61  ;;  %v811_v5 = vadd.f32 %v1397_v63, %v1315_v58  ;;  %v1400_v6 = vadd.f32 %v1399_v3, %v1398_v0 }
 0x145   :  { %1240 = vst [vmem:[%s1816_s3 + $0x40] sm:$0xff] %v1221_v4   ;;  %v917_v7 = vadd.f32 %v1756_v21, %v811_v5  ;;  %v814_v8 = vadd.f32 %v1400_v6, %v1318_v2 }
 0x146   :  { %v1319_v9 = vpop.f32.mrb[40].mxu0 }
 0x147   :  { %v918_v10 = vadd.f32 %v1756_v21, %v814_v8  ;;  %v1401_v11 = vpop.f32.mrb[40].mxu1  ;;  %v1320_v12 = vpop.f32.mrb[41].mxu0  ;;  %v939_v16 = vmax.f32 %v917_v7, 0.0 }
 0x148   :  { %v1321_v13 = vadd.f32 %v1320_v12, %v1319_v9  ;;  %v1402_v14 = vpop.f32.mrb[41].mxu1  ;;  %v1322_v15 = vpop.f32.mrb[42].mxu0 }
 0x149   :  { %v940_v17 = vmax.f32 %v918_v10, 0.0  ;;  %v1403_v18 = vadd.f32 %v1402_v14, %v1401_v11  ;;  %v1404_v19 = vpop.f32.mrb[42].mxu1  ;;  %v1323_v20 = vpop.f32.mrb[43].mxu0 }
 0x14a   :  { %v1324_v22 = vadd.f32 %v1323_v20, %v1322_v15  ;;  %v1405_v23 = vpop.f32.mrb[43].mxu1 }
 0x14b   :  { %v1226_v24 = vpack.c.bf16 %v940_v17, %v939_v16  ;;  %v819_v25 = vadd.f32 %v1403_v18, %v1321_v13  ;;  %v1406_v26 = vadd.f32 %v1405_v23, %v1404_v19 }
 0x14d   :  { %1241 = vst [vmem:[%s1816_s3 + $0x48] sm:$0xff] %v1226_v24   ;;  %v919_v27 = vadd.f32 %v1756_v21, %v819_v25  ;;  %v822_v28 = vadd.f32 %v1406_v26, %v1324_v22 }
 0x14f   :  { %v920_v29 = vadd.f32 %v1756_v21, %v822_v28  ;;  %v941_v30 = vmax.f32 %v919_v27, 0.0 }
 0x151   :  { %v942_v31 = vmax.f32 %v920_v29, 0.0 }
 0x153   :  { %v1231_v32 = vpack.c.bf16 %v942_v31, %v941_v30 }
 0x155   :  { %1242 = vst [vmem:[%s1816_s3 + $0x50] sm:$0xff] %v1231_v32  }

// kernel: qnetwork_forward.6
= control target key start
LH: loop header
LB: loop body
LE: loop exit
PB: predicated region body
PF: predicated region fallthrough
CT: control target
= control target key end

     0   :  { %v1437_v24 = vmov 0.0   ;;  %vm1438_vm0 = vmmov 0   ;;  %s1773_s1 = inlined_call_operand.vmem [shape: bf16[640,128], index: 1, kind: input, shape index: {}]   ;;  %s1774_s0 = inlined_call_operand.vmem [shape: bf16[112,640], index: 0, kind: input, shape index: {}]   ;;  %s1775_s2 = inlined_call_operand.vmem [shape: f32[8,128], index: 2, kind: input, shape index: {}]   ;;  %s1776_s3 = inlined_call_operand.vmem [shape: bf16[112,128], index: 3, kind: output, shape index: {}]  }
   0x1   :  { %v1348_v0 = vld [vmem:[%s1773_s1 + $0x40] sm:$0xff]   ;;  %v1350_v2 = vld [vmem:[%s1773_s1 + $0x48] sm:$0xff]   ;;  %v1352_v4 = vld [vmem:[%s1773_s1 + $0x50] sm:$0xff]  }
   0x2   :  { %v1349_v1 = vld [vmem:[%s1773_s1] sm:$0xff]   ;;  %1330 = vmatprep.subr.bf16.mxu1 %v1348_v0  ;;  %1155 = vmatprep.subr.bf16.mxu0 %v1348_v0  ;;  %v1351_v3 = vld [vmem:[%s1773_s1 + $0x8] sm:$0xff]   ;;  %v1353_v5 = vld [vmem:[%s1773_s1 + $0x10] sm:$0xff]  }
   0x3   :  { %1338 = vmatpush3.bf16.msra.mxu1 %v1349_v1  ;;  %1156 = vmatpush3.bf16.msra.mxu0 %v1349_v1  ;;  %v1354_v6 = vld [vmem:[%s1773_s1 + $0x58] sm:$0xff]   ;;  %v1356_v8 = vld [vmem:[%s1773_s1 + $0x60] sm:$0xff]   ;;  %v1358_v10 = vld [vmem:[%s1773_s1 + $0x68] sm:$0xff]  }
   0x4   :  { %1331 = vmatprep.subr.bf16.mxu1 %v1350_v2  ;;  %1157 = vmatprep.subr.bf16.mxu0 %v1350_v2  ;;  %v1355_v7 = vld [vmem:[%s1773_s1 + $0x18] sm:$0xff]   ;;  %v1357_v9 = vld [vmem:[%s1773_s1 + $0x20] sm:$0xff]   ;;  %v1359_v12 = vld [vmem:[%s1773_s1 + $0x28] sm:$0xff]  }
   0x5   :  { %v1366_v11 = vld [vmem:[%s1774_s0 + $0xa4] ss:$20 sps:$4 sm:$0xff]   ;;  %v1360_v14 = vld [vmem:[%s1773_s1 + $0x70] sm:$0xff]   ;;  %v1373_v23 = vld [vmem:[%s1773_s1 + $0xc8] sm:$0xff]  }
   0x6   :  { %v1370_v13 = vld [vmem:[%s1774_s0 + $0x4] ss:$20 sps:$4 sm:$0xff]   ;;  %655 = vmatprep.mubr.bf16.mxu1 %v1366_v11  ;;  %v1361_v15 = vld [vmem:[%s1773_s1 + $0x30] sm:$0xff]   ;;  %v1377_v25 = vld [vmem:[%s1774_s0 + $0x2c] ss:$20 sps:$4 sm:$0xff]  }
   0x7   :  { %1339 = vmatpush3.bf16.msra.mxu1 %v1351_v3  ;;  %1158 = vmatpush3.bf16.msra.mxu0 %v1351_v3  ;;  %v1362_v16 = vld [vmem:[%s1773_s1 + $0x78] sm:$0xff]   ;;  %v1367_v18 = vld [vmem:[%s1773_s1 + $0xc0] sm:$0xff]   ;;  %v1374_v27 = vld [vmem:[%s1773_s1 + $0x88] sm:$0xff]  }
   0x8   :  { %1332 = vmatprep.subr.bf16.mxu1 %v1352_v4  ;;  %1159 = vmatprep.subr.bf16.mxu0 %v1352_v4  ;;  %v1363_v17 = vld [vmem:[%s1773_s1 + $0x38] sm:$0xff]   ;;  %v1364_v19 = vld [vmem:[%s1774_s0 + $0xa0] ss:$20 sps:$4 sm:$0xff]   ;;  %v1375_v28 = vld [vmem:[%s1773_s1 + $0x108] sm:$0xff]  }
   0x9   :  { %623 = vmatprep.mubr.bf16.mxu0 %v1370_v13  ;;  %v1368_v20 = vld [vmem:[%s1774_s0] ss:$20 sps:$4 sm:$0xff]   ;;  %v1380_v31 = vld [vmem:[%s1774_s0 + $0x28] ss:$20 sps:$4 sm:$0xff]   ;;  %v1392_v41 = vld [vmem:[%s1774_s0 + $0x50] ss:$20 sps:$4 sm:$0xff]  }
   0xa   :  { %v1371_v21 = vld [vmem:[%s1773_s1 + $0x80] sm:$0xff]   ;;  %v1376_v29 = vld [vmem:[%s1773_s1 + $0xd0] sm:$0xff]   ;;  %v1385_v32 = vld [vmem:[%s1774_s0 + $0xc8] ss:$20 sps:$4 sm:$0xff]  }
   0xb   :  { %1340 = vmatpush3.bf16.msra.mxu1 %v1353_v5  ;;  %1160 = vmatpush3.bf16.msra.mxu0 %v1353_v5  ;;  %v1372_v22 = vld [vmem:[%s1773_s1 + $0x100] sm:$0xff]   ;;  %v1379_v30 = vld [vmem:[%s1773_s1 + $0x90] sm:$0xff]   ;;  %v1384_v34 = vld [vmem:[%s1773_s1 + $0xd8] sm:$0xff]  }
   0xc   :  { %1333 = vmatprep.subr.bf16.mxu1 %v1354_v6  ;;  %1161 = vmatprep.subr.bf16.mxu0 %v1354_v6  ;;  %v1382_v26 = vld [vmem:[%s1774_s0 + $0xcc] ss:$20 sps:$4 sm:$0xff]   ;;  %v1381_v33 = vld [vmem:[%s1773_s1 + $0x110] sm:$0xff]   ;;  %v1386_v37 = vld [vmem:[%s1773_s1 + $0x98] sm:$0xff]  }
   0xd   :  { %v1389_v35 = vld [vmem:[%s1774_s0 + $0x54] ss:$20 sps:$4 sm:$0xff]   ;;  %v1387_v38 = vld [vmem:[%s1773_s1 + $0x118] sm:$0xff]   ;;  %v1388_v39 = vld [vmem:[%s1773_s1 + $0xe0] sm:$0xff]  }
   0xe   :  { %v1394_v36 = vld [vmem:[%s1774_s0 + $0xf4] ss:$20 sps:$4 sm:$0xff]   ;;  %v1391_v40 = vld [vmem:[%s1773_s1 + $0xa0] sm:$0xff]   ;;  %v1401_v45 = vld [vmem:[%s1774_s0 + $0x7c] ss:$20 sps:$4 sm:$0xff]  }
   0xf   :  { %1341 = vmatpush3.bf16.msra.mxu1 %v1355_v7  ;;  %1162 = vmatpush3.bf16.msra.mxu0 %v1355_v7  ;;  %v1397_v42 = vld [vmem:[%s1774_s0 + $0xf0] ss:$20 sps:$4 sm:$0xff]   ;;  %v1396_v44 = vld [vmem:[%s1773_s1 + $0xe8] sm:$0xff]   ;;  %v1406_v53 = vld [vmem:[%s1773_s1 + $0xf8] sm:$0xff]  }
  0x10   :  { %1334 = vmatprep.subr.bf16.mxu1 %v1356_v8  ;;  %1163 = vmatprep.subr.bf16.mxu0 %v1356_v8  ;;  %v1393_v43 = vld [vmem:[%s1773_s1 + $0x120] sm:$0xff]   ;;  %v1398_v47 = vld [vmem:[%s1773_s1 + $0xa8] sm:$0xff]   ;;  %v1400_v49 = vld [vmem:[%s1773_s1 + $0xf0] sm:$0xff]  }
  0x11   :  { %v1410_v46 = vld [vmem:[%s1774_s0 + $0xc] ss:$20 sps:$4 sm:$0xff]   ;;  %v1403_v50 = vld [vmem:[%s1773_s1 + $0xb0] sm:$0xff]   ;;  %v1407_v54 = vld [vmem:[%s1773_s1 + $0xb8] sm:$0xff]  }
  0x12   :  { %v1399_v48 = vld [vmem:[%s1773_s1 + $0x128] sm:$0xff]   ;;  %v1405_v52 = vld [vmem:[%s1773_s1 + $0x130] sm:$0xff]   ;;  %v1411_v55 = vld [vmem:[%s1773_s1 + $0x138] sm:$0xff]  }
  0x13   :  { %1342 = vmatpush3.bf16.msra.mxu1 %v1357_v9  ;;  %1164 = vmatpush3.bf16.msra.mxu0 %v1357_v9  ;;  %v1404_v51 = vld [vmem:[%s1774_s0 + $0x78] ss:$20 sps:$4 sm:$0xff]   ;;  %v1408_v56 = vld [vmem:[%s1774_s0 + $0x8] ss:$20 sps:$4 sm:$0xff]   ;;  %v1412_v57 = vld [vmem:[%s1774_s0 + $0x10] ss:$20 sps:$4 sm:$0xff]  }
  0x14   :  { %1335 = vmatprep.subr.bf16.mxu1 %v1358_v10  ;;  %1165 = vmatprep.subr.bf16.mxu0 %v1358_v10  ;;  %v1413_v58 = vld [vmem:[%s1774_s0 + $0x34] ss:$20 sps:$4 sm:$0xff]   ;;  %v1415_v59 = vld [vmem:[%s1774_s0 + $0x30] ss:$20 sps:$4 sm:$0xff]   ;;  %v1416_v60 = vld [vmem:[%s1774_s0 + $0x38] ss:$20 sps:$4 sm:$0xff]  }
  0x15   :  { %v1417_v61 = vld [vmem:[%s1774_s0 + $0x5c] ss:$20 sps:$4 sm:$0xff]   ;;  %v1419_v62 = vld [vmem:[%s1774_s0 + $0x58] ss:$20 sps:$4 sm:$0xff]   ;;  %v1420_v63 = vld [vmem:[%s1774_s0 + $0x60] ss:$20 sps:$4 sm:$0xff]  }
  0x16   :  { %v1421_v0 = vld [vmem:[%s1774_s0 + $0x84] ss:$20 sps:$4 sm:$0xff]   ;;  %v1423_v1 = vld [vmem:[%s1774_s0 + $0x80] ss:$20 sps:$4 sm:$0xff]   ;;  %v1424_v2 = vld [vmem:[%s1774_s0 + $0x88] ss:$20 sps:$4 sm:$0xff]  }
  0x17   :  { %1343 = vmatpush3.bf16.msra.mxu1 %v1359_v12  ;;  %1166 = vmatpush3.bf16.msra.mxu0 %v1359_v12  ;;  %v1425_v3 = vld [vmem:[%s1774_s0 + $0xac] ss:$20 sps:$4 sm:$0xff]   ;;  %v1427_v4 = vld [vmem:[%s1774_s0 + $0xa8] ss:$20 sps:$4 sm:$0xff]   ;;  %v1428_v5 = vld [vmem:[%s1774_s0 + $0xb0] ss:$20 sps:$4 sm:$0xff]  }
  0x18   :  { %1336 = vmatprep.subr.bf16.mxu1 %v1360_v14  ;;  %1167 = vmatprep.subr.bf16.mxu0 %v1360_v14  ;;  %v1429_v6 = vld [vmem:[%s1774_s0 + $0xd4] ss:$20 sps:$4 sm:$0xff]   ;;  %v1431_v7 = vld [vmem:[%s1774_s0 + $0xd0] ss:$20 sps:$4 sm:$0xff]   ;;  %v1432_v8 = vld [vmem:[%s1774_s0 + $0xd8] ss:$20 sps:$4 sm:$0xff]  }
  0x19   :  { %v1433_v9 = vld [vmem:[%s1774_s0 + $0xfc] ss:$20 sps:$4 sm:$0xff]   ;;  %v1435_v10 = vld [vmem:[%s1774_s0 + $0xf8] ss:$20 sps:$4 sm:$0xff]   ;;  %v1436_v11 = vld [vmem:[%s1774_s0 + $0x100] ss:$20 sps:$4 sm:$0xff]  }
  0x1b   :  { %1344 = vmatpush3.bf16.msra.mxu1 %v1361_v15  ;;  %1168 = vmatpush3.bf16.msra.mxu0 %v1361_v15 }
  0x1c   :  { %1337 = vmatprep.subr.bf16.mxu1 %v1362_v16  ;;  %1169 = vmatprep.subr.bf16.mxu0 %v1362_v16 }
  0x1f   :  { %1345 = vmatpush3.bf16.msra.mxu1 %v1363_v17  ;;  %1170 = vmatpush3.bf16.msra.mxu0 %v1363_v17 }
  0x20   :  { %1213 = vmatprep.subr.bf16.mxu1 %v1367_v18  ;;  %1286 = vmatprep.subr.bf16.mxu0 %v1437_v24 }
  0x22   :  { %656 = vmatmul.mubr.bf16.vlgmr.msra.gmra.mrb[0].mxu1 %v1364_v19  ;;  %624 = vmatmul.mubr.bf16.vlgmr.msra.gmra.mrb[0].mxu0 %v1368_v20 }
  0x23   :  { %1214 = vmatpush3.bf16.msra.mxu1 %v1371_v21  ;;  %1287 = vmatpush3.bf16.msra.mxu0 %v1372_v22 }
  0x24   :  { %1215 = vmatprep.subr.bf16.mxu1 %v1373_v23  ;;  %1288 = vmatprep.subr.bf16.mxu0 %v1437_v24 }
  0x25   :  { %631 = vmatprep.mubr.bf16.mxu0 %v1377_v25  ;;  %663 = vmatprep.mubr.bf16.mxu1 %v1382_v26 }
  0x27   :  { %1216 = vmatpush3.bf16.msra.mxu1 %v1374_v27  ;;  %1289 = vmatpush3.bf16.msra.mxu0 %v1375_v28 }
  0x28   :  { %1217 = vmatprep.subr.bf16.mxu1 %v1376_v29  ;;  %1290 = vmatprep.subr.bf16.mxu0 %v1437_v24 }
  0x2a   :  { %632 = vmatmul.mubr.bf16.gmra.mrb[4].mxu0 %v1380_v31  ;;  %664 = vmatmul.mubr.bf16.gmra.mrb[4].mxu1 %v1385_v32 }
  0x2b   :  { %1218 = vmatpush3.bf16.msra.mxu1 %v1379_v30  ;;  %1291 = vmatpush3.bf16.msra.mxu0 %v1381_v33 }
  0x2c   :  { %1219 = vmatprep.subr.bf16.mxu1 %v1384_v34  ;;  %1292 = vmatprep.subr.bf16.mxu0 %v1437_v24 }
  0x2d   :  { %639 = vmatprep.mubr.bf16.mxu0 %v1389_v35  ;;  %671 = vmatprep.mubr.bf16.mxu1 %v1394_v36 }
  0x2f   :  { %1220 = vmatpush3.bf16.msra.mxu1 %v1386_v37  ;;  %1293 = vmatpush3.bf16.msra.mxu0 %v1387_v38 }
  0x30   :  { %1221 = vmatprep.subr.bf16.mxu1 %v1388_v39  ;;  %1294 = vmatprep.subr.bf16.mxu0 %v1437_v24 }
  0x32   :  { %640 = vmatmul.mubr.bf16.gmra.mrb[8].mxu0 %v1392_v41  ;;  %672 = vmatmul.mubr.bf16.gmra.mrb[8].mxu1 %v1397_v42 }
  0x33   :  { %1222 = vmatpush3.bf16.msra.mxu1 %v1391_v40  ;;  %1295 = vmatpush3.bf16.msra.mxu0 %v1393_v43 }
  0x34   :  { %1223 = vmatprep.subr.bf16.mxu1 %v1396_v44  ;;  %1296 = vmatprep.subr.bf16.mxu0 %v1437_v24 }
  0x35   :  { %647 = vmatprep.mubr.bf16.mxu0 %v1401_v45  ;;  %712 = vmatprep.mubr.bf16.mxu1 %v1410_v46 }
  0x37   :  { %1224 = vmatpush3.bf16.msra.mxu1 %v1398_v47  ;;  %1297 = vmatpush3.bf16.msra.mxu0 %v1399_v48 }
  0x38   :  { %1225 = vmatprep.subr.bf16.mxu1 %v1400_v49  ;;  %1298 = vmatprep.subr.bf16.mxu0 %v1437_v24 }
  0x3a   :  { %648 = vmatmul.mubr.bf16.gmra.mrb[12].mxu0 %v1404_v51 }
  0x3b   :  { %1226 = vmatpush3.bf16.msra.mxu1 %v1403_v50  ;;  %1299 = vmatpush3.bf16.msra.mxu0 %v1405_v52 }
  0x3c   :  { %1227 = vmatprep.subr.bf16.mxu1 %v1406_v53  ;;  %1300 = vmatprep.subr.bf16.mxu0 %v1437_v24 }
  0x3d   :  { %1302 = vmatprep.mubr.msk.bf16.mxu0 %vm1438_vm0, %v1437_v24 }
  0x3f   :  { %1228 = vmatpush3.bf16.msra.mxu1 %v1407_v54  ;;  %1301 = vmatpush3.bf16.msra.mxu0 %v1411_v55 }
  0x42   :  { %713 = vmatmul.mubr.bf16.vlgmr.msra.gmra.mrb[12].mxu1 %v1408_v56  ;;  %1303 = vmatmul.mubr.bf16.vlgmr.msra.gmra.mrb[16].mxu0 %v1412_v57 }
  0x43   :  { %720 = vmatprep.mubr.bf16.mxu1 %v1413_v58  ;;  %1306 = vmatprep.mubr.msk.bf16.mxu0 %vm1438_vm0, %v1437_v24 }
  0x4a   :  { %721 = vmatmul.mubr.bf16.gmra.mrb[16].mxu1 %v1415_v59  ;;  %1307 = vmatmul.mubr.bf16.gmra.mrb[20].mxu0 %v1416_v60 }
  0x4b   :  { %728 = vmatprep.mubr.bf16.mxu1 %v1417_v61  ;;  %1310 = vmatprep.mubr.msk.bf16.mxu0 %vm1438_vm0, %v1437_v24 }
  0x52   :  { %729 = vmatmul.mubr.bf16.gmra.mrb[20].mxu1 %v1419_v62  ;;  %1311 = vmatmul.mubr.bf16.gmra.mrb[24].mxu0 %v1420_v63 }
  0x53   :  { %736 = vmatprep.mubr.bf16.mxu1 %v1421_v0  ;;  %1314 = vmatprep.mubr.msk.bf16.mxu0 %vm1438_vm0, %v1437_v24 }
  0x5a   :  { %737 = vmatmul.mubr.bf16.gmra.mrb[24].mxu1 %v1423_v1  ;;  %1315 = vmatmul.mubr.bf16.gmra.mrb[28].mxu0 %v1424_v2  ;;  %v1727_v1 = vld [vmem:[%s1775_s2] ss:$0 sm:$0xff] }
  0x5b   :  { %744 = vmatprep.mubr.bf16.mxu1 %v1425_v3  ;;  %1318 = vmatprep.mubr.msk.bf16.mxu0 %vm1438_vm0, %v1437_v24 }
  0x62   :  { %745 = vmatmul.mubr.bf16.gmra.mrb[28].mxu1 %v1427_v4  ;;  %1319 = vmatmul.mubr.bf16.gmra.mrb[32].mxu0 %v1428_v5 }
  0x63   :  { %752 = vmatprep.mubr.bf16.mxu1 %v1429_v6  ;;  %1322 = vmatprep.mubr.msk.bf16.mxu0 %vm1438_vm0, %v1437_v24 }
  0x6a   :  { %753 = vmatmul.mubr.bf16.gmra.mrb[32].mxu1 %v1431_v7  ;;  %1323 = vmatmul.mubr.bf16.gmra.mrb[36].mxu0 %v1432_v8 }
  0x6b   :  { %760 = vmatprep.mubr.bf16.mxu1 %v1433_v9  ;;  %1326 = vmatprep.mubr.msk.bf16.mxu0 %vm1438_vm0, %v1437_v24 }
  0x72   :  { %761 = vmatmul.mubr.bf16.gmra.mrb[36].mxu1 %v1435_v10  ;;  %1327 = vmatmul.mubr.bf16.gmra.mrb[40].mxu0 %v1436_v11 }
  0xf5   :  { %v1195_v12 = vpop.f32.mrb[0].mxu1  ;;  %v1171_v13 = vpop.f32.mrb[0].mxu0 }
  0xf6   :  { %v1196_v14 = vpop.f32.mrb[1].mxu1  ;;  %v1172_v15 = vpop.f32.mrb[1].mxu0 }
  0xf7   :  { %v1706_v16 = vadd.f32 %v1196_v14, %v1195_v12  ;;  %v1198_v17 = vpop.f32.mrb[2].mxu1  ;;  %v1173_v18 = vadd.f32 %v1172_v15, %v1171_v13  ;;  %v1174_v19 = vpop.f32.mrb[2].mxu0 }
  0xf8   :  { %v1199_v20 = vpop.f32.mrb[3].mxu1  ;;  %v1175_v21 = vpop.f32.mrb[3].mxu0 }
  0xf9   :  { %v1708_v22 = vadd.f32 %v1199_v20, %v1198_v17  ;;  %v1176_v23 = vadd.f32 %v1175_v21, %v1174_v19 }
  0xfd   :  { %v1177_v24 = vpop.f32.mrb[4].mxu0  ;;  %v1201_v25 = vpop.f32.mrb[4].mxu1 }
  0xfe   :  { %v1178_v26 = vpop.f32.mrb[5].mxu0  ;;  %v1202_v27 = vpop.f32.mrb[5].mxu1 }
  0xff   :  { %v1179_v28 = vadd.f32 %v1178_v26, %v1177_v24  ;;  %v1180_v29 = vpop.f32.mrb[6].mxu0  ;;  %v1710_v30 = vadd.f32 %v1202_v27, %v1201_v25  ;;  %v1204_v31 = vpop.f32.mrb[6].mxu1 }
 0x100   :  { %v1181_v32 = vpop.f32.mrb[7].mxu0  ;;  %v1205_v33 = vpop.f32.mrb[7].mxu1 }
 0x101   :  { %v1182_v34 = vadd.f32 %v1181_v32, %v1180_v29  ;;  %v1712_v35 = vadd.f32 %v1205_v33, %v1204_v31 }
 0x105   :  { %v1183_v36 = vpop.f32.mrb[8].mxu0  ;;  %v1207_v37 = vpop.f32.mrb[8].mxu1 }
 0x106   :  { %v1184_v38 = vpop.f32.mrb[9].mxu0  ;;  %v1208_v39 = vpop.f32.mrb[9].mxu1 }
 0x107   :  { %v1714_v40 = vadd.f32 %v1184_v38, %v1183_v36  ;;  %v1186_v41 = vpop.f32.mrb[10].mxu0  ;;  %v1716_v42 = vadd.f32 %v1208_v39, %v1207_v37  ;;  %v1210_v43 = vpop.f32.mrb[10].mxu1 }
 0x108   :  { %v1187_v44 = vpop.f32.mrb[11].mxu0  ;;  %v1211_v45 = vpop.f32.mrb[11].mxu1 }
 0x109   :  { %v1188_v46 = vadd.f32 %v1187_v44, %v1186_v41  ;;  %v1718_v47 = vadd.f32 %v1211_v45, %v1210_v43 }
 0x10d   :  { %v1189_v48 = vpop.f32.mrb[12].mxu0 }
 0x10e   :  { %v1190_v49 = vpop.f32.mrb[13].mxu0 }
 0x10f   :  { %v1720_v50 = vadd.f32 %v1190_v49, %v1189_v48  ;;  %v1192_v51 = vpop.f32.mrb[14].mxu0 }
 0x110   :  { %v1193_v52 = vpop.f32.mrb[15].mxu0 }
 0x111   :  { %v1722_v53 = vadd.f32 %v1193_v52, %v1192_v51 }
 0x115   :  { %v1229_v54 = vpop.f32.mrb[12].mxu1  ;;  %v803_v55 = vpop.f32.mrb[16].mxu0 }
 0x116   :  { %v1230_v56 = vpop.f32.mrb[13].mxu1  ;;  %v1304_v57 = vpop.f32.mrb[17].mxu0 }
 0x117   :  { %v1231_v58 = vadd.f32 %v1230_v56, %v1229_v54  ;;  %v1232_v59 = vpop.f32.mrb[14].mxu1  ;;  %v806_v60 = vpop.f32.mrb[18].mxu0 }
 0x118   :  { %v1233_v61 = vpop.f32.mrb[15].mxu1  ;;  %v1305_v62 = vpop.f32.mrb[19].mxu0 }
 0x119   :  { %v715_v63 = vadd.f32 %v1231_v58, %v1173_v18  ;;  %v1234_v0 = vadd.f32 %v1233_v61, %v1232_v59 }
 0x11b   :  { %v804_v2 = vadd.f32 %v803_v55, %v715_v63  ;;  %v718_v3 = vadd.f32 %v1234_v0, %v1176_v23 }
 0x11d   :  { %v908_v4 = vadd.f32 %v1727_v1, %v804_v2  ;;  %v807_v5 = vadd.f32 %v806_v60, %v718_v3  ;;  %v1235_v6 = vpop.f32.mrb[16].mxu1  ;;  %v811_v7 = vpop.f32.mrb[20].mxu0 }
 0x11e   :  { %v1236_v8 = vpop.f32.mrb[17].mxu1  ;;  %v1308_v9 = vpop.f32.mrb[21].mxu0 }
 0x11f   :  { %v909_v10 = vadd.f32 %v1727_v1, %v807_v5  ;;  %v1237_v11 = vadd.f32 %v1236_v8, %v1235_v6  ;;  %v1238_v12 = vpop.f32.mrb[18].mxu1  ;;  %v814_v13 = vpop.f32.mrb[22].mxu0  ;;  %v922_v17 = vmax.f32 %v908_v4, 0.0 }
 0x120   :  { %v1239_v14 = vpop.f32.mrb[19].mxu1  ;;  %v1309_v15 = vpop.f32.mrb[23].mxu0 }
 0x121   :  { %v923_v18 = vmax.f32 %v909_v10, 0.0  ;;  %v723_v19 = vadd.f32 %v1237_v11, %v1179_v28  ;;  %v1240_v20 = vadd.f32 %v1239_v14, %v1238_v12 }
 0x123   :  { %v1117_v21 = vpack.c.bf16 %v923_v18, %v922_v17  ;;  %v812_v23 = vadd.f32 %v811_v7, %v723_v19  ;;  %v726_v24 = vadd.f32 %v1240_v20, %v1182_v34 }
 0x125   :  { %1118 = vst [vmem:[%s1776_s3] sm:$0xff] %v1117_v21   ;;  %v910_v25 = vadd.f32 %v1727_v1, %v812_v23  ;;  %v815_v26 = vadd.f32 %v814_v13, %v726_v24  ;;  %v1241_v27 = vpop.f32.mrb[20].mxu1  ;;  %v819_v29 = vpop.f32.mrb[24].mxu0 }
 0x126   :  { %v1242_v31 = vpop.f32.mrb[21].mxu1  ;;  %v1312_v32 = vpop.f32.mrb[25].mxu0 }
 0x127   :  { %v911_v33 = vadd.f32 %v1727_v1, %v815_v26  ;;  %v1243_v36 = vadd.f32 %v1242_v31, %v1241_v27  ;;  %v1244_v37 = vpop.f32.mrb[22].mxu1  ;;  %v822_v28 = vpop.f32.mrb[26].mxu0  ;;  %v924_v41 = vmax.f32 %v910_v25, 0.0 }
 0x128   :  { %v1245_v38 = vpop.f32.mrb[23].mxu1  ;;  %v1313_v39 = vpop.f32.mrb[27].mxu0 }
 0x129   :  { %v925_v34 = vmax.f32 %v911_v33, 0.0  ;;  %v731_v43 = vadd.f32 %v1243_v36, %v1714_v40  ;;  %v1246_v44 = vadd.f32 %v1245_v38, %v1244_v37 }
 0x12b   :  { %v1122_v45 = vpack.c.bf16 %v925_v34, %v924_v41  ;;  %v820_v48 = vadd.f32 %v819_v29, %v731_v43  ;;  %v734_v49 = vadd.f32 %v1246_v44, %v1188_v46 }
 0x12d   :  { %1149 = vst [vmem:[%s1776_s3 + $0x8] sm:$0xff] %v1122_v45   ;;  %v912_v51 = vadd.f32 %v1727_v1, %v820_v48  ;;  %v823_v52 = vadd.f32 %v822_v28, %v734_v49  ;;  %v1247_v54 = vpop.f32.mrb[24].mxu1  ;;  %v827_v55 = vpop.f32.mrb[28].mxu0 }
 0x12e   :  { %v1248_v56 = vpop.f32.mrb[25].mxu1  ;;  %v1316_v57 = vpop.f32.mrb[29].mxu0 }
 0x12f   :  { %v913_v58 = vadd.f32 %v1727_v1, %v823_v52  ;;  %v1249_v59 = vadd.f32 %v1248_v56, %v1247_v54  ;;  %v1250_v60 = vpop.f32.mrb[26].mxu1  ;;  %v830_v40 = vpop.f32.mrb[30].mxu0  ;;  %v926_v63 = vmax.f32 %v912_v51, 0.0 }
 0x130   :  { %v1251_v61 = vpop.f32.mrb[27].mxu1  ;;  %v1317_v62 = vpop.f32.mrb[31].mxu0 }
 0x131   :  { %v927_v46 = vmax.f32 %v913_v58, 0.0  ;;  %v739_v0 = vadd.f32 %v1249_v59, %v1720_v50  ;;  %v1252_v2 = vadd.f32 %v1251_v61, %v1250_v60 }
 0x133   :  { %v1127_v3 = vpack.c.bf16 %v927_v46, %v926_v63  ;;  %v828_v4 = vadd.f32 %v827_v55, %v739_v0  ;;  %v742_v5 = vadd.f32 %v1252_v2, %v1722_v53 }
 0x135   :  { %1150 = vst [vmem:[%s1776_s3 + $0x10] sm:$0xff] %v1127_v3   ;;  %v914_v6 = vadd.f32 %v1727_v1, %v828_v4  ;;  %v831_v7 = vadd.f32 %v830_v40, %v742_v5  ;;  %v1253_v8 = vpop.f32.mrb[28].mxu1  ;;  %v835_v9 = vpop.f32.mrb[32].mxu0 }
 0x136   :  { %v1254_v10 = vpop.f32.mrb[29].mxu1  ;;  %v1320_v11 = vpop.f32.mrb[33].mxu0 }
 0x137   :  { %v915_v12 = vadd.f32 %v1727_v1, %v831_v7  ;;  %v1255_v13 = vadd.f32 %v1254_v10, %v1253_v8  ;;  %v1256_v50 = vpop.f32.mrb[30].mxu1  ;;  %v838_v14 = vpop.f32.mrb[34].mxu0  ;;  %v928_v18 = vmax.f32 %v914_v6, 0.0 }
 0x138   :  { %v1257_v15 = vpop.f32.mrb[31].mxu1  ;;  %v1321_v17 = vpop.f32.mrb[35].mxu0 }
 0x139   :  { %v929_v53 = vmax.f32 %v915_v12, 0.0  ;;  %v747_v19 = vadd.f32 %v1255_v13, %v1706_v16  ;;  %v1258_v20 = vadd.f32 %v1257_v15, %v1256_v50 }
 0x13b   :  { %v1132_v21 = vpack.c.bf16 %v929_v53, %v928_v18  ;;  %v836_v23 = vadd.f32 %v835_v9, %v747_v19  ;;  %v750_v24 = vadd.f32 %v1258_v20, %v1708_v22 }
 0x13d   :  { %1151 = vst [vmem:[%s1776_s3 + $0x18] sm:$0xff] %v1132_v21   ;;  %v916_v25 = vadd.f32 %v1727_v1, %v836_v23  ;;  %v839_v26 = vadd.f32 %v838_v14, %v750_v24  ;;  %v1259_v27 = vpop.f32.mrb[32].mxu1  ;;  %v843_v29 = vpop.f32.mrb[36].mxu0 }
 0x13e   :  { %v1260_v31 = vpop.f32.mrb[33].mxu1  ;;  %v1324_v32 = vpop.f32.mrb[37].mxu0 }
 0x13f   :  { %v917_v33 = vadd.f32 %v1727_v1, %v839_v26  ;;  %v1261_v36 = vadd.f32 %v1260_v31, %v1259_v27  ;;  %v1262_v16 = vpop.f32.mrb[34].mxu1  ;;  %v846_v37 = vpop.f32.mrb[38].mxu0  ;;  %v930_v39 = vmax.f32 %v916_v25, 0.0 }
 0x140   :  { %v1263_v28 = vpop.f32.mrb[35].mxu1  ;;  %v1325_v38 = vpop.f32.mrb[39].mxu0 }
 0x141   :  { %v931_v22 = vmax.f32 %v917_v33, 0.0  ;;  %v755_v41 = vadd.f32 %v1261_v36, %v1710_v30  ;;  %v1264_v34 = vadd.f32 %v1263_v28, %v1262_v16 }
 0x143   :  { %v1137_v43 = vpack.c.bf16 %v931_v22, %v930_v39  ;;  %v844_v44 = vadd.f32 %v843_v29, %v755_v41  ;;  %v758_v45 = vadd.f32 %v1264_v34, %v1712_v35 }
 0x145   :  { %1152 = vst [vmem:[%s1776_s3 + $0x20] sm:$0xff] %v1137_v43   ;;  %v918_v48 = vadd.f32 %v1727_v1, %v844_v44  ;;  %v847_v49 = vadd.f32 %v846_v37, %v758_v45  ;;  %v1265_v51 = vpop.f32.mrb[36].mxu1  ;;  %v851_v52 = vpop.f32.mrb[40].mxu0 }
 0x146   :  { %v1266_v54 = vpop.f32.mrb[37].mxu1  ;;  %v1328_v55 = vpop.f32.mrb[41].mxu0 }
 0x147   :  { %v919_v56 = vadd.f32 %v1727_v1, %v847_v49  ;;  %v1267_v57 = vadd.f32 %v1266_v54, %v1265_v51  ;;  %v1268_v30 = vpop.f32.mrb[38].mxu1  ;;  %v854_v58 = vpop.f32.mrb[42].mxu0  ;;  %v932_v40 = vmax.f32 %v918_v48, 0.0 }
 0x148   :  { %v1269_v59 = vpop.f32.mrb[39].mxu1  ;;  %v1329_v60 = vpop.f32.mrb[43].mxu0 }
 0x149   :  { %v933_v35 = vmax.f32 %v919_v56, 0.0  ;;  %v763_v61 = vadd.f32 %v1267_v57, %v1716_v42  ;;  %v1270_v62 = vadd.f32 %v1269_v59, %v1268_v30 }
 0x14b   :  { %v1142_v63 = vpack.c.bf16 %v933_v35, %v932_v40  ;;  %v852_v46 = vadd.f32 %v851_v52, %v763_v61  ;;  %v766_v0 = vadd.f32 %v1270_v62, %v1718_v47 }
 0x14d   :  { %1153 = vst [vmem:[%s1776_s3 + $0x28] sm:$0xff] %v1142_v63   ;;  %v920_v2 = vadd.f32 %v1727_v1, %v852_v46  ;;  %v855_v3 = vadd.f32 %v854_v58, %v766_v0 }
 0x14f   :  { %v921_v4 = vadd.f32 %v1727_v1, %v855_v3  ;;  %v934_v5 = vmax.f32 %v920_v2, 0.0 }
 0x151   :  { %v935_v6 = vmax.f32 %v921_v4, 0.0 }
 0x153   :  { %v1147_v7 = vpack.c.bf16 %v935_v6, %v934_v5 }
 0x155   :  { %1154 = vst [vmem:[%s1776_s3 + $0x30] sm:$0xff] %v1147_v7  }

// kernel: qnetwork_forward.7
= control target key start
LH: loop header
LB: loop body
LE: loop exit
PB: predicated region body
PF: predicated region fallthrough
CT: control target
= control target key end

     0   :  { %s5390_s18 = smov 0   ;;  %s5392_s19 = smov 0   ;;  %s5998_s0 = inlined_call_operand.vmem [shape: bf16[16,3328], index: 0, kind: input, shape index: {}]   ;;  %s5999_s1 = inlined_call_operand.vmem [shape: bf16[3328,512], index: 1, kind: input, shape index: {}]   ;;  %s6000_s2 = inlined_call_operand.vmem [shape: f32[8,512], index: 2, kind: input, shape index: {}]   ;;  %s6001_s3 = inlined_call_operand.vmem [shape: bf16[512,128], index: 3, kind: input, shape index: {}]   ;;  %s6002_s4 = inlined_call_operand.vmem [shape: f32[8,128], index: 4, kind: input, shape index: {}]   ;;  %s6003_s5 = inlined_call_operand.vmem [shape: f32[16,128], index: 5, kind: output, shape index: {}]  }
   0x1   :  { %s5394_s20 = smov 0   ;;  %s5396_s21 = smov 0  }
   0x2   :  { %s5398_s22 = smov 0  }
   0x3 LB: > { %s24_s23 = sadd.s32 1, %s5352_s21  ;;  %p43_p1 = scmp.ne.s32.totalorder %s5344_s19, %s5340_s18  ;;  %s5356_s22 = sphi %s5398_s22, %s15_s22   ;;  %s5352_s21 = sphi %s5396_s21, %s6007_s21   ;;  %s5348_s20 = sphi %s5394_s20, %s6006_s20   ;;  %s5344_s19 = sphi %s5392_s19, %s6005_s19   ;;  %s5340_s18 = sphi %s5390_s18, %s6004_s18  }
   0x4   : > { %p25_p0 = scmp.ge.s32.totalorder %s24_s23, 2  ;;  %p44_p2 = scmp.eq.s32.totalorder %s5356_s22, 0 }
   0x5   : > { %s36_s25 = sadd.s32 1, %s5344_s19  ;;  %p4028_p5 = scmp.ge.s32.totalorder %s5356_s22, 2 }
   0x6   : > { %s6009_s23 = smov (%p25_p0, %s24_s23), 0  ;;  %p45_p3 = por %p44_p2, %p43_p1 }
   0x7   : > { %s32_s24 = ssub.s32 %s5352_s21, %s6009_s23  ;;  %193 = sbr.rel (%p4028_p5) target bundleno = 26 (0x1a), region = 28 }
   0x8   : > { %p34_p4 = scmp.eq.s32.totalorder %s32_s24, 0 }
   0xa   : > { %s5425_s26 = scalar_select %p34_p4, %s5344_s19, %s36_s25  }
   0xe   : > { %196 = sbr.rel (!%p45_p3) target bundleno = 26 (0x1a), region = 32  ;;  %s198_s27 = sand.u32 (%p45_p3), 1, %s5344_s19  }
   0xf   : > { %s4505_s28 = smul.u32 (%p45_p3), 52, %s5352_s21 }
  0x10   : > { %s4599_s29 = smul.u32 (%p45_p3), 104, %s198_s27 }
  0x11   : > { %s206_s7 = scalar_lea.vmem (%p45_p3), %s5998_s0, %s4505_s28 }
  0x12   : > { %v221_v0 = vld [vmem:[%s206_s7] sm:$0xff] (%p45_p3)  ;;  %v223_v1 = vld [vmem:[%s206_s7 + $0x8] sm:$0xff] (%p45_p3)  ;;  %v225_v2 = vld [vmem:[%s206_s7 + $0x10] sm:$0xff] (%p45_p3)  ;;  %s200_s8 = scalar_lea.vmem (%p45_p3), [#allocation3], %s4599_s29 }
  0x13   : > { %222 = vst [vmem:[%s200_s8] sm:$0xff] (%p45_p3), %v221_v0  ;;  %224 = vst [vmem:[%s200_s8 + $0x8] sm:$0xff] (%p45_p3), %v223_v1  ;;  %v227_v3 = vld [vmem:[%s206_s7 + $0x18] sm:$0xff] (%p45_p3)  ;;  %v229_v4 = vld [vmem:[%s206_s7 + $0x20] sm:$0xff] (%p45_p3) }
  0x14   : > { %226 = vst [vmem:[%s200_s8 + $0x10] sm:$0xff] (%p45_p3), %v225_v2  ;;  %v231_v5 = vld [vmem:[%s206_s7 + $0x28] sm:$0xff] (%p45_p3)  ;;  %228 = vst [vmem:[%s200_s8 + $0x18] sm:$0xff] (%p45_p3), %v227_v3  ;;  %v235_v7 = vld [vmem:[%s206_s7 + $0x70] sm:$0xff] (%p45_p3) }
  0x15   : > { %230 = vst [vmem:[%s200_s8 + $0x20] sm:$0xff] %v229_v4  ;;  %232 = vst [vmem:[%s200_s8 + $0x28] sm:$0xff] %v231_v5  ;;  %v233_v6 = vld [vmem:[%s206_s7 + $0x68] sm:$0xff]  ;;  %v237_v8 = vld [vmem:[%s206_s7 + $0x78] sm:$0xff] }
  0x16   : > { %234 = vst [vmem:[%s200_s8 + $0x34] sm:$0xff] %v233_v6  ;;  %236 = vst [vmem:[%s200_s8 + $0x3c] sm:$0xff] %v235_v7  ;;  %v239_v9 = vld [vmem:[%s206_s7 + $0x80] sm:$0xff]  ;;  %v241_v10 = vld [vmem:[%s206_s7 + $0x88] sm:$0xff] }
  0x17   : > { %238 = vst [vmem:[%s200_s8 + $0x44] sm:$0xff] %v237_v8  ;;  %v243_v11 = vld [vmem:[%s206_s7 + $0x90] sm:$0xff]  ;;  %240 = vst [vmem:[%s200_s8 + $0x4c] sm:$0xff] %v239_v9  ;;  %v4032_v13 = vld [vmem:[%s206_s7 + $0x98] sm:$0xf] }
  0x18   : > { %242 = vst [vmem:[%s200_s8 + $0x54] sm:$0xff] %v241_v10  ;;  %244 = vst [vmem:[%s200_s8 + $0x5c] sm:$0xff] %v243_v11  ;;  %v4030_v12 = vld [vmem:[%s206_s7 + $0x30] sm:$0xf] }
  0x19   : > { %4031 = vst [vmem:[%s200_s8 + $0x30] sm:$0xf] %v4030_v12  ;;  %4033 = vst [vmem:[%s200_s8 + $0x64] sm:$0xf] %v4032_v13 }
  0x1a PF: > { %p4034_p6 = scmp.ge.s32.totalorder %s5356_s22, 1  ;;  %p270_p7 = scmp.lt.s32.totalorder %s5356_s22, 3 }
  0x1c   : > { %p271_p8 = pnand %p4034_p6, %p270_p7 }
  0x1d   : > { %s277_s9 = sand.u32 (!%p271_p8), 1, %s5340_s18   ;;  %s312_s10 = smul.u32 (!%p271_p8), 208, %s5348_s20 }
  0x1e   : > { %274 = sbr.rel (%p271_p8) target bundleno = 915 (0x393), region = 62  ;;  %p4037_p10 = scmp.ne.s32.totalorder (!%p271_p8), %s5348_s20, 0 }
  0x1f   : > { %s4600_s11 = smul.u32 (!%p271_p8), 104, %s277_s9  ;;  %p313_p9 = scmp.lt.s32.totalorder (!%p271_p8), %s312_s10, 415 }
  0x21   : > { %s5442_s16 = scalar_lea.vmem (!%p271_p8), [#allocation3], %s4600_s11 }
  0x25   : > { %s6011_s10 = smov (!%p313_p9, %s312_s10), 415  ;;  %329 = sbr.rel (%p4037_p10) target bundleno = 44 (0x2c), region = 70 }
  0x26   : > { %s4506_s12 = sshll.u32 %s6011_s10, 4  ;;  %v5358_v14 = vmov (!%p4037_p10), 0.0  }
  0x27   : > { %s5440_s15 = scalar_lea.vmem %s5999_s1, %s4506_s12  ;;  %330 = vst [vmem:[#allocation2] sm:$0xff] (!%p4037_p10), %v5358_v14  ;;  %331 = vst [vmem:[#allocation2 + $0x8] sm:$0xff] (!%p4037_p10), %v5358_v14 }
  0x28   : > { %332 = vst [vmem:[#allocation2 + $0x10] sm:$0xff] (!%p4037_p10), %v5358_v14  ;;  %333 = vst [vmem:[#allocation2 + $0x18] sm:$0xff] (!%p4037_p10), %v5358_v14 }
  0x29   : > { %334 = vst [vmem:[#allocation2 + $0x20] sm:$0xff] (!%p4037_p10), %v5358_v14  ;;  %335 = vst [vmem:[#allocation2 + $0x28] sm:$0xff] (!%p4037_p10), %v5358_v14 }
  0x2a   : > { %336 = vst [vmem:[#allocation2 + $0x30] sm:$0xff] (!%p4037_p10), %v5358_v14  ;;  %337 = vst [vmem:[#allocation2 + $0x38] sm:$0xff] (!%p4037_p10), %v5358_v14 }
  0x2c PF: > { %v4643_v15 = vld [vmem:[%s5440_s15 + $0x4] ss:$16 sps:$4 sm:$0xff]   ;;  %v4645_v16 = vld [vmem:[%s5440_s15 + $0xc] ss:$16 sps:$4 sm:$0xff]   ;;  %v4647_v17 = vld [vmem:[%s5440_s15] ss:$16 sps:$4 sm:$0xff]  }
  0x2d   : > { %2922 = vmatprep.subr.bf16.mxu0 %v4643_v15  ;;  %v4648_v18 = vld [vmem:[%s5440_s15 + $0x8] ss:$16 sps:$4 sm:$0xff]   ;;  %3223 = vmatprep.subr.bf16.mxu1 %v4645_v16  ;;  %v4649_v19 = vld [vmem:[%s5440_s15 + $0x24] ss:$16 sps:$4 sm:$0xff]   ;;  %v4651_v20 = vld [vmem:[%s5440_s15 + $0x2c] ss:$16 sps:$4 sm:$0xff]  }
  0x2e   : > { %2923 = vmatpush1.bf16.msra.mxu0 %v4647_v17  ;;  %3224 = vmatpush1.bf16.msra.mxu1 %v4648_v18  ;;  %v4653_v21 = vld [vmem:[%s5440_s15 + $0x20] ss:$16 sps:$4 sm:$0xff]   ;;  %v4654_v22 = vld [vmem:[%s5440_s15 + $0x28] ss:$16 sps:$4 sm:$0xff]   ;;  %v4655_v23 = vld [vmem:[%s5440_s15 + $0x44] ss:$16 sps:$4 sm:$0xff]  }
  0x2f   : > { %2924 = vmatprep.subr.bf16.mxu0 %v4649_v19  ;;  %3225 = vmatprep.subr.bf16.mxu1 %v4651_v20  ;;  %v4657_v24 = vld [vmem:[%s5440_s15 + $0x4c] ss:$16 sps:$4 sm:$0xff]   ;;  %v4659_v25 = vld [vmem:[%s5440_s15 + $0x40] ss:$16 sps:$4 sm:$0xff]   ;;  %v4660_v26 = vld [vmem:[%s5440_s15 + $0x48] ss:$16 sps:$4 sm:$0xff]  }
  0x30   : > { %v4661_v27 = vld [vmem:[%s5440_s15 + $0x64] ss:$16 sps:$4 sm:$0xff]   ;;  %v4663_v28 = vld [vmem:[%s5440_s15 + $0x6c] ss:$16 sps:$4 sm:$0xff]   ;;  %v4665_v29 = vld [vmem:[%s5440_s15 + $0x60] ss:$16 sps:$4 sm:$0xff]  }
  0x31   : > { %v4666_v30 = vld [vmem:[%s5440_s15 + $0x68] ss:$16 sps:$4 sm:$0xff]   ;;  %v4667_v31 = vld [vmem:[%s5440_s15 + $0x84] ss:$16 sps:$4 sm:$0xff]   ;;  %v4669_v32 = vld [vmem:[%s5440_s15 + $0x8c] ss:$16 sps:$4 sm:$0xff]  }
  0x32   : > { %2925 = vmatpush1.bf16.msra.mxu0 %v4653_v21  ;;  %3226 = vmatpush1.bf16.msra.mxu1 %v4654_v22  ;;  %v4671_v33 = vld [vmem:[%s5440_s15 + $0x80] ss:$16 sps:$4 sm:$0xff]   ;;  %v4672_v34 = vld [vmem:[%s5440_s15 + $0x88] ss:$16 sps:$4 sm:$0xff]   ;;  %v4673_v35 = vld [vmem:[%s5440_s15 + $0xa4] ss:$16 sps:$4 sm:$0xff]  }
  0x33   : > { %2926 = vmatprep.subr.bf16.mxu0 %v4655_v23  ;;  %3227 = vmatprep.subr.bf16.mxu1 %v4657_v24  ;;  %v4675_v36 = vld [vmem:[%s5440_s15 + $0xac] ss:$16 sps:$4 sm:$0xff]   ;;  %v4677_v37 = vld [vmem:[%s5440_s15 + $0xa0] ss:$16 sps:$4 sm:$0xff]   ;;  %v4678_v38 = vld [vmem:[%s5440_s15 + $0xa8] ss:$16 sps:$4 sm:$0xff]  }
  0x34   : > { %v4679_v39 = vld [vmem:[%s5440_s15 + $0xc4] ss:$16 sps:$4 sm:$0xff]   ;;  %v4681_v40 = vld [vmem:[%s5440_s15 + $0xcc] ss:$16 sps:$4 sm:$0xff]   ;;  %v4683_v41 = vld [vmem:[%s5440_s15 + $0xc0] ss:$16 sps:$4 sm:$0xff]  }
  0x35   : > { %v4684_v42 = vld [vmem:[%s5440_s15 + $0xc8] ss:$16 sps:$4 sm:$0xff]   ;;  %v4685_v43 = vld [vmem:[%s5440_s15 + $0xe4] ss:$16 sps:$4 sm:$0xff]   ;;  %v4687_v44 = vld [vmem:[%s5440_s15 + $0xec] ss:$16 sps:$4 sm:$0xff]  }
  0x36   : > { %2927 = vmatpush1.bf16.msra.mxu0 %v4659_v25  ;;  %3228 = vmatpush1.bf16.msra.mxu1 %v4660_v26  ;;  %v4689_v45 = vld [vmem:[%s5440_s15 + $0xe0] ss:$16 sps:$4 sm:$0xff]   ;;  %v4690_v46 = vld [vmem:[%s5440_s15 + $0xe8] ss:$16 sps:$4 sm:$0xff]   ;;  %v4691_v47 = vld [vmem:[%s5440_s15 + $0x104] ss:$16 sps:$4 sm:$0xff]  }
  0x37   : > { %2928 = vmatprep.subr.bf16.mxu0 %v4661_v27  ;;  %3229 = vmatprep.subr.bf16.mxu1 %v4663_v28  ;;  %v4693_v48 = vld [vmem:[%s5440_s15 + $0x10c] ss:$16 sps:$4 sm:$0xff]   ;;  %v4695_v49 = vld [vmem:[%s5440_s15 + $0x100] ss:$16 sps:$4 sm:$0xff]   ;;  %v4696_v50 = vld [vmem:[%s5440_s15 + $0x108] ss:$16 sps:$4 sm:$0xff]  }
  0x38   : > { %v4697_v51 = vld [vmem:[%s5440_s15 + $0x124] ss:$16 sps:$4 sm:$0xff]   ;;  %v4699_v52 = vld [vmem:[%s5440_s15 + $0x12c] ss:$16 sps:$4 sm:$0xff]   ;;  %v4701_v53 = vld [vmem:[%s5440_s15 + $0x120] ss:$16 sps:$4 sm:$0xff]  }
  0x39   : > { %v4702_v54 = vld [vmem:[%s5440_s15 + $0x128] ss:$16 sps:$4 sm:$0xff]   ;;  %v4703_v55 = vld [vmem:[%s5440_s15 + $0x144] ss:$16 sps:$4 sm:$0xff]   ;;  %v4705_v56 = vld [vmem:[%s5440_s15 + $0x14c] ss:$16 sps:$4 sm:$0xff]  }
  0x3a   : > { %2929 = vmatpush1.bf16.msra.mxu0 %v4665_v29  ;;  %3230 = vmatpush1.bf16.msra.mxu1 %v4666_v30  ;;  %v4707_v57 = vld [vmem:[%s5440_s15 + $0x140] ss:$16 sps:$4 sm:$0xff]   ;;  %v4708_v58 = vld [vmem:[%s5440_s15 + $0x148] ss:$16 sps:$4 sm:$0xff]   ;;  %v4709_v59 = vld [vmem:[%s5440_s15 + $0x164] ss:$16 sps:$4 sm:$0xff]  }
  0x3b   : > { %2930 = vmatprep.subr.bf16.mxu0 %v4667_v31  ;;  %3231 = vmatprep.subr.bf16.mxu1 %v4669_v32  ;;  %v4711_v60 = vld [vmem:[%s5440_s15 + $0x16c] ss:$16 sps:$4 sm:$0xff]   ;;  %v4713_v61 = vld [vmem:[%s5440_s15 + $0x160] ss:$16 sps:$4 sm:$0xff]   ;;  %v4714_v62 = vld [vmem:[%s5440_s15 + $0x168] ss:$16 sps:$4 sm:$0xff]  }
  0x3c   : > { %v4741_v63 = vld [vmem:[%s5442_s16 + $0x4] ss:$52 sps:$4 sm:$0xff]   ;;  %v4739_v18 = vld [vmem:[%s5442_s16] ss:$52 sps:$4 sm:$0xff]   ;;  %p4467_p11 = scmp.ne.s32.totalorder %s5348_s20, 1 }
  0x3d   : > { %v4715_v0 = vld [vmem:[%s5440_s15 + $0x184] ss:$16 sps:$4 sm:$0xff]   ;;  %v4717_v1 = vld [vmem:[%s5440_s15 + $0x18c] ss:$16 sps:$4 sm:$0xff]   ;;  %2954 = vmatprep.mubr.bf16.mxu0 %v4741_v63  ;;  %3255 = vmatprep.mubr.bf16.mxu1 %v4741_v63  ;;  %v4719_v2 = vld [vmem:[%s5440_s15 + $0x180] ss:$16 sps:$4 sm:$0xff]  }
  0x3e   : > { %2931 = vmatpush1.bf16.msra.mxu0 %v4671_v33  ;;  %3232 = vmatpush1.bf16.msra.mxu1 %v4672_v34  ;;  %v4720_v3 = vld [vmem:[%s5440_s15 + $0x188] ss:$16 sps:$4 sm:$0xff]   ;;  %v4721_v4 = vld [vmem:[%s5440_s15 + $0x1a4] ss:$16 sps:$4 sm:$0xff]   ;;  %v4723_v5 = vld [vmem:[%s5440_s15 + $0x1ac] ss:$16 sps:$4 sm:$0xff]  }
  0x3f   : > { %2932 = vmatprep.subr.bf16.mxu0 %v4673_v35  ;;  %3233 = vmatprep.subr.bf16.mxu1 %v4675_v36  ;;  %v4725_v6 = vld [vmem:[%s5440_s15 + $0x1a0] ss:$16 sps:$4 sm:$0xff]   ;;  %v4726_v7 = vld [vmem:[%s5440_s15 + $0x1a8] ss:$16 sps:$4 sm:$0xff]   ;;  %v4727_v8 = vld [vmem:[%s5440_s15 + $0x1c4] ss:$16 sps:$4 sm:$0xff]  }
  0x40   : > { %v4729_v9 = vld [vmem:[%s5440_s15 + $0x1cc] ss:$16 sps:$4 sm:$0xff]   ;;  %v4731_v10 = vld [vmem:[%s5440_s15 + $0x1c0] ss:$16 sps:$4 sm:$0xff]   ;;  %v4732_v11 = vld [vmem:[%s5440_s15 + $0x1c8] ss:$16 sps:$4 sm:$0xff]  }
  0x41   : > { %v4733_v12 = vld [vmem:[%s5440_s15 + $0x1e4] ss:$16 sps:$4 sm:$0xff]   ;;  %v4735_v13 = vld [vmem:[%s5440_s15 + $0x1ec] ss:$16 sps:$4 sm:$0xff]   ;;  %v4737_v14 = vld [vmem:[%s5440_s15 + $0x1e0] ss:$16 sps:$4 sm:$0xff]  }
  0x42   : > { %2933 = vmatpush1.bf16.msra.mxu0 %v4677_v37  ;;  %3234 = vmatpush1.bf16.msra.mxu1 %v4678_v38  ;;  %v4738_v15 = vld [vmem:[%s5440_s15 + $0x1e8] ss:$16 sps:$4 sm:$0xff]   ;;  %v4744_v16 = vld [vmem:[%s5440_s15 + $0x204] ss:$16 sps:$4 sm:$0xff]   ;;  %v4747_v17 = vld [vmem:[%s5440_s15 + $0x20c] ss:$16 sps:$4 sm:$0xff]  }
  0x43   : > { %2934 = vmatprep.subr.bf16.mxu0 %v4679_v39  ;;  %3235 = vmatprep.subr.bf16.mxu1 %v4681_v40  ;;  %v4742_v19 = vld [vmem:[%s5440_s15 + $0x200] ss:$16 sps:$4 sm:$0xff]   ;;  %v4745_v20 = vld [vmem:[%s5440_s15 + $0x208] ss:$16 sps:$4 sm:$0xff]   ;;  %v4750_v21 = vld [vmem:[%s5440_s15 + $0x224] ss:$16 sps:$4 sm:$0xff]  }
  0x44   : > { %v4753_v22 = vld [vmem:[%s5440_s15 + $0x22c] ss:$16 sps:$4 sm:$0xff]   ;;  %v4748_v23 = vld [vmem:[%s5440_s15 + $0x220] ss:$16 sps:$4 sm:$0xff]   ;;  %v4751_v24 = vld [vmem:[%s5440_s15 + $0x228] ss:$16 sps:$4 sm:$0xff]  }
  0x45   : > { %v4756_v25 = vld [vmem:[%s5440_s15 + $0x244] ss:$16 sps:$4 sm:$0xff]   ;;  %v4759_v26 = vld [vmem:[%s5440_s15 + $0x24c] ss:$16 sps:$4 sm:$0xff]   ;;  %v4754_v27 = vld [vmem:[%s5440_s15 + $0x240] ss:$16 sps:$4 sm:$0xff]  }
  0x46   : > { %2935 = vmatpush1.bf16.msra.mxu0 %v4683_v41  ;;  %3236 = vmatpush1.bf16.msra.mxu1 %v4684_v42  ;;  %v4757_v28 = vld [vmem:[%s5440_s15 + $0x248] ss:$16 sps:$4 sm:$0xff]   ;;  %v4762_v29 = vld [vmem:[%s5440_s15 + $0x264] ss:$16 sps:$4 sm:$0xff]   ;;  %v4765_v30 = vld [vmem:[%s5440_s15 + $0x26c] ss:$16 sps:$4 sm:$0xff]  }
  0x47   : > { %2936 = vmatprep.subr.bf16.mxu0 %v4685_v43  ;;  %3237 = vmatprep.subr.bf16.mxu1 %v4687_v44  ;;  %v4760_v31 = vld [vmem:[%s5440_s15 + $0x260] ss:$16 sps:$4 sm:$0xff]   ;;  %v4763_v32 = vld [vmem:[%s5440_s15 + $0x268] ss:$16 sps:$4 sm:$0xff]   ;;  %v4768_v33 = vld [vmem:[%s5440_s15 + $0x284] ss:$16 sps:$4 sm:$0xff]  }
  0x48   : > { %v4771_v34 = vld [vmem:[%s5440_s15 + $0x28c] ss:$16 sps:$4 sm:$0xff]   ;;  %v4766_v35 = vld [vmem:[%s5440_s15 + $0x280] ss:$16 sps:$4 sm:$0xff]   ;;  %v4769_v36 = vld [vmem:[%s5440_s15 + $0x288] ss:$16 sps:$4 sm:$0xff]  }
  0x49   : > { %v4774_v37 = vld [vmem:[%s5440_s15 + $0x2a4] ss:$16 sps:$4 sm:$0xff]   ;;  %v4777_v38 = vld [vmem:[%s5440_s15 + $0x2ac] ss:$16 sps:$4 sm:$0xff]   ;;  %v4772_v39 = vld [vmem:[%s5440_s15 + $0x2a0] ss:$16 sps:$4 sm:$0xff]  }
  0x4a   : > { %2937 = vmatpush1.bf16.msra.mxu0 %v4689_v45  ;;  %3238 = vmatpush1.bf16.msra.mxu1 %v4690_v46  ;;  %v4775_v40 = vld [vmem:[%s5440_s15 + $0x2a8] ss:$16 sps:$4 sm:$0xff]   ;;  %v4780_v41 = vld [vmem:[%s5440_s15 + $0x2c4] ss:$16 sps:$4 sm:$0xff]   ;;  %v4783_v42 = vld [vmem:[%s5440_s15 + $0x2cc] ss:$16 sps:$4 sm:$0xff]  }
  0x4b   : > { %2938 = vmatprep.subr.bf16.mxu0 %v4691_v47  ;;  %3239 = vmatprep.subr.bf16.mxu1 %v4693_v48  ;;  %v4778_v43 = vld [vmem:[%s5440_s15 + $0x2c0] ss:$16 sps:$4 sm:$0xff]   ;;  %v4781_v44 = vld [vmem:[%s5440_s15 + $0x2c8] ss:$16 sps:$4 sm:$0xff]   ;;  %v4786_v46 = vld [vmem:[%s5440_s15 + $0x2e4] ss:$16 sps:$4 sm:$0xff]  }
  0x4c   : > { %v4840_v45 = vld [vmem:[%s5442_s16 + $0xc] ss:$52 sps:$4 sm:$0xff]  }
  0x4d   : > { %v4789_v47 = vld [vmem:[%s5440_s15 + $0x2ec] ss:$16 sps:$4 sm:$0xff]   ;;  %v4784_v48 = vld [vmem:[%s5440_s15 + $0x2e0] ss:$16 sps:$4 sm:$0xff]  }
  0x4e   : > { %2939 = vmatpush1.bf16.msra.mxu0 %v4695_v49  ;;  %3240 = vmatpush1.bf16.msra.mxu1 %v4696_v50  ;;  %v4787_v49 = vld [vmem:[%s5440_s15 + $0x2e8] ss:$16 sps:$4 sm:$0xff]   ;;  %v4792_v50 = vld [vmem:[%s5440_s15 + $0x304] ss:$16 sps:$4 sm:$0xff]   ;;  %v4813_v63 = vld [vmem:[%s5440_s15 + $0x36c] ss:$16 sps:$4 sm:$0xff]  }
  0x4f   : > { %2940 = vmatprep.subr.bf16.mxu0 %v4697_v51  ;;  %3241 = vmatprep.subr.bf16.mxu1 %v4699_v52  ;;  %v4795_v51 = vld [vmem:[%s5440_s15 + $0x30c] ss:$16 sps:$4 sm:$0xff]   ;;  %v4790_v52 = vld [vmem:[%s5440_s15 + $0x300] ss:$16 sps:$4 sm:$0xff]  }
  0x52   : > { %2941 = vmatpush1.bf16.msra.mxu0 %v4701_v53  ;;  %3242 = vmatpush1.bf16.msra.mxu1 %v4702_v54  ;;  %v4793_v53 = vld [vmem:[%s5440_s15 + $0x308] ss:$16 sps:$4 sm:$0xff]   ;;  %v4798_v54 = vld [vmem:[%s5440_s15 + $0x324] ss:$16 sps:$4 sm:$0xff]  }
  0x53   : > { %2942 = vmatprep.subr.bf16.mxu0 %v4703_v55  ;;  %3243 = vmatprep.subr.bf16.mxu1 %v4705_v56  ;;  %v4801_v55 = vld [vmem:[%s5440_s15 + $0x32c] ss:$16 sps:$4 sm:$0xff]   ;;  %v4796_v56 = vld [vmem:[%s5440_s15 + $0x320] ss:$16 sps:$4 sm:$0xff]  }
  0x56   : > { %2943 = vmatpush1.bf16.msra.mxu0 %v4707_v57  ;;  %3244 = vmatpush1.bf16.msra.mxu1 %v4708_v58  ;;  %v4799_v57 = vld [vmem:[%s5440_s15 + $0x328] ss:$16 sps:$4 sm:$0xff]   ;;  %v4804_v58 = vld [vmem:[%s5440_s15 + $0x344] ss:$16 sps:$4 sm:$0xff]  }
  0x57   : > { %2944 = vmatprep.subr.bf16.mxu0 %v4709_v59  ;;  %3245 = vmatprep.subr.bf16.mxu1 %v4711_v60  ;;  %v4807_v59 = vld [vmem:[%s5440_s15 + $0x34c] ss:$16 sps:$4 sm:$0xff]   ;;  %v4802_v60 = vld [vmem:[%s5440_s15 + $0x340] ss:$16 sps:$4 sm:$0xff]  }
  0x5a   : > { %2945 = vmatpush1.bf16.msra.mxu0 %v4713_v61  ;;  %3246 = vmatpush1.bf16.msra.mxu1 %v4714_v62  ;;  %v4805_v61 = vld [vmem:[%s5440_s15 + $0x348] ss:$16 sps:$4 sm:$0xff]   ;;  %v4810_v62 = vld [vmem:[%s5440_s15 + $0x364] ss:$16 sps:$4 sm:$0xff]  }
  0x5b   : > { %2946 = vmatprep.subr.bf16.mxu0 %v4715_v0  ;;  %3247 = vmatprep.subr.bf16.mxu1 %v4717_v1  ;;  %v4808_v0 = vld [vmem:[%s5440_s15 + $0x360] ss:$16 sps:$4 sm:$0xff]   ;;  %v4811_v1 = vld [vmem:[%s5440_s15 + $0x368] ss:$16 sps:$4 sm:$0xff]  }
  0x5e   : > { %2947 = vmatpush1.bf16.msra.mxu0 %v4719_v2  ;;  %3248 = vmatpush1.bf16.msra.mxu1 %v4720_v3  ;;  %v4816_v2 = vld [vmem:[%s5440_s15 + $0x384] ss:$16 sps:$4 sm:$0xff]   ;;  %v4819_v3 = vld [vmem:[%s5440_s15 + $0x38c] ss:$16 sps:$4 sm:$0xff]  }
  0x5f   : > { %2948 = vmatprep.subr.bf16.mxu0 %v4721_v4  ;;  %3249 = vmatprep.subr.bf16.mxu1 %v4723_v5  ;;  %v4814_v4 = vld [vmem:[%s5440_s15 + $0x380] ss:$16 sps:$4 sm:$0xff]   ;;  %v4817_v5 = vld [vmem:[%s5440_s15 + $0x388] ss:$16 sps:$4 sm:$0xff]  }
  0x62   : > { %2949 = vmatpush1.bf16.msra.mxu0 %v4725_v6  ;;  %3250 = vmatpush1.bf16.msra.mxu1 %v4726_v7  ;;  %v4822_v6 = vld [vmem:[%s5440_s15 + $0x3a4] ss:$16 sps:$4 sm:$0xff]   ;;  %v4825_v7 = vld [vmem:[%s5440_s15 + $0x3ac] ss:$16 sps:$4 sm:$0xff]  }
  0x63   : > { %2950 = vmatprep.subr.bf16.mxu0 %v4727_v8  ;;  %3251 = vmatprep.subr.bf16.mxu1 %v4729_v9  ;;  %v4820_v8 = vld [vmem:[%s5440_s15 + $0x3a0] ss:$16 sps:$4 sm:$0xff]   ;;  %v4823_v9 = vld [vmem:[%s5440_s15 + $0x3a8] ss:$16 sps:$4 sm:$0xff]  }
  0x66   : > { %2951 = vmatpush1.bf16.msra.mxu0 %v4731_v10  ;;  %3252 = vmatpush1.bf16.msra.mxu1 %v4732_v11  ;;  %v4828_v10 = vld [vmem:[%s5440_s15 + $0x3c4] ss:$16 sps:$4 sm:$0xff]   ;;  %v4831_v11 = vld [vmem:[%s5440_s15 + $0x3cc] ss:$16 sps:$4 sm:$0xff]  }
  0x67   : > { %2952 = vmatprep.subr.bf16.mxu0 %v4733_v12  ;;  %3253 = vmatprep.subr.bf16.mxu1 %v4735_v13  ;;  %v4826_v12 = vld [vmem:[%s5440_s15 + $0x3c0] ss:$16 sps:$4 sm:$0xff]   ;;  %v4829_v13 = vld [vmem:[%s5440_s15 + $0x3c8] ss:$16 sps:$4 sm:$0xff]  }
  0x6a   : > { %2953 = vmatpush1.bf16.msra.mxu0 %v4737_v14  ;;  %3254 = vmatpush1.bf16.msra.mxu1 %v4738_v15  ;;  %v4834_v14 = vld [vmem:[%s5440_s15 + $0x3e4] ss:$16 sps:$4 sm:$0xff]   ;;  %v4837_v15 = vld [vmem:[%s5440_s15 + $0x3ec] ss:$16 sps:$4 sm:$0xff]  }
  0x6b   : > { %2965 = vmatprep.subr.bf16.mxu0 %v4744_v16  ;;  %3266 = vmatprep.subr.bf16.mxu1 %v4747_v17  ;;  %v4832_v16 = vld [vmem:[%s5440_s15 + $0x3e0] ss:$16 sps:$4 sm:$0xff]   ;;  %v4835_v17 = vld [vmem:[%s5440_s15 + $0x3e8] ss:$16 sps:$4 sm:$0xff]  }
  0x6d   : > { %2955 = vmatmul.mubr.bf16.vlgmr.msra.gmra.mrb[0].mxu0 %v4739_v18  ;;  %3256 = vmatmul.mubr.bf16.vlgmr.msra.gmra.mrb[0].mxu1 %v4739_v18  ;;  %v4843_v18 = vld [vmem:[%s5440_s15 + $0x404] ss:$16 sps:$4 sm:$0xff]  }
  0x6e   : > { %2966 = vmatpush1.bf16.msra.mxu0 %v4742_v19  ;;  %3267 = vmatpush1.bf16.msra.mxu1 %v4745_v20  ;;  %v4846_v19 = vld [vmem:[%s5440_s15 + $0x40c] ss:$16 sps:$4 sm:$0xff]  }
  0x6f   : > { %2967 = vmatprep.subr.bf16.mxu0 %v4750_v21  ;;  %3268 = vmatprep.subr.bf16.mxu1 %v4753_v22  ;;  %v4838_v20 = vld [vmem:[%s5442_s16 + $0x8] ss:$52 sps:$4 sm:$0xff]  }
  0x70   : > { %2997 = vmatprep.mubr.bf16.mxu0 %v4840_v45  ;;  %3298 = vmatprep.mubr.bf16.mxu1 %v4840_v45  ;;  %v4841_v21 = vld [vmem:[%s5440_s15 + $0x400] ss:$16 sps:$4 sm:$0xff]   ;;  %v4844_v22 = vld [vmem:[%s5440_s15 + $0x408] ss:$16 sps:$4 sm:$0xff]   ;;  %v4882_v45 = vld [vmem:[%s5440_s15 + $0x4cc] ss:$16 sps:$4 sm:$0xff]  }
  0x72   : > { %2968 = vmatpush1.bf16.msra.mxu0 %v4748_v23  ;;  %3269 = vmatpush1.bf16.msra.mxu1 %v4751_v24  ;;  %v4849_v23 = vld [vmem:[%s5440_s15 + $0x424] ss:$16 sps:$4 sm:$0xff]   ;;  %v4852_v24 = vld [vmem:[%s5440_s15 + $0x42c] ss:$16 sps:$4 sm:$0xff]  }
  0x73   : > { %2969 = vmatprep.subr.bf16.mxu0 %v4756_v25  ;;  %3270 = vmatprep.subr.bf16.mxu1 %v4759_v26  ;;  %v4847_v25 = vld [vmem:[%s5440_s15 + $0x420] ss:$16 sps:$4 sm:$0xff]   ;;  %v4850_v26 = vld [vmem:[%s5440_s15 + $0x428] ss:$16 sps:$4 sm:$0xff]  }
  0x76   : > { %2970 = vmatpush1.bf16.msra.mxu0 %v4754_v27  ;;  %3271 = vmatpush1.bf16.msra.mxu1 %v4757_v28  ;;  %v4939_v27 = vld [vmem:[%s5442_s16 + $0x14] ss:$52 sps:$4 sm:$0xff]  }
  0x77   : > { %2971 = vmatprep.subr.bf16.mxu0 %v4762_v29  ;;  %3272 = vmatprep.subr.bf16.mxu1 %v4765_v30  ;;  %v4855_v28 = vld [vmem:[%s5440_s15 + $0x444] ss:$16 sps:$4 sm:$0xff]   ;;  %v4858_v29 = vld [vmem:[%s5440_s15 + $0x44c] ss:$16 sps:$4 sm:$0xff]   ;;  %v4853_v30 = vld [vmem:[%s5440_s15 + $0x440] ss:$16 sps:$4 sm:$0xff]  }
  0x7a   : > { %2972 = vmatpush1.bf16.msra.mxu0 %v4760_v31  ;;  %3273 = vmatpush1.bf16.msra.mxu1 %v4763_v32  ;;  %v4856_v31 = vld [vmem:[%s5440_s15 + $0x448] ss:$16 sps:$4 sm:$0xff]   ;;  %v4861_v32 = vld [vmem:[%s5440_s15 + $0x464] ss:$16 sps:$4 sm:$0xff]  }
  0x7b   : > { %2973 = vmatprep.subr.bf16.mxu0 %v4768_v33  ;;  %3274 = vmatprep.subr.bf16.mxu1 %v4771_v34  ;;  %v4864_v33 = vld [vmem:[%s5440_s15 + $0x46c] ss:$16 sps:$4 sm:$0xff]   ;;  %v4859_v34 = vld [vmem:[%s5440_s15 + $0x460] ss:$16 sps:$4 sm:$0xff]  }
  0x7e   : > { %2974 = vmatpush1.bf16.msra.mxu0 %v4766_v35  ;;  %3275 = vmatpush1.bf16.msra.mxu1 %v4769_v36  ;;  %v4862_v35 = vld [vmem:[%s5440_s15 + $0x468] ss:$16 sps:$4 sm:$0xff]   ;;  %v4867_v36 = vld [vmem:[%s5440_s15 + $0x484] ss:$16 sps:$4 sm:$0xff]  }
  0x7f   : > { %2975 = vmatprep.subr.bf16.mxu0 %v4774_v37  ;;  %3276 = vmatprep.subr.bf16.mxu1 %v4777_v38  ;;  %v4870_v37 = vld [vmem:[%s5440_s15 + $0x48c] ss:$16 sps:$4 sm:$0xff]   ;;  %v4865_v38 = vld [vmem:[%s5440_s15 + $0x480] ss:$16 sps:$4 sm:$0xff]  }
  0x82   : > { %2976 = vmatpush1.bf16.msra.mxu0 %v4772_v39  ;;  %3277 = vmatpush1.bf16.msra.mxu1 %v4775_v40  ;;  %v4868_v39 = vld [vmem:[%s5440_s15 + $0x488] ss:$16 sps:$4 sm:$0xff]   ;;  %v4873_v40 = vld [vmem:[%s5440_s15 + $0x4a4] ss:$16 sps:$4 sm:$0xff]  }
  0x83   : > { %2977 = vmatprep.subr.bf16.mxu0 %v4780_v41  ;;  %3278 = vmatprep.subr.bf16.mxu1 %v4783_v42  ;;  %v4876_v41 = vld [vmem:[%s5440_s15 + $0x4ac] ss:$16 sps:$4 sm:$0xff]   ;;  %v4871_v42 = vld [vmem:[%s5440_s15 + $0x4a0] ss:$16 sps:$4 sm:$0xff]  }
  0x86   : > { %2978 = vmatpush1.bf16.msra.mxu0 %v4778_v43  ;;  %3279 = vmatpush1.bf16.msra.mxu1 %v4781_v44  ;;  %v4874_v43 = vld [vmem:[%s5440_s15 + $0x4a8] ss:$16 sps:$4 sm:$0xff]   ;;  %v4879_v44 = vld [vmem:[%s5440_s15 + $0x4c4] ss:$16 sps:$4 sm:$0xff]  }
  0x87   : > { %2979 = vmatprep.subr.bf16.mxu0 %v4786_v46  ;;  %3280 = vmatprep.subr.bf16.mxu1 %v4789_v47  ;;  %v4877_v46 = vld [vmem:[%s5440_s15 + $0x4c0] ss:$16 sps:$4 sm:$0xff]   ;;  %v4880_v47 = vld [vmem:[%s5440_s15 + $0x4c8] ss:$16 sps:$4 sm:$0xff]  }
  0x8a   : > { %2980 = vmatpush1.bf16.msra.mxu0 %v4784_v48  ;;  %3281 = vmatpush1.bf16.msra.mxu1 %v4787_v49  ;;  %v4885_v48 = vld [vmem:[%s5440_s15 + $0x4e4] ss:$16 sps:$4 sm:$0xff]   ;;  %v4888_v49 = vld [vmem:[%s5440_s15 + $0x4ec] ss:$16 sps:$4 sm:$0xff]  }
  0x8b   : > { %2981 = vmatprep.subr.bf16.mxu0 %v4792_v50  ;;  %3282 = vmatprep.subr.bf16.mxu1 %v4795_v51  ;;  %v4883_v50 = vld [vmem:[%s5440_s15 + $0x4e0] ss:$16 sps:$4 sm:$0xff]   ;;  %v4886_v51 = vld [vmem:[%s5440_s15 + $0x4e8] ss:$16 sps:$4 sm:$0xff]  }
  0x8e   : > { %2982 = vmatpush1.bf16.msra.mxu0 %v4790_v52  ;;  %3283 = vmatpush1.bf16.msra.mxu1 %v4793_v53  ;;  %v4891_v52 = vld [vmem:[%s5440_s15 + $0x504] ss:$16 sps:$4 sm:$0xff]   ;;  %v4894_v53 = vld [vmem:[%s5440_s15 + $0x50c] ss:$16 sps:$4 sm:$0xff]  }
  0x8f   : > { %2983 = vmatprep.subr.bf16.mxu0 %v4798_v54  ;;  %3284 = vmatprep.subr.bf16.mxu1 %v4801_v55  ;;  %v4889_v54 = vld [vmem:[%s5440_s15 + $0x500] ss:$16 sps:$4 sm:$0xff]   ;;  %v4892_v55 = vld [vmem:[%s5440_s15 + $0x508] ss:$16 sps:$4 sm:$0xff]  }
  0x92   : > { %2984 = vmatpush1.bf16.msra.mxu0 %v4796_v56  ;;  %3285 = vmatpush1.bf16.msra.mxu1 %v4799_v57  ;;  %v4897_v56 = vld [vmem:[%s5440_s15 + $0x524] ss:$16 sps:$4 sm:$0xff]   ;;  %v4900_v57 = vld [vmem:[%s5440_s15 + $0x52c] ss:$16 sps:$4 sm:$0xff]  }
  0x93   : > { %2985 = vmatprep.subr.bf16.mxu0 %v4804_v58  ;;  %3286 = vmatprep.subr.bf16.mxu1 %v4807_v59  ;;  %v4895_v58 = vld [vmem:[%s5440_s15 + $0x520] ss:$16 sps:$4 sm:$0xff]   ;;  %v4898_v59 = vld [vmem:[%s5440_s15 + $0x528] ss:$16 sps:$4 sm:$0xff]  }
  0x96   : > { %2986 = vmatpush1.bf16.msra.mxu0 %v4802_v60  ;;  %3287 = vmatpush1.bf16.msra.mxu1 %v4805_v61  ;;  %v4903_v60 = vld [vmem:[%s5440_s15 + $0x544] ss:$16 sps:$4 sm:$0xff]   ;;  %v4906_v61 = vld [vmem:[%s5440_s15 + $0x54c] ss:$16 sps:$4 sm:$0xff]  }
  0x97   : > { %2987 = vmatprep.subr.bf16.mxu0 %v4810_v62  ;;  %3288 = vmatprep.subr.bf16.mxu1 %v4813_v63  ;;  %v4901_v62 = vld [vmem:[%s5440_s15 + $0x540] ss:$16 sps:$4 sm:$0xff]   ;;  %v4904_v63 = vld [vmem:[%s5440_s15 + $0x548] ss:$16 sps:$4 sm:$0xff]  }
  0x9a   : > { %2988 = vmatpush1.bf16.msra.mxu0 %v4808_v0  ;;  %3289 = vmatpush1.bf16.msra.mxu1 %v4811_v1  ;;  %v4909_v0 = vld [vmem:[%s5440_s15 + $0x564] ss:$16 sps:$4 sm:$0xff]   ;;  %v4912_v1 = vld [vmem:[%s5440_s15 + $0x56c] ss:$16 sps:$4 sm:$0xff]  }
  0x9b   : > { %2989 = vmatprep.subr.bf16.mxu0 %v4816_v2  ;;  %3290 = vmatprep.subr.bf16.mxu1 %v4819_v3  ;;  %v4907_v2 = vld [vmem:[%s5440_s15 + $0x560] ss:$16 sps:$4 sm:$0xff]   ;;  %v4910_v3 = vld [vmem:[%s5440_s15 + $0x568] ss:$16 sps:$4 sm:$0xff]  }
  0x9e   : > { %2990 = vmatpush1.bf16.msra.mxu0 %v4814_v4  ;;  %3291 = vmatpush1.bf16.msra.mxu1 %v4817_v5  ;;  %v4915_v4 = vld [vmem:[%s5440_s15 + $0x584] ss:$16 sps:$4 sm:$0xff]   ;;  %v4918_v5 = vld [vmem:[%s5440_s15 + $0x58c] ss:$16 sps:$4 sm:$0xff]  }
  0x9f   : > { %2991 = vmatprep.subr.bf16.mxu0 %v4822_v6  ;;  %3292 = vmatprep.subr.bf16.mxu1 %v4825_v7  ;;  %v4913_v6 = vld [vmem:[%s5440_s15 + $0x580] ss:$16 sps:$4 sm:$0xff]   ;;  %v4916_v7 = vld [vmem:[%s5440_s15 + $0x588] ss:$16 sps:$4 sm:$0xff]  }
  0xa2   : > { %2992 = vmatpush1.bf16.msra.mxu0 %v4820_v8  ;;  %3293 = vmatpush1.bf16.msra.mxu1 %v4823_v9  ;;  %v4921_v8 = vld [vmem:[%s5440_s15 + $0x5a4] ss:$16 sps:$4 sm:$0xff]   ;;  %v4924_v9 = vld [vmem:[%s5440_s15 + $0x5ac] ss:$16 sps:$4 sm:$0xff]  }
  0xa3   : > { %2993 = vmatprep.subr.bf16.mxu0 %v4828_v10  ;;  %3294 = vmatprep.subr.bf16.mxu1 %v4831_v11  ;;  %v4919_v10 = vld [vmem:[%s5440_s15 + $0x5a0] ss:$16 sps:$4 sm:$0xff]   ;;  %v4922_v11 = vld [vmem:[%s5440_s15 + $0x5a8] ss:$16 sps:$4 sm:$0xff]  }
  0xa6   : > { %2994 = vmatpush1.bf16.msra.mxu0 %v4826_v12  ;;  %3295 = vmatpush1.bf16.msra.mxu1 %v4829_v13  ;;  %v4927_v12 = vld [vmem:[%s5440_s15 + $0x5c4] ss:$16 sps:$4 sm:$0xff]   ;;  %v4930_v13 = vld [vmem:[%s5440_s15 + $0x5cc] ss:$16 sps:$4 sm:$0xff]  }
  0xa7   : > { %2995 = vmatprep.subr.bf16.mxu0 %v4834_v14  ;;  %3296 = vmatprep.subr.bf16.mxu1 %v4837_v15  ;;  %v4925_v14 = vld [vmem:[%s5440_s15 + $0x5c0] ss:$16 sps:$4 sm:$0xff]   ;;  %v4928_v15 = vld [vmem:[%s5440_s15 + $0x5c8] ss:$16 sps:$4 sm:$0xff]  }
  0xaa   : > { %2996 = vmatpush1.bf16.msra.mxu0 %v4832_v16  ;;  %3297 = vmatpush1.bf16.msra.mxu1 %v4835_v17  ;;  %v4933_v16 = vld [vmem:[%s5440_s15 + $0x5e4] ss:$16 sps:$4 sm:$0xff]   ;;  %v4936_v17 = vld [vmem:[%s5440_s15 + $0x5ec] ss:$16 sps:$4 sm:$0xff]  }
  0xab   : > { %3008 = vmatprep.subr.bf16.mxu0 %v4843_v18  ;;  %3309 = vmatprep.subr.bf16.mxu1 %v4846_v19  ;;  %v4931_v18 = vld [vmem:[%s5440_s15 + $0x5e0] ss:$16 sps:$4 sm:$0xff]   ;;  %v4934_v19 = vld [vmem:[%s5440_s15 + $0x5e8] ss:$16 sps:$4 sm:$0xff]  }
  0xad   : > { %2998 = vmatmul.mubr.bf16.vlgmr.msra.gmra.mrb[0].mxu0 %v4838_v20  ;;  %3299 = vmatmul.mubr.bf16.vlgmr.msra.gmra.mrb[0].mxu1 %v4838_v20  ;;  %v4942_v20 = vld [vmem:[%s5440_s15 + $0x604] ss:$16 sps:$4 sm:$0xff]  }
  0xae   : > { %3009 = vmatpush1.bf16.msra.mxu0 %v4841_v21  ;;  %3310 = vmatpush1.bf16.msra.mxu1 %v4844_v22  ;;  %v4945_v21 = vld [vmem:[%s5440_s15 + $0x60c] ss:$16 sps:$4 sm:$0xff]  }
  0xaf   : > { %3010 = vmatprep.subr.bf16.mxu0 %v4849_v23  ;;  %3311 = vmatprep.subr.bf16.mxu1 %v4852_v24  ;;  %v4937_v22 = vld [vmem:[%s5442_s16 + $0x10] ss:$52 sps:$4 sm:$0xff]  }
  0xb0   : > { %3040 = vmatprep.mubr.bf16.mxu0 %v4939_v27  ;;  %3341 = vmatprep.mubr.bf16.mxu1 %v4939_v27  ;;  %v4940_v23 = vld [vmem:[%s5440_s15 + $0x600] ss:$16 sps:$4 sm:$0xff]   ;;  %v4943_v24 = vld [vmem:[%s5440_s15 + $0x608] ss:$16 sps:$4 sm:$0xff]  }
  0xb1   : > { %v5038_v27 = vld [vmem:[%s5442_s16 + $0x1c] ss:$52 sps:$4 sm:$0xff]  }
  0xb2   : > { %3011 = vmatpush1.bf16.msra.mxu0 %v4847_v25  ;;  %3312 = vmatpush1.bf16.msra.mxu1 %v4850_v26  ;;  %v4948_v25 = vld [vmem:[%s5440_s15 + $0x624] ss:$16 sps:$4 sm:$0xff]   ;;  %v4951_v26 = vld [vmem:[%s5440_s15 + $0x62c] ss:$16 sps:$4 sm:$0xff]  }
  0xb3   : > { %3012 = vmatprep.subr.bf16.mxu0 %v4855_v28  ;;  %3313 = vmatprep.subr.bf16.mxu1 %v4858_v29  ;;  %v4946_v28 = vld [vmem:[%s5440_s15 + $0x620] ss:$16 sps:$4 sm:$0xff]   ;;  %v4949_v29 = vld [vmem:[%s5440_s15 + $0x628] ss:$16 sps:$4 sm:$0xff]  }
  0xb6   : > { %3013 = vmatpush1.bf16.msra.mxu0 %v4853_v30  ;;  %3314 = vmatpush1.bf16.msra.mxu1 %v4856_v31  ;;  %v4954_v30 = vld [vmem:[%s5440_s15 + $0x644] ss:$16 sps:$4 sm:$0xff]   ;;  %v4957_v31 = vld [vmem:[%s5440_s15 + $0x64c] ss:$16 sps:$4 sm:$0xff]  }
  0xb7   : > { %3014 = vmatprep.subr.bf16.mxu0 %v4861_v32  ;;  %3315 = vmatprep.subr.bf16.mxu1 %v4864_v33  ;;  %v4952_v32 = vld [vmem:[%s5440_s15 + $0x640] ss:$16 sps:$4 sm:$0xff]   ;;  %v4955_v33 = vld [vmem:[%s5440_s15 + $0x648] ss:$16 sps:$4 sm:$0xff]  }
  0xba   : > { %3015 = vmatpush1.bf16.msra.mxu0 %v4859_v34  ;;  %3316 = vmatpush1.bf16.msra.mxu1 %v4862_v35  ;;  %v4960_v34 = vld [vmem:[%s5440_s15 + $0x664] ss:$16 sps:$4 sm:$0xff]   ;;  %v4963_v35 = vld [vmem:[%s5440_s15 + $0x66c] ss:$16 sps:$4 sm:$0xff]  }
  0xbb   : > { %3016 = vmatprep.subr.bf16.mxu0 %v4867_v36  ;;  %3317 = vmatprep.subr.bf16.mxu1 %v4870_v37  ;;  %v4958_v36 = vld [vmem:[%s5440_s15 + $0x660] ss:$16 sps:$4 sm:$0xff]   ;;  %v4961_v37 = vld [vmem:[%s5440_s15 + $0x668] ss:$16 sps:$4 sm:$0xff]  }
  0xbe   : > { %3017 = vmatpush1.bf16.msra.mxu0 %v4865_v38  ;;  %3318 = vmatpush1.bf16.msra.mxu1 %v4868_v39  ;;  %v4966_v38 = vld [vmem:[%s5440_s15 + $0x684] ss:$16 sps:$4 sm:$0xff]   ;;  %v4969_v39 = vld [vmem:[%s5440_s15 + $0x68c] ss:$16 sps:$4 sm:$0xff]  }
  0xbf   : > { %3018 = vmatprep.subr.bf16.mxu0 %v4873_v40  ;;  %3319 = vmatprep.subr.bf16.mxu1 %v4876_v41  ;;  %v4964_v40 = vld [vmem:[%s5440_s15 + $0x680] ss:$16 sps:$4 sm:$0xff]   ;;  %v4967_v41 = vld [vmem:[%s5440_s15 + $0x688] ss:$16 sps:$4 sm:$0xff]  }
  0xc2   : > { %3019 = vmatpush1.bf16.msra.mxu0 %v4871_v42  ;;  %3320 = vmatpush1.bf16.msra.mxu1 %v4874_v43  ;;  %v4972_v42 = vld [vmem:[%s5440_s15 + $0x6a4] ss:$16 sps:$4 sm:$0xff]   ;;  %v4975_v43 = vld [vmem:[%s5440_s15 + $0x6ac] ss:$16 sps:$4 sm:$0xff]  }
  0xc3   : > { %3020 = vmatprep.subr.bf16.mxu0 %v4879_v44  ;;  %3321 = vmatprep.subr.bf16.mxu1 %v4882_v45  ;;  %v4970_v44 = vld [vmem:[%s5440_s15 + $0x6a0] ss:$16 sps:$4 sm:$0xff]   ;;  %v4973_v45 = vld [vmem:[%s5440_s15 + $0x6a8] ss:$16 sps:$4 sm:$0xff]  }
  0xc6   : > { %3021 = vmatpush1.bf16.msra.mxu0 %v4877_v46  ;;  %3322 = vmatpush1.bf16.msra.mxu1 %v4880_v47  ;;  %v4978_v46 = vld [vmem:[%s5440_s15 + $0x6c4] ss:$16 sps:$4 sm:$0xff]   ;;  %v4981_v47 = vld [vmem:[%s5440_s15 + $0x6cc] ss:$16 sps:$4 sm:$0xff]  }
  0xc7   : > { %3022 = vmatprep.subr.bf16.mxu0 %v4885_v48  ;;  %3323 = vmatprep.subr.bf16.mxu1 %v4888_v49  ;;  %v4976_v48 = vld [vmem:[%s5440_s15 + $0x6c0] ss:$16 sps:$4 sm:$0xff]   ;;  %v4979_v49 = vld [vmem:[%s5440_s15 + $0x6c8] ss:$16 sps:$4 sm:$0xff]  }
  0xca   : > { %3023 = vmatpush1.bf16.msra.mxu0 %v4883_v50  ;;  %3324 = vmatpush1.bf16.msra.mxu1 %v4886_v51  ;;  %v4984_v50 = vld [vmem:[%s5440_s15 + $0x6e4] ss:$16 sps:$4 sm:$0xff]   ;;  %v4987_v51 = vld [vmem:[%s5440_s15 + $0x6ec] ss:$16 sps:$4 sm:$0xff]  }
  0xcb   : > { %3024 = vmatprep.subr.bf16.mxu0 %v4891_v52  ;;  %3325 = vmatprep.subr.bf16.mxu1 %v4894_v53  ;;  %v4982_v52 = vld [vmem:[%s5440_s15 + $0x6e0] ss:$16 sps:$4 sm:$0xff]   ;;  %v4985_v53 = vld [vmem:[%s5440_s15 + $0x6e8] ss:$16 sps:$4 sm:$0xff]  }
  0xce   : > { %3025 = vmatpush1.bf16.msra.mxu0 %v4889_v54  ;;  %3326 = vmatpush1.bf16.msra.mxu1 %v4892_v55  ;;  %v4990_v54 = vld [vmem:[%s5440_s15 + $0x704] ss:$16 sps:$4 sm:$0xff]   ;;  %v4993_v55 = vld [vmem:[%s5440_s15 + $0x70c] ss:$16 sps:$4 sm:$0xff]  }
  0xcf   : > { %3026 = vmatprep.subr.bf16.mxu0 %v4897_v56  ;;  %3327 = vmatprep.subr.bf16.mxu1 %v4900_v57  ;;  %v4988_v56 = vld [vmem:[%s5440_s15 + $0x700] ss:$16 sps:$4 sm:$0xff]   ;;  %v4991_v57 = vld [vmem:[%s5440_s15 + $0x708] ss:$16 sps:$4 sm:$0xff]  }
  0xd2   : > { %3027 = vmatpush1.bf16.msra.mxu0 %v4895_v58  ;;  %3328 = vmatpush1.bf16.msra.mxu1 %v4898_v59  ;;  %v4996_v58 = vld [vmem:[%s5440_s15 + $0x724] ss:$16 sps:$4 sm:$0xff]   ;;  %v4999_v59 = vld [vmem:[%s5440_s15 + $0x72c] ss:$16 sps:$4 sm:$0xff]  }
  0xd3   : > { %3028 = vmatprep.subr.bf16.mxu0 %v4903_v60  ;;  %3329 = vmatprep.subr.bf16.mxu1 %v4906_v61  ;;  %v4994_v60 = vld [vmem:[%s5440_s15 + $0x720] ss:$16 sps:$4 sm:$0xff]   ;;  %v4997_v61 = vld [vmem:[%s5440_s15 + $0x728] ss:$16 sps:$4 sm:$0xff]  }
  0xd6   : > { %3029 = vmatpush1.bf16.msra.mxu0 %v4901_v62  ;;  %3330 = vmatpush1.bf16.msra.mxu1 %v4904_v63  ;;  %v5002_v62 = vld [vmem:[%s5440_s15 + $0x744] ss:$16 sps:$4 sm:$0xff]   ;;  %v5005_v63 = vld [vmem:[%s5440_s15 + $0x74c] ss:$16 sps:$4 sm:$0xff]  }
  0xd7   : > { %3030 = vmatprep.subr.bf16.mxu0 %v4909_v0  ;;  %3331 = vmatprep.subr.bf16.mxu1 %v4912_v1  ;;  %v5000_v0 = vld [vmem:[%s5440_s15 + $0x740] ss:$16 sps:$4 sm:$0xff]   ;;  %v5003_v1 = vld [vmem:[%s5440_s15 + $0x748] ss:$16 sps:$4 sm:$0xff]  }
  0xda   : > { %3031 = vmatpush1.bf16.msra.mxu0 %v4907_v2  ;;  %3332 = vmatpush1.bf16.msra.mxu1 %v4910_v3  ;;  %v5008_v2 = vld [vmem:[%s5440_s15 + $0x764] ss:$16 sps:$4 sm:$0xff]   ;;  %v5011_v3 = vld [vmem:[%s5440_s15 + $0x76c] ss:$16 sps:$4 sm:$0xff]  }
  0xdb   : > { %3032 = vmatprep.subr.bf16.mxu0 %v4915_v4  ;;  %3333 = vmatprep.subr.bf16.mxu1 %v4918_v5  ;;  %v5006_v4 = vld [vmem:[%s5440_s15 + $0x760] ss:$16 sps:$4 sm:$0xff]   ;;  %v5009_v5 = vld [vmem:[%s5440_s15 + $0x768] ss:$16 sps:$4 sm:$0xff]  }
  0xde   : > { %3033 = vmatpush1.bf16.msra.mxu0 %v4913_v6  ;;  %3334 = vmatpush1.bf16.msra.mxu1 %v4916_v7  ;;  %v5014_v6 = vld [vmem:[%s5440_s15 + $0x784] ss:$16 sps:$4 sm:$0xff]   ;;  %v5017_v7 = vld [vmem:[%s5440_s15 + $0x78c] ss:$16 sps:$4 sm:$0xff]  }
  0xdf   : > { %3034 = vmatprep.subr.bf16.mxu0 %v4921_v8  ;;  %3335 = vmatprep.subr.bf16.mxu1 %v4924_v9  ;;  %v5012_v8 = vld [vmem:[%s5440_s15 + $0x780] ss:$16 sps:$4 sm:$0xff]   ;;  %v5015_v9 = vld [vmem:[%s5440_s15 + $0x788] ss:$16 sps:$4 sm:$0xff]  }
  0xe2   : > { %3035 = vmatpush1.bf16.msra.mxu0 %v4919_v10  ;;  %3336 = vmatpush1.bf16.msra.mxu1 %v4922_v11  ;;  %v5020_v10 = vld [vmem:[%s5440_s15 + $0x7a4] ss:$16 sps:$4 sm:$0xff]   ;;  %v5023_v11 = vld [vmem:[%s5440_s15 + $0x7ac] ss:$16 sps:$4 sm:$0xff]  }
  0xe3   : > { %3036 = vmatprep.subr.bf16.mxu0 %v4927_v12  ;;  %3337 = vmatprep.subr.bf16.mxu1 %v4930_v13  ;;  %v5018_v12 = vld [vmem:[%s5440_s15 + $0x7a0] ss:$16 sps:$4 sm:$0xff]   ;;  %v5021_v13 = vld [vmem:[%s5440_s15 + $0x7a8] ss:$16 sps:$4 sm:$0xff]  }
  0xe6   : > { %3037 = vmatpush1.bf16.msra.mxu0 %v4925_v14  ;;  %3338 = vmatpush1.bf16.msra.mxu1 %v4928_v15  ;;  %v5026_v14 = vld [vmem:[%s5440_s15 + $0x7c4] ss:$16 sps:$4 sm:$0xff]   ;;  %v5029_v15 = vld [vmem:[%s5440_s15 + $0x7cc] ss:$16 sps:$4 sm:$0xff]  }
  0xe7   : > { %3038 = vmatprep.subr.bf16.mxu0 %v4933_v16  ;;  %3339 = vmatprep.subr.bf16.mxu1 %v4936_v17  ;;  %v5024_v16 = vld [vmem:[%s5440_s15 + $0x7c0] ss:$16 sps:$4 sm:$0xff]   ;;  %v5027_v17 = vld [vmem:[%s5440_s15 + $0x7c8] ss:$16 sps:$4 sm:$0xff]  }
  0xea   : > { %3039 = vmatpush1.bf16.msra.mxu0 %v4931_v18  ;;  %3340 = vmatpush1.bf16.msra.mxu1 %v4934_v19  ;;  %v5032_v18 = vld [vmem:[%s5440_s15 + $0x7e4] ss:$16 sps:$4 sm:$0xff]   ;;  %v5035_v19 = vld [vmem:[%s5440_s15 + $0x7ec] ss:$16 sps:$4 sm:$0xff]  }
  0xeb   : > { %3051 = vmatprep.subr.bf16.mxu0 %v4942_v20  ;;  %3352 = vmatprep.subr.bf16.mxu1 %v4945_v21  ;;  %v5030_v20 = vld [vmem:[%s5440_s15 + $0x7e0] ss:$16 sps:$4 sm:$0xff]   ;;  %v5033_v21 = vld [vmem:[%s5440_s15 + $0x7e8] ss:$16 sps:$4 sm:$0xff]  }
  0xed   : > { %3041 = vmatmul.mubr.bf16.vlgmr.msra.gmra.mrb[0].mxu0 %v4937_v22  ;;  %3342 = vmatmul.mubr.bf16.vlgmr.msra.gmra.mrb[0].mxu1 %v4937_v22  ;;  %v5041_v22 = vld [vmem:[%s5440_s15 + $0x804] ss:$16 sps:$4 sm:$0xff]  }
  0xee   : > { %3052 = vmatpush1.bf16.msra.mxu0 %v4940_v23  ;;  %3353 = vmatpush1.bf16.msra.mxu1 %v4943_v24  ;;  %v5044_v23 = vld [vmem:[%s5440_s15 + $0x80c] ss:$16 sps:$4 sm:$0xff]  }
  0xef   : > { %3053 = vmatprep.subr.bf16.mxu0 %v4948_v25  ;;  %3354 = vmatprep.subr.bf16.mxu1 %v4951_v26  ;;  %v5036_v24 = vld [vmem:[%s5442_s16 + $0x18] ss:$52 sps:$4 sm:$0xff]  }
  0xf0   : > { %3083 = vmatprep.mubr.bf16.mxu0 %v5038_v27  ;;  %3384 = vmatprep.mubr.bf16.mxu1 %v5038_v27  ;;  %v5039_v25 = vld [vmem:[%s5440_s15 + $0x800] ss:$16 sps:$4 sm:$0xff]   ;;  %v5042_v26 = vld [vmem:[%s5440_s15 + $0x808] ss:$16 sps:$4 sm:$0xff]   ;;  %v5047_v27 = vld [vmem:[%s5440_s15 + $0x824] ss:$16 sps:$4 sm:$0xff]  }
  0xf2   : > { %3054 = vmatpush1.bf16.msra.mxu0 %v4946_v28  ;;  %3355 = vmatpush1.bf16.msra.mxu1 %v4949_v29  ;;  %v5050_v28 = vld [vmem:[%s5440_s15 + $0x82c] ss:$16 sps:$4 sm:$0xff]  }
  0xf3   : > { %3055 = vmatprep.subr.bf16.mxu0 %v4954_v30  ;;  %3356 = vmatprep.subr.bf16.mxu1 %v4957_v31  ;;  %v5137_v29 = vld [vmem:[%s5442_s16 + $0x24] ss:$52 sps:$4 sm:$0xff]  }
  0xf4   : > { %v5045_v30 = vld [vmem:[%s5440_s15 + $0x820] ss:$16 sps:$4 sm:$0xff]   ;;  %v5048_v31 = vld [vmem:[%s5440_s15 + $0x828] ss:$16 sps:$4 sm:$0xff]  }
  0xf6   : > { %3056 = vmatpush1.bf16.msra.mxu0 %v4952_v32  ;;  %3357 = vmatpush1.bf16.msra.mxu1 %v4955_v33  ;;  %v5053_v32 = vld [vmem:[%s5440_s15 + $0x844] ss:$16 sps:$4 sm:$0xff]   ;;  %v5056_v33 = vld [vmem:[%s5440_s15 + $0x84c] ss:$16 sps:$4 sm:$0xff]  }
  0xf7   : > { %3057 = vmatprep.subr.bf16.mxu0 %v4960_v34  ;;  %3358 = vmatprep.subr.bf16.mxu1 %v4963_v35  ;;  %v5051_v34 = vld [vmem:[%s5440_s15 + $0x840] ss:$16 sps:$4 sm:$0xff]   ;;  %v5054_v35 = vld [vmem:[%s5440_s15 + $0x848] ss:$16 sps:$4 sm:$0xff]  }
  0xfa   : > { %3058 = vmatpush1.bf16.msra.mxu0 %v4958_v36  ;;  %3359 = vmatpush1.bf16.msra.mxu1 %v4961_v37  ;;  %v5059_v36 = vld [vmem:[%s5440_s15 + $0x864] ss:$16 sps:$4 sm:$0xff]   ;;  %v5062_v37 = vld [vmem:[%s5440_s15 + $0x86c] ss:$16 sps:$4 sm:$0xff]  }
  0xfb   : > { %3059 = vmatprep.subr.bf16.mxu0 %v4966_v38  ;;  %3360 = vmatprep.subr.bf16.mxu1 %v4969_v39  ;;  %v5057_v38 = vld [vmem:[%s5440_s15 + $0x860] ss:$16 sps:$4 sm:$0xff]   ;;  %v5060_v39 = vld [vmem:[%s5440_s15 + $0x868] ss:$16 sps:$4 sm:$0xff]  }
  0xfe   : > { %3060 = vmatpush1.bf16.msra.mxu0 %v4964_v40  ;;  %3361 = vmatpush1.bf16.msra.mxu1 %v4967_v41  ;;  %v5065_v40 = vld [vmem:[%s5440_s15 + $0x884] ss:$16 sps:$4 sm:$0xff]   ;;  %v5068_v41 = vld [vmem:[%s5440_s15 + $0x88c] ss:$16 sps:$4 sm:$0xff]  }
  0xff   : > { %3061 = vmatprep.subr.bf16.mxu0 %v4972_v42  ;;  %3362 = vmatprep.subr.bf16.mxu1 %v4975_v43  ;;  %v5063_v42 = vld [vmem:[%s5440_s15 + $0x880] ss:$16 sps:$4 sm:$0xff]   ;;  %v5066_v43 = vld [vmem:[%s5440_s15 + $0x888] ss:$16 sps:$4 sm:$0xff]  }
 0x102   : > { %3062 = vmatpush1.bf16.msra.mxu0 %v4970_v44  ;;  %3363 = vmatpush1.bf16.msra.mxu1 %v4973_v45  ;;  %v5071_v44 = vld [vmem:[%s5440_s15 + $0x8a4] ss:$16 sps:$4 sm:$0xff]   ;;  %v5074_v45 = vld [vmem:[%s5440_s15 + $0x8ac] ss:$16 sps:$4 sm:$0xff]  }
 0x103   : > { %3063 = vmatprep.subr.bf16.mxu0 %v4978_v46  ;;  %3364 = vmatprep.subr.bf16.mxu1 %v4981_v47  ;;  %v5069_v46 = vld [vmem:[%s5440_s15 + $0x8a0] ss:$16 sps:$4 sm:$0xff]   ;;  %v5072_v47 = vld [vmem:[%s5440_s15 + $0x8a8] ss:$16 sps:$4 sm:$0xff]  }
 0x106   : > { %3064 = vmatpush1.bf16.msra.mxu0 %v4976_v48  ;;  %3365 = vmatpush1.bf16.msra.mxu1 %v4979_v49  ;;  %v5077_v48 = vld [vmem:[%s5440_s15 + $0x8c4] ss:$16 sps:$4 sm:$0xff]   ;;  %v5080_v49 = vld [vmem:[%s5440_s15 + $0x8cc] ss:$16 sps:$4 sm:$0xff]  }
 0x107   : > { %3065 = vmatprep.subr.bf16.mxu0 %v4984_v50  ;;  %3366 = vmatprep.subr.bf16.mxu1 %v4987_v51  ;;  %v5075_v50 = vld [vmem:[%s5440_s15 + $0x8c0] ss:$16 sps:$4 sm:$0xff]   ;;  %v5078_v51 = vld [vmem:[%s5440_s15 + $0x8c8] ss:$16 sps:$4 sm:$0xff]  }
 0x10a   : > { %3066 = vmatpush1.bf16.msra.mxu0 %v4982_v52  ;;  %3367 = vmatpush1.bf16.msra.mxu1 %v4985_v53  ;;  %v5083_v52 = vld [vmem:[%s5440_s15 + $0x8e4] ss:$16 sps:$4 sm:$0xff]   ;;  %v5086_v53 = vld [vmem:[%s5440_s15 + $0x8ec] ss:$16 sps:$4 sm:$0xff]  }
 0x10b   : > { %3067 = vmatprep.subr.bf16.mxu0 %v4990_v54  ;;  %3368 = vmatprep.subr.bf16.mxu1 %v4993_v55  ;;  %v5081_v54 = vld [vmem:[%s5440_s15 + $0x8e0] ss:$16 sps:$4 sm:$0xff]   ;;  %v5084_v55 = vld [vmem:[%s5440_s15 + $0x8e8] ss:$16 sps:$4 sm:$0xff]  }
 0x10e   : > { %3068 = vmatpush1.bf16.msra.mxu0 %v4988_v56  ;;  %3369 = vmatpush1.bf16.msra.mxu1 %v4991_v57  ;;  %v5089_v56 = vld [vmem:[%s5440_s15 + $0x904] ss:$16 sps:$4 sm:$0xff]   ;;  %v5092_v57 = vld [vmem:[%s5440_s15 + $0x90c] ss:$16 sps:$4 sm:$0xff]  }
 0x10f   : > { %3069 = vmatprep.subr.bf16.mxu0 %v4996_v58  ;;  %3370 = vmatprep.subr.bf16.mxu1 %v4999_v59  ;;  %v5087_v58 = vld [vmem:[%s5440_s15 + $0x900] ss:$16 sps:$4 sm:$0xff]   ;;  %v5090_v59 = vld [vmem:[%s5440_s15 + $0x908] ss:$16 sps:$4 sm:$0xff]  }
 0x112   : > { %3070 = vmatpush1.bf16.msra.mxu0 %v4994_v60  ;;  %3371 = vmatpush1.bf16.msra.mxu1 %v4997_v61  ;;  %v5095_v60 = vld [vmem:[%s5440_s15 + $0x924] ss:$16 sps:$4 sm:$0xff]   ;;  %v5098_v61 = vld [vmem:[%s5440_s15 + $0x92c] ss:$16 sps:$4 sm:$0xff]  }
 0x113   : > { %3071 = vmatprep.subr.bf16.mxu0 %v5002_v62  ;;  %3372 = vmatprep.subr.bf16.mxu1 %v5005_v63  ;;  %v5093_v62 = vld [vmem:[%s5440_s15 + $0x920] ss:$16 sps:$4 sm:$0xff]   ;;  %v5096_v63 = vld [vmem:[%s5440_s15 + $0x928] ss:$16 sps:$4 sm:$0xff]  }
 0x116   : > { %3072 = vmatpush1.bf16.msra.mxu0 %v5000_v0  ;;  %3373 = vmatpush1.bf16.msra.mxu1 %v5003_v1  ;;  %v5101_v0 = vld [vmem:[%s5440_s15 + $0x944] ss:$16 sps:$4 sm:$0xff]   ;;  %v5104_v1 = vld [vmem:[%s5440_s15 + $0x94c] ss:$16 sps:$4 sm:$0xff]  }
 0x117   : > { %3073 = vmatprep.subr.bf16.mxu0 %v5008_v2  ;;  %3374 = vmatprep.subr.bf16.mxu1 %v5011_v3  ;;  %v5099_v2 = vld [vmem:[%s5440_s15 + $0x940] ss:$16 sps:$4 sm:$0xff]   ;;  %v5102_v3 = vld [vmem:[%s5440_s15 + $0x948] ss:$16 sps:$4 sm:$0xff]  }
 0x11a   : > { %3074 = vmatpush1.bf16.msra.mxu0 %v5006_v4  ;;  %3375 = vmatpush1.bf16.msra.mxu1 %v5009_v5  ;;  %v5107_v4 = vld [vmem:[%s5440_s15 + $0x964] ss:$16 sps:$4 sm:$0xff]   ;;  %v5110_v5 = vld [vmem:[%s5440_s15 + $0x96c] ss:$16 sps:$4 sm:$0xff]  }
 0x11b   : > { %3075 = vmatprep.subr.bf16.mxu0 %v5014_v6  ;;  %3376 = vmatprep.subr.bf16.mxu1 %v5017_v7  ;;  %v5105_v6 = vld [vmem:[%s5440_s15 + $0x960] ss:$16 sps:$4 sm:$0xff]   ;;  %v5108_v7 = vld [vmem:[%s5440_s15 + $0x968] ss:$16 sps:$4 sm:$0xff]  }
 0x11e   : > { %3076 = vmatpush1.bf16.msra.mxu0 %v5012_v8  ;;  %3377 = vmatpush1.bf16.msra.mxu1 %v5015_v9  ;;  %v5113_v8 = vld [vmem:[%s5440_s15 + $0x984] ss:$16 sps:$4 sm:$0xff]   ;;  %v5116_v9 = vld [vmem:[%s5440_s15 + $0x98c] ss:$16 sps:$4 sm:$0xff]  }
 0x11f   : > { %3077 = vmatprep.subr.bf16.mxu0 %v5020_v10  ;;  %3378 = vmatprep.subr.bf16.mxu1 %v5023_v11  ;;  %v5111_v10 = vld [vmem:[%s5440_s15 + $0x980] ss:$16 sps:$4 sm:$0xff]   ;;  %v5114_v11 = vld [vmem:[%s5440_s15 + $0x988] ss:$16 sps:$4 sm:$0xff]  }
 0x122   : > { %3078 = vmatpush1.bf16.msra.mxu0 %v5018_v12  ;;  %3379 = vmatpush1.bf16.msra.mxu1 %v5021_v13  ;;  %v5119_v12 = vld [vmem:[%s5440_s15 + $0x9a4] ss:$16 sps:$4 sm:$0xff]   ;;  %v5122_v13 = vld [vmem:[%s5440_s15 + $0x9ac] ss:$16 sps:$4 sm:$0xff]  }
 0x123   : > { %3079 = vmatprep.subr.bf16.mxu0 %v5026_v14  ;;  %3380 = vmatprep.subr.bf16.mxu1 %v5029_v15  ;;  %v5117_v14 = vld [vmem:[%s5440_s15 + $0x9a0] ss:$16 sps:$4 sm:$0xff]   ;;  %v5120_v15 = vld [vmem:[%s5440_s15 + $0x9a8] ss:$16 sps:$4 sm:$0xff]  }
 0x126   : > { %3080 = vmatpush1.bf16.msra.mxu0 %v5024_v16  ;;  %3381 = vmatpush1.bf16.msra.mxu1 %v5027_v17  ;;  %v5125_v16 = vld [vmem:[%s5440_s15 + $0x9c4] ss:$16 sps:$4 sm:$0xff]   ;;  %v5128_v17 = vld [vmem:[%s5440_s15 + $0x9cc] ss:$16 sps:$4 sm:$0xff]  }
 0x127   : > { %3081 = vmatprep.subr.bf16.mxu0 %v5032_v18  ;;  %3382 = vmatprep.subr.bf16.mxu1 %v5035_v19  ;;  %v5123_v18 = vld [vmem:[%s5440_s15 + $0x9c0] ss:$16 sps:$4 sm:$0xff]   ;;  %v5126_v19 = vld [vmem:[%s5440_s15 + $0x9c8] ss:$16 sps:$4 sm:$0xff]  }
 0x12a   : > { %3082 = vmatpush1.bf16.msra.mxu0 %v5030_v20  ;;  %3383 = vmatpush1.bf16.msra.mxu1 %v5033_v21  ;;  %v5131_v20 = vld [vmem:[%s5440_s15 + $0x9e4] ss:$16 sps:$4 sm:$0xff]   ;;  %v5134_v21 = vld [vmem:[%s5440_s15 + $0x9ec] ss:$16 sps:$4 sm:$0xff]  }
 0x12b   : > { %3094 = vmatprep.subr.bf16.mxu0 %v5041_v22  ;;  %3395 = vmatprep.subr.bf16.mxu1 %v5044_v23  ;;  %v5129_v22 = vld [vmem:[%s5440_s15 + $0x9e0] ss:$16 sps:$4 sm:$0xff]   ;;  %v5132_v23 = vld [vmem:[%s5440_s15 + $0x9e8] ss:$16 sps:$4 sm:$0xff]  }
 0x12d   : > { %3084 = vmatmul.mubr.bf16.vlgmr.msra.gmra.mrb[0].mxu0 %v5036_v24  ;;  %3385 = vmatmul.mubr.bf16.vlgmr.msra.gmra.mrb[0].mxu1 %v5036_v24  ;;  %v5140_v24 = vld [vmem:[%s5440_s15 + $0xa04] ss:$16 sps:$4 sm:$0xff]  }
 0x12e   : > { %3095 = vmatpush1.bf16.msra.mxu0 %v5039_v25  ;;  %3396 = vmatpush1.bf16.msra.mxu1 %v5042_v26  ;;  %v5143_v25 = vld [vmem:[%s5440_s15 + $0xa0c] ss:$16 sps:$4 sm:$0xff]  }
 0x12f   : > { %3096 = vmatprep.subr.bf16.mxu0 %v5047_v27  ;;  %3397 = vmatprep.subr.bf16.mxu1 %v5050_v28  ;;  %v5135_v26 = vld [vmem:[%s5442_s16 + $0x20] ss:$52 sps:$4 sm:$0xff]  }
 0x130   : > { %3126 = vmatprep.mubr.bf16.mxu0 %v5137_v29  ;;  %3427 = vmatprep.mubr.bf16.mxu1 %v5137_v29  ;;  %v5138_v27 = vld [vmem:[%s5440_s15 + $0xa00] ss:$16 sps:$4 sm:$0xff]   ;;  %v5141_v28 = vld [vmem:[%s5440_s15 + $0xa08] ss:$16 sps:$4 sm:$0xff]   ;;  %v5146_v29 = vld [vmem:[%s5440_s15 + $0xa24] ss:$16 sps:$4 sm:$0xff]  }
 0x132   : > { %3097 = vmatpush1.bf16.msra.mxu0 %v5045_v30  ;;  %3398 = vmatpush1.bf16.msra.mxu1 %v5048_v31  ;;  %v5149_v30 = vld [vmem:[%s5440_s15 + $0xa2c] ss:$16 sps:$4 sm:$0xff]  }
 0x133   : > { %3098 = vmatprep.subr.bf16.mxu0 %v5053_v32  ;;  %3399 = vmatprep.subr.bf16.mxu1 %v5056_v33  ;;  %v5236_v31 = vld [vmem:[%s5442_s16 + $0x2c] ss:$52 sps:$4 sm:$0xff]  }
 0x134   : > { %v5144_v32 = vld [vmem:[%s5440_s15 + $0xa20] ss:$16 sps:$4 sm:$0xff]   ;;  %v5147_v33 = vld [vmem:[%s5440_s15 + $0xa28] ss:$16 sps:$4 sm:$0xff]  }
 0x136   : > { %3099 = vmatpush1.bf16.msra.mxu0 %v5051_v34  ;;  %3400 = vmatpush1.bf16.msra.mxu1 %v5054_v35  ;;  %v5152_v34 = vld [vmem:[%s5440_s15 + $0xa44] ss:$16 sps:$4 sm:$0xff]   ;;  %v5155_v35 = vld [vmem:[%s5440_s15 + $0xa4c] ss:$16 sps:$4 sm:$0xff]  }
 0x137   : > { %3100 = vmatprep.subr.bf16.mxu0 %v5059_v36  ;;  %3401 = vmatprep.subr.bf16.mxu1 %v5062_v37  ;;  %v5150_v36 = vld [vmem:[%s5440_s15 + $0xa40] ss:$16 sps:$4 sm:$0xff]   ;;  %v5153_v37 = vld [vmem:[%s5440_s15 + $0xa48] ss:$16 sps:$4 sm:$0xff]  }
 0x13a   : > { %3101 = vmatpush1.bf16.msra.mxu0 %v5057_v38  ;;  %3402 = vmatpush1.bf16.msra.mxu1 %v5060_v39  ;;  %v5158_v38 = vld [vmem:[%s5440_s15 + $0xa64] ss:$16 sps:$4 sm:$0xff]   ;;  %v5161_v39 = vld [vmem:[%s5440_s15 + $0xa6c] ss:$16 sps:$4 sm:$0xff]  }
 0x13b   : > { %3102 = vmatprep.subr.bf16.mxu0 %v5065_v40  ;;  %3403 = vmatprep.subr.bf16.mxu1 %v5068_v41  ;;  %v5156_v40 = vld [vmem:[%s5440_s15 + $0xa60] ss:$16 sps:$4 sm:$0xff]   ;;  %v5159_v41 = vld [vmem:[%s5440_s15 + $0xa68] ss:$16 sps:$4 sm:$0xff]  }
 0x13e   : > { %3103 = vmatpush1.bf16.msra.mxu0 %v5063_v42  ;;  %3404 = vmatpush1.bf16.msra.mxu1 %v5066_v43  ;;  %v5164_v42 = vld [vmem:[%s5440_s15 + $0xa84] ss:$16 sps:$4 sm:$0xff]   ;;  %v5167_v43 = vld [vmem:[%s5440_s15 + $0xa8c] ss:$16 sps:$4 sm:$0xff]  }
 0x13f   : > { %3104 = vmatprep.subr.bf16.mxu0 %v5071_v44  ;;  %3405 = vmatprep.subr.bf16.mxu1 %v5074_v45  ;;  %v5162_v44 = vld [vmem:[%s5440_s15 + $0xa80] ss:$16 sps:$4 sm:$0xff]   ;;  %v5165_v45 = vld [vmem:[%s5440_s15 + $0xa88] ss:$16 sps:$4 sm:$0xff]  }
 0x142   : > { %3105 = vmatpush1.bf16.msra.mxu0 %v5069_v46  ;;  %3406 = vmatpush1.bf16.msra.mxu1 %v5072_v47  ;;  %v5170_v46 = vld [vmem:[%s5440_s15 + $0xaa4] ss:$16 sps:$4 sm:$0xff]   ;;  %v5173_v47 = vld [vmem:[%s5440_s15 + $0xaac] ss:$16 sps:$4 sm:$0xff]  }
 0x143   : > { %3106 = vmatprep.subr.bf16.mxu0 %v5077_v48  ;;  %3407 = vmatprep.subr.bf16.mxu1 %v5080_v49  ;;  %v5168_v48 = vld [vmem:[%s5440_s15 + $0xaa0] ss:$16 sps:$4 sm:$0xff]   ;;  %v5171_v49 = vld [vmem:[%s5440_s15 + $0xaa8] ss:$16 sps:$4 sm:$0xff]  }
 0x146   : > { %3107 = vmatpush1.bf16.msra.mxu0 %v5075_v50  ;;  %3408 = vmatpush1.bf16.msra.mxu1 %v5078_v51  ;;  %v5176_v50 = vld [vmem:[%s5440_s15 + $0xac4] ss:$16 sps:$4 sm:$0xff]   ;;  %v5179_v51 = vld [vmem:[%s5440_s15 + $0xacc] ss:$16 sps:$4 sm:$0xff]  }
 0x147   : > { %3108 = vmatprep.subr.bf16.mxu0 %v5083_v52  ;;  %3409 = vmatprep.subr.bf16.mxu1 %v5086_v53  ;;  %v5174_v52 = vld [vmem:[%s5440_s15 + $0xac0] ss:$16 sps:$4 sm:$0xff]   ;;  %v5177_v53 = vld [vmem:[%s5440_s15 + $0xac8] ss:$16 sps:$4 sm:$0xff]  }
 0x14a   : > { %3109 = vmatpush1.bf16.msra.mxu0 %v5081_v54  ;;  %3410 = vmatpush1.bf16.msra.mxu1 %v5084_v55  ;;  %v5182_v54 = vld [vmem:[%s5440_s15 + $0xae4] ss:$16 sps:$4 sm:$0xff]   ;;  %v5185_v55 = vld [vmem:[%s5440_s15 + $0xaec] ss:$16 sps:$4 sm:$0xff]  }
 0x14b   : > { %3110 = vmatprep.subr.bf16.mxu0 %v5089_v56  ;;  %3411 = vmatprep.subr.bf16.mxu1 %v5092_v57  ;;  %v5180_v56 = vld [vmem:[%s5440_s15 + $0xae0] ss:$16 sps:$4 sm:$0xff]   ;;  %v5183_v57 = vld [vmem:[%s5440_s15 + $0xae8] ss:$16 sps:$4 sm:$0xff]  }
 0x14e   : > { %3111 = vmatpush1.bf16.msra.mxu0 %v5087_v58  ;;  %3412 = vmatpush1.bf16.msra.mxu1 %v5090_v59  ;;  %v5188_v58 = vld [vmem:[%s5440_s15 + $0xb04] ss:$16 sps:$4 sm:$0xff]   ;;  %v5191_v59 = vld [vmem:[%s5440_s15 + $0xb0c] ss:$16 sps:$4 sm:$0xff]  }
 0x14f   : > { %3112 = vmatprep.subr.bf16.mxu0 %v5095_v60  ;;  %3413 = vmatprep.subr.bf16.mxu1 %v5098_v61  ;;  %v5186_v60 = vld [vmem:[%s5440_s15 + $0xb00] ss:$16 sps:$4 sm:$0xff]   ;;  %v5189_v61 = vld [vmem:[%s5440_s15 + $0xb08] ss:$16 sps:$4 sm:$0xff]  }
 0x152   : > { %3113 = vmatpush1.bf16.msra.mxu0 %v5093_v62  ;;  %3414 = vmatpush1.bf16.msra.mxu1 %v5096_v63  ;;  %v5194_v62 = vld [vmem:[%s5440_s15 + $0xb24] ss:$16 sps:$4 sm:$0xff]   ;;  %v5197_v63 = vld [vmem:[%s5440_s15 + $0xb2c] ss:$16 sps:$4 sm:$0xff]  }
 0x153   : > { %3114 = vmatprep.subr.bf16.mxu0 %v5101_v0  ;;  %3415 = vmatprep.subr.bf16.mxu1 %v5104_v1  ;;  %v5192_v0 = vld [vmem:[%s5440_s15 + $0xb20] ss:$16 sps:$4 sm:$0xff]   ;;  %v5195_v1 = vld [vmem:[%s5440_s15 + $0xb28] ss:$16 sps:$4 sm:$0xff]  }
 0x156   : > { %3115 = vmatpush1.bf16.msra.mxu0 %v5099_v2  ;;  %3416 = vmatpush1.bf16.msra.mxu1 %v5102_v3  ;;  %v5200_v2 = vld [vmem:[%s5440_s15 + $0xb44] ss:$16 sps:$4 sm:$0xff]   ;;  %v5203_v3 = vld [vmem:[%s5440_s15 + $0xb4c] ss:$16 sps:$4 sm:$0xff]  }
 0x157   : > { %3116 = vmatprep.subr.bf16.mxu0 %v5107_v4  ;;  %3417 = vmatprep.subr.bf16.mxu1 %v5110_v5  ;;  %v5198_v4 = vld [vmem:[%s5440_s15 + $0xb40] ss:$16 sps:$4 sm:$0xff]   ;;  %v5201_v5 = vld [vmem:[%s5440_s15 + $0xb48] ss:$16 sps:$4 sm:$0xff]  }
 0x15a   : > { %3117 = vmatpush1.bf16.msra.mxu0 %v5105_v6  ;;  %3418 = vmatpush1.bf16.msra.mxu1 %v5108_v7  ;;  %v5206_v6 = vld [vmem:[%s5440_s15 + $0xb64] ss:$16 sps:$4 sm:$0xff]   ;;  %v5209_v7 = vld [vmem:[%s5440_s15 + $0xb6c] ss:$16 sps:$4 sm:$0xff]  }
 0x15b   : > { %3118 = vmatprep.subr.bf16.mxu0 %v5113_v8  ;;  %3419 = vmatprep.subr.bf16.mxu1 %v5116_v9  ;;  %v5204_v8 = vld [vmem:[%s5440_s15 + $0xb60] ss:$16 sps:$4 sm:$0xff]   ;;  %v5207_v9 = vld [vmem:[%s5440_s15 + $0xb68] ss:$16 sps:$4 sm:$0xff]  }
 0x15e   : > { %3119 = vmatpush1.bf16.msra.mxu0 %v5111_v10  ;;  %3420 = vmatpush1.bf16.msra.mxu1 %v5114_v11  ;;  %v5212_v10 = vld [vmem:[%s5440_s15 + $0xb84] ss:$16 sps:$4 sm:$0xff]   ;;  %v5215_v11 = vld [vmem:[%s5440_s15 + $0xb8c] ss:$16 sps:$4 sm:$0xff]  }
 0x15f   : > { %3120 = vmatprep.subr.bf16.mxu0 %v5119_v12  ;;  %3421 = vmatprep.subr.bf16.mxu1 %v5122_v13  ;;  %v5210_v12 = vld [vmem:[%s5440_s15 + $0xb80] ss:$16 sps:$4 sm:$0xff]   ;;  %v5213_v13 = vld [vmem:[%s5440_s15 + $0xb88] ss:$16 sps:$4 sm:$0xff]  }
 0x162   : > { %3121 = vmatpush1.bf16.msra.mxu0 %v5117_v14  ;;  %3422 = vmatpush1.bf16.msra.mxu1 %v5120_v15  ;;  %v5218_v14 = vld [vmem:[%s5440_s15 + $0xba4] ss:$16 sps:$4 sm:$0xff]   ;;  %v5221_v15 = vld [vmem:[%s5440_s15 + $0xbac] ss:$16 sps:$4 sm:$0xff]  }
 0x163   : > { %3122 = vmatprep.subr.bf16.mxu0 %v5125_v16  ;;  %3423 = vmatprep.subr.bf16.mxu1 %v5128_v17  ;;  %v5216_v16 = vld [vmem:[%s5440_s15 + $0xba0] ss:$16 sps:$4 sm:$0xff]   ;;  %v5219_v17 = vld [vmem:[%s5440_s15 + $0xba8] ss:$16 sps:$4 sm:$0xff]  }
 0x166   : > { %3123 = vmatpush1.bf16.msra.mxu0 %v5123_v18  ;;  %3424 = vmatpush1.bf16.msra.mxu1 %v5126_v19  ;;  %v5224_v18 = vld [vmem:[%s5440_s15 + $0xbc4] ss:$16 sps:$4 sm:$0xff]   ;;  %v5227_v19 = vld [vmem:[%s5440_s15 + $0xbcc] ss:$16 sps:$4 sm:$0xff]  }
 0x167   : > { %3124 = vmatprep.subr.bf16.mxu0 %v5131_v20  ;;  %3425 = vmatprep.subr.bf16.mxu1 %v5134_v21  ;;  %v5222_v20 = vld [vmem:[%s5440_s15 + $0xbc0] ss:$16 sps:$4 sm:$0xff]   ;;  %v5225_v21 = vld [vmem:[%s5440_s15 + $0xbc8] ss:$16 sps:$4 sm:$0xff]  }
 0x16a   : > { %3125 = vmatpush1.bf16.msra.mxu0 %v5129_v22  ;;  %3426 = vmatpush1.bf16.msra.mxu1 %v5132_v23  ;;  %v5230_v22 = vld [vmem:[%s5440_s15 + $0xbe4] ss:$16 sps:$4 sm:$0xff]   ;;  %v5233_v23 = vld [vmem:[%s5440_s15 + $0xbec] ss:$16 sps:$4 sm:$0xff]  }
 0x16b   : > { %3137 = vmatprep.subr.bf16.mxu0 %v5140_v24  ;;  %3438 = vmatprep.subr.bf16.mxu1 %v5143_v25  ;;  %v5228_v24 = vld [vmem:[%s5440_s15 + $0xbe0] ss:$16 sps:$4 sm:$0xff]   ;;  %v5231_v25 = vld [vmem:[%s5440_s15 + $0xbe8] ss:$16 sps:$4 sm:$0xff]  }
 0x16d   : > { %3127 = vmatmul.mubr.bf16.vlgmr.msra.gmra.mrb[0].mxu0 %v5135_v26  ;;  %3428 = vmatmul.mubr.bf16.vlgmr.msra.gmra.mrb[0].mxu1 %v5135_v26  ;;  %v5239_v26 = vld [vmem:[%s5440_s15 + $0xc04] ss:$16 sps:$4 sm:$0xff]  }
 0x16e   : > { %3138 = vmatpush1.bf16.msra.mxu0 %v5138_v27  ;;  %3439 = vmatpush1.bf16.msra.mxu1 %v5141_v28  ;;  %v5242_v27 = vld [vmem:[%s5440_s15 + $0xc0c] ss:$16 sps:$4 sm:$0xff]  }
 0x16f   : > { %3139 = vmatprep.subr.bf16.mxu0 %v5146_v29  ;;  %3440 = vmatprep.subr.bf16.mxu1 %v5149_v30  ;;  %v5234_v28 = vld [vmem:[%s5442_s16 + $0x28] ss:$52 sps:$4 sm:$0xff]  }
 0x170   : > { %3169 = vmatprep.mubr.bf16.mxu0 %v5236_v31  ;;  %3470 = vmatprep.mubr.bf16.mxu1 %v5236_v31  ;;  %v5237_v29 = vld [vmem:[%s5440_s15 + $0xc00] ss:$16 sps:$4 sm:$0xff]   ;;  %v5240_v30 = vld [vmem:[%s5440_s15 + $0xc08] ss:$16 sps:$4 sm:$0xff]   ;;  %v5245_v31 = vld [vmem:[%s5440_s15 + $0xc24] ss:$16 sps:$4 sm:$0xff]  }
 0x172   : > { %3140 = vmatpush1.bf16.msra.mxu0 %v5144_v32  ;;  %3441 = vmatpush1.bf16.msra.mxu1 %v5147_v33  ;;  %v5248_v32 = vld [vmem:[%s5440_s15 + $0xc2c] ss:$16 sps:$4 sm:$0xff]   ;;  %v5243_v33 = vld [vmem:[%s5440_s15 + $0xc20] ss:$16 sps:$4 sm:$0xff]  }
 0x173   : > { %3141 = vmatprep.subr.bf16.mxu0 %v5152_v34  ;;  %3442 = vmatprep.subr.bf16.mxu1 %v5155_v35  ;;  %v5246_v34 = vld [vmem:[%s5440_s15 + $0xc28] ss:$16 sps:$4 sm:$0xff]   ;;  %v5251_v35 = vld [vmem:[%s5440_s15 + $0xc44] ss:$16 sps:$4 sm:$0xff]  }
 0x176   : > { %3142 = vmatpush1.bf16.msra.mxu0 %v5150_v36  ;;  %3443 = vmatpush1.bf16.msra.mxu1 %v5153_v37  ;;  %v5254_v36 = vld [vmem:[%s5440_s15 + $0xc4c] ss:$16 sps:$4 sm:$0xff]   ;;  %v5359_v37 = vmov 0  }
 0x177   : > { %3143 = vmatprep.subr.bf16.mxu0 %v5158_v38  ;;  %3444 = vmatprep.subr.bf16.mxu1 %v5161_v39  ;;  %v5249_v38 = vld [vmem:[%s5440_s15 + $0xc40] ss:$16 sps:$4 sm:$0xff]   ;;  %v5252_v39 = vld [vmem:[%s5440_s15 + $0xc48] ss:$16 sps:$4 sm:$0xff]  }
 0x17a   : > { %3144 = vmatpush1.bf16.msra.mxu0 %v5156_v40  ;;  %3445 = vmatpush1.bf16.msra.mxu1 %v5159_v41  ;;  %v5257_v40 = vld [vmem:[%s5440_s15 + $0xc64] ss:$16 sps:$4 sm:$0xff]   ;;  %v5260_v41 = vld [vmem:[%s5440_s15 + $0xc6c] ss:$16 sps:$4 sm:$0xff]  }
 0x17b   : > { %3145 = vmatprep.subr.bf16.mxu0 %v5164_v42  ;;  %3446 = vmatprep.subr.bf16.mxu1 %v5167_v43  ;;  %v5255_v42 = vld [vmem:[%s5440_s15 + $0xc60] ss:$16 sps:$4 sm:$0xff]   ;;  %v5258_v43 = vld [vmem:[%s5440_s15 + $0xc68] ss:$16 sps:$4 sm:$0xff]  }
 0x17e   : > { %3146 = vmatpush1.bf16.msra.mxu0 %v5162_v44  ;;  %3447 = vmatpush1.bf16.msra.mxu1 %v5165_v45  ;;  %v5263_v44 = vld [vmem:[%s5440_s15 + $0xc84] ss:$16 sps:$4 sm:$0xff]   ;;  %v5266_v45 = vld [vmem:[%s5440_s15 + $0xc8c] ss:$16 sps:$4 sm:$0xff]  }
 0x17f   : > { %3147 = vmatprep.subr.bf16.mxu0 %v5170_v46  ;;  %3448 = vmatprep.subr.bf16.mxu1 %v5173_v47  ;;  %v5261_v46 = vld [vmem:[%s5440_s15 + $0xc80] ss:$16 sps:$4 sm:$0xff]   ;;  %v5264_v47 = vld [vmem:[%s5440_s15 + $0xc88] ss:$16 sps:$4 sm:$0xff]  }
 0x182   : > { %3148 = vmatpush1.bf16.msra.mxu0 %v5168_v48  ;;  %3449 = vmatpush1.bf16.msra.mxu1 %v5171_v49  ;;  %v5269_v48 = vld [vmem:[%s5440_s15 + $0xca4] ss:$16 sps:$4 sm:$0xff]   ;;  %v5272_v49 = vld [vmem:[%s5440_s15 + $0xcac] ss:$16 sps:$4 sm:$0xff]  }
 0x183   : > { %3149 = vmatprep.subr.bf16.mxu0 %v5176_v50  ;;  %3450 = vmatprep.subr.bf16.mxu1 %v5179_v51  ;;  %v5267_v50 = vld [vmem:[%s5440_s15 + $0xca0] ss:$16 sps:$4 sm:$0xff]   ;;  %v5270_v51 = vld [vmem:[%s5440_s15 + $0xca8] ss:$16 sps:$4 sm:$0xff]  }
 0x186   : > { %3150 = vmatpush1.bf16.msra.mxu0 %v5174_v52  ;;  %3451 = vmatpush1.bf16.msra.mxu1 %v5177_v53  ;;  %v5275_v52 = vld [vmem:[%s5440_s15 + $0xcc4] ss:$16 sps:$4 sm:$0xff]   ;;  %v5278_v53 = vld [vmem:[%s5440_s15 + $0xccc] ss:$16 sps:$4 sm:$0xff]  }
 0x187   : > { %3151 = vmatprep.subr.bf16.mxu0 %v5182_v54  ;;  %3452 = vmatprep.subr.bf16.mxu1 %v5185_v55  ;;  %v5273_v54 = vld [vmem:[%s5440_s15 + $0xcc0] ss:$16 sps:$4 sm:$0xff]   ;;  %v5276_v55 = vld [vmem:[%s5440_s15 + $0xcc8] ss:$16 sps:$4 sm:$0xff]  }
 0x18a   : > { %3152 = vmatpush1.bf16.msra.mxu0 %v5180_v56  ;;  %3453 = vmatpush1.bf16.msra.mxu1 %v5183_v57  ;;  %v5281_v56 = vld [vmem:[%s5440_s15 + $0xce4] ss:$16 sps:$4 sm:$0xff]   ;;  %v5284_v57 = vld [vmem:[%s5440_s15 + $0xcec] ss:$16 sps:$4 sm:$0xff]  }
 0x18b   : > { %3153 = vmatprep.subr.bf16.mxu0 %v5188_v58  ;;  %3454 = vmatprep.subr.bf16.mxu1 %v5191_v59  ;;  %v5279_v58 = vld [vmem:[%s5440_s15 + $0xce0] ss:$16 sps:$4 sm:$0xff]   ;;  %v5282_v59 = vld [vmem:[%s5440_s15 + $0xce8] ss:$16 sps:$4 sm:$0xff]  }
 0x18e   : > { %3154 = vmatpush1.bf16.msra.mxu0 %v5186_v60  ;;  %3455 = vmatpush1.bf16.msra.mxu1 %v5189_v61  ;;  %v5285_v60 = vld [vmem:[%s5442_s16 + $0x30] ss:$52 sps:$4 sm:$0xff]  }
 0x18f   : > { %3155 = vmatprep.subr.bf16.mxu0 %v5194_v62  ;;  %3456 = vmatprep.subr.bf16.mxu1 %v5197_v63  ;;  %v338_v61 = vld [vmem:[#allocation2] sm:$0xff]  ;;  %v340_v62 = vld [vmem:[#allocation2 + $0x10] sm:$0xff]  ;;  %v339_v63 = vld [vmem:[#allocation2 + $0x8] sm:$0xff] }
 0x192   : > { %3156 = vmatpush1.bf16.msra.mxu0 %v5192_v0  ;;  %3457 = vmatpush1.bf16.msra.mxu1 %v5195_v1  ;;  %v341_v0 = vld [vmem:[#allocation2 + $0x18] sm:$0xff] }
 0x193   : > { %3157 = vmatprep.subr.bf16.mxu0 %v5200_v2  ;;  %3458 = vmatprep.subr.bf16.mxu1 %v5203_v3  ;;  %v342_v3 = vld [vmem:[#allocation2 + $0x20] sm:$0xff] }
 0x196   : > { %3158 = vmatpush1.bf16.msra.mxu0 %v5198_v4  ;;  %3459 = vmatpush1.bf16.msra.mxu1 %v5201_v5  ;;  %v344_v4 = vld [vmem:[#allocation2 + $0x30] sm:$0xff] }
 0x197   : > { %3159 = vmatprep.subr.bf16.mxu0 %v5206_v6  ;;  %3460 = vmatprep.subr.bf16.mxu1 %v5209_v7 }
 0x19a   : > { %3160 = vmatpush1.bf16.msra.mxu0 %v5204_v8  ;;  %3461 = vmatpush1.bf16.msra.mxu1 %v5207_v9  ;;  %v343_v9 = vld [vmem:[#allocation2 + $0x28] sm:$0xff] }
 0x19b   : > { %3161 = vmatprep.subr.bf16.mxu0 %v5212_v10  ;;  %3462 = vmatprep.subr.bf16.mxu1 %v5215_v11  ;;  %v345_v10 = vld [vmem:[#allocation2 + $0x38] sm:$0xff] }
 0x19e   : > { %3162 = vmatpush1.bf16.msra.mxu0 %v5210_v12  ;;  %3463 = vmatpush1.bf16.msra.mxu1 %v5213_v13 }
 0x19f   : > { %3163 = vmatprep.subr.bf16.mxu0 %v5218_v14  ;;  %3464 = vmatprep.subr.bf16.mxu1 %v5221_v15 }
 0x1a2   : > { %3164 = vmatpush1.bf16.msra.mxu0 %v5216_v16  ;;  %3465 = vmatpush1.bf16.msra.mxu1 %v5219_v17 }
 0x1a3   : > { %3165 = vmatprep.subr.bf16.mxu0 %v5224_v18  ;;  %3466 = vmatprep.subr.bf16.mxu1 %v5227_v19 }
 0x1a6   : > { %3166 = vmatpush1.bf16.msra.mxu0 %v5222_v20  ;;  %3467 = vmatpush1.bf16.msra.mxu1 %v5225_v21  ;;  %v5286_v21 = vld [vmem:[%s6001_s3 + $0x40] sm:$0xff] (!%p4467_p11)  }
 0x1a7   : > { %3167 = vmatprep.subr.bf16.mxu0 %v5230_v22  ;;  %3468 = vmatprep.subr.bf16.mxu1 %v5233_v23  ;;  %v5287_v22 = vld [vmem:[%s6001_s3 + $0xc0] sm:$0xff] (!%p4467_p11)  }
 0x1a8   : > { %v5288_v23 = vld [vmem:[%s6001_s3] sm:$0xff] (!%p4467_p11)  }
 0x1aa   : > { %3168 = vmatpush1.bf16.msra.mxu0 %v5228_v24  ;;  %3469 = vmatpush1.bf16.msra.mxu1 %v5231_v25  ;;  %v5289_v24 = vld [vmem:[%s6001_s3 + $0x80] sm:$0xff] (!%p4467_p11)   ;;  %v5290_v25 = vld [vmem:[%s6001_s3 + $0x48] sm:$0xff] (!%p4467_p11)  }
 0x1ab   : > { %3180 = vmatprep.subr.bf16.mxu0 %v5239_v26  ;;  %3481 = vmatprep.subr.bf16.mxu1 %v5242_v27  ;;  %v5291_v26 = vld [vmem:[%s6001_s3 + $0xc8] sm:$0xff] (!%p4467_p11)  }
 0x1ac   : > { %v5292_v27 = vld [vmem:[%s6001_s3 + $0x8] sm:$0xff] (!%p4467_p11)  }
 0x1ad   : > { %3170 = vmatmul.mubr.bf16.vlgmr.msra.gmra.mrb[0].mxu0 %v5234_v28  ;;  %3471 = vmatmul.mubr.bf16.vlgmr.msra.gmra.mrb[0].mxu1 %v5234_v28  ;;  %v5293_v28 = vld [vmem:[%s6001_s3 + $0x88] sm:$0xff] (!%p4467_p11)  }
 0x1ae   : > { %3181 = vmatpush1.bf16.msra.mxu0 %v5237_v29  ;;  %3482 = vmatpush1.bf16.msra.mxu1 %v5240_v30  ;;  %v5294_v29 = vld [vmem:[%s6001_s3 + $0x50] sm:$0xff] (!%p4467_p11)  }
 0x1af   : > { %3182 = vmatprep.subr.bf16.mxu0 %v5245_v31  ;;  %3483 = vmatprep.subr.bf16.mxu1 %v5248_v32  ;;  %v5295_v30 = vld [vmem:[%s6001_s3 + $0xd0] sm:$0xff] (!%p4467_p11)  }
 0x1b0   : > { %3212 = vmatprep.mubr.bf16.mxu0 %v5359_v37  ;;  %3513 = vmatprep.mubr.bf16.mxu1 %v5359_v37  ;;  %v5296_v31 = vld [vmem:[%s6001_s3 + $0x10] sm:$0xff] (!%p4467_p11)   ;;  %v5302_v37 = vld [vmem:[%s6001_s3 + $0x60] sm:$0xff] (!%p4467_p11)  }
 0x1b1   : > { %v5297_v32 = vld [vmem:[%s6001_s3 + $0x90] sm:$0xff] (!%p4467_p11)  }
 0x1b2   : > { %3183 = vmatpush1.bf16.msra.mxu0 %v5243_v33  ;;  %3484 = vmatpush1.bf16.msra.mxu1 %v5246_v34  ;;  %v5298_v33 = vld [vmem:[%s6001_s3 + $0x58] sm:$0xff] (!%p4467_p11)  }
 0x1b3   : > { %3184 = vmatprep.subr.bf16.mxu0 %v5251_v35  ;;  %3485 = vmatprep.subr.bf16.mxu1 %v5254_v36  ;;  %v5299_v34 = vld [vmem:[%s6001_s3 + $0xd8] sm:$0xff] (!%p4467_p11)  }
 0x1b4   : > { %v5300_v35 = vld [vmem:[%s6001_s3 + $0x18] sm:$0xff] (!%p4467_p11)  }
 0x1b5   : > { %v5301_v36 = vld [vmem:[%s6001_s3 + $0x98] sm:$0xff] (!%p4467_p11)  }
 0x1b6   : > { %3185 = vmatpush1.bf16.msra.mxu0 %v5249_v38  ;;  %3486 = vmatpush1.bf16.msra.mxu1 %v5252_v39  ;;  %v5303_v38 = vld [vmem:[%s6001_s3 + $0xe0] sm:$0xff] (!%p4467_p11)  }
 0x1b7   : > { %3186 = vmatprep.subr.bf16.mxu0 %v5257_v40  ;;  %3487 = vmatprep.subr.bf16.mxu1 %v5260_v41  ;;  %v5304_v39 = vld [vmem:[%s6001_s3 + $0x20] sm:$0xff] (!%p4467_p11)   ;;  %v3554_v40 = vlaneseq (!%p4467_p11) }
 0x1b8   : > { %v5305_v41 = vld [vmem:[%s6001_s3 + $0xa0] sm:$0xff] (!%p4467_p11)  }
 0x1ba   : > { %3187 = vmatpush1.bf16.msra.mxu0 %v5255_v42  ;;  %3488 = vmatpush1.bf16.msra.mxu1 %v5258_v43  ;;  %v5306_v42 = vld [vmem:[%s6001_s3 + $0x68] sm:$0xff] (!%p4467_p11)  }
 0x1bb   : > { %3188 = vmatprep.subr.bf16.mxu0 %v5263_v44  ;;  %3489 = vmatprep.subr.bf16.mxu1 %v5266_v45  ;;  %v5307_v43 = vld [vmem:[%s6001_s3 + $0xe8] sm:$0xff] (!%p4467_p11)   ;;  %v3555_v45 = vshrl.u32 (!%p4467_p11), %v3554_v40, 7 }
 0x1bc   : > { %v5308_v44 = vld [vmem:[%s6001_s3 + $0x28] sm:$0xff] (!%p4467_p11)  }
 0x1be   : > { %3189 = vmatpush1.bf16.msra.mxu0 %v5261_v46  ;;  %3490 = vmatpush1.bf16.msra.mxu1 %v5264_v47  ;;  %v5309_v46 = vld [vmem:[%s6001_s3 + $0xa8] sm:$0xff] (!%p4467_p11)   ;;  %v5310_v47 = vld [vmem:[%s6001_s3 + $0x70] sm:$0xff] (!%p4467_p11)  }
 0x1bf   : > { %3190 = vmatprep.subr.bf16.mxu0 %v5269_v48  ;;  %3491 = vmatprep.subr.bf16.mxu1 %v5272_v49  ;;  %v5311_v48 = vld [vmem:[%s6001_s3 + $0xf0] sm:$0xff] (!%p4467_p11)  }
 0x1c0   : > { %v5312_v49 = vld [vmem:[%s6001_s3 + $0x30] sm:$0xff] (!%p4467_p11)  }
 0x1c2   : > { %3191 = vmatpush1.bf16.msra.mxu0 %v5267_v50  ;;  %3492 = vmatpush1.bf16.msra.mxu1 %v5270_v51  ;;  %v3560_v50 = vsub.s32 (!%p4467_p11), 1, %v3555_v45  ;;  %v5313_v51 = vld [vmem:[%s6001_s3 + $0xb0] sm:$0xff] (!%p4467_p11)  }
 0x1c3   : > { %3192 = vmatprep.subr.bf16.mxu0 %v5275_v52  ;;  %3493 = vmatprep.subr.bf16.mxu1 %v5278_v53  ;;  %v3568_v52 = vsub.s32 (!%p4467_p11), 3, %v3555_v45  ;;  %v5314_v53 = vld [vmem:[%s6001_s3 + $0x78] sm:$0xff] (!%p4467_p11)  }
 0x1c6   : > { %3193 = vmatpush1.bf16.msra.mxu0 %v5273_v54  ;;  %3494 = vmatpush1.bf16.msra.mxu1 %v5276_v55  ;;  %v3556_v54 = vsub.s32 (!%p4467_p11), 0, %v3555_v45  ;;  %v5315_v55 = vld [vmem:[%s6001_s3 + $0xf8] sm:$0xff] (!%p4467_p11)  }
 0x1c7   : > { %3194 = vmatprep.subr.bf16.mxu0 %v5281_v56  ;;  %3495 = vmatprep.subr.bf16.mxu1 %v5284_v57  ;;  %v3564_v56 = vsub.s32 (!%p4467_p11), 2, %v3555_v45  ;;  %v5316_v57 = vld [vmem:[%s6001_s3 + $0x38] sm:$0xff] (!%p4467_p11)  }
 0x1ca   : > { %3195 = vmatpush1.bf16.msra.mxu0 %v5279_v58  ;;  %3496 = vmatpush1.bf16.msra.mxu1 %v5282_v59  ;;  %v5317_v58 = vld [vmem:[%s6001_s3 + $0xb8] sm:$0xff] (!%p4467_p11)  }
 0x1cb   : > { %4507 = vmatprep.subr.bf16.mxu0 (!%p4467_p11), %v5286_v21  ;;  %4529 = vmatprep.subr.bf16.mxu1 (!%p4467_p11), %v5287_v22 }
 0x1cd   : > { %3213 = vmatmul.mubr.bf16.vlgmr.msra.gmra.mrb[0].mxu0 %v5285_v60  ;;  %3514 = vmatmul.mubr.bf16.vlgmr.msra.gmra.mrb[0].mxu1 %v5285_v60 }
 0x1ce   : > { %4508 = vmatpush3.bf16.msra.mxu0 (!%p4467_p11), %v5288_v23  ;;  %4530 = vmatpush3.bf16.msra.mxu1 (!%p4467_p11), %v5289_v24 }
 0x1cf   : > { %4509 = vmatprep.subr.bf16.mxu0 (!%p4467_p11), %v5290_v25  ;;  %4531 = vmatprep.subr.bf16.mxu1 (!%p4467_p11), %v5291_v26 }
 0x1d2   : > { %4510 = vmatpush3.bf16.msra.mxu0 (!%p4467_p11), %v5292_v27  ;;  %4532 = vmatpush3.bf16.msra.mxu1 (!%p4467_p11), %v5293_v28 }
 0x1d3   : > { %4511 = vmatprep.subr.bf16.mxu0 (!%p4467_p11), %v5294_v29  ;;  %4533 = vmatprep.subr.bf16.mxu1 (!%p4467_p11), %v5295_v30  ;;  %v4468_v30 = vld [vmem:[%s6002_s4] ss:$0 sm:$0xff] (!%p4467_p11) }
 0x1d6   : > { %4512 = vmatpush3.bf16.msra.mxu0 (!%p4467_p11), %v5296_v31  ;;  %4534 = vmatpush3.bf16.msra.mxu1 (!%p4467_p11), %v5297_v32 }
 0x1d7   : > { %4513 = vmatprep.subr.bf16.mxu0 (!%p4467_p11), %v5298_v33  ;;  %4535 = vmatprep.subr.bf16.mxu1 (!%p4467_p11), %v5299_v34 }
 0x1da   : > { %4514 = vmatpush3.bf16.msra.mxu0 (!%p4467_p11), %v5300_v35  ;;  %4536 = vmatpush3.bf16.msra.mxu1 (!%p4467_p11), %v5301_v36 }
 0x1db   : > { %4515 = vmatprep.subr.bf16.mxu0 (!%p4467_p11), %v5302_v37  ;;  %4537 = vmatprep.subr.bf16.mxu1 (!%p4467_p11), %v5303_v38 }
 0x1de   : > { %4516 = vmatpush3.bf16.msra.mxu0 (!%p4467_p11), %v5304_v39  ;;  %4538 = vmatpush3.bf16.msra.mxu1 (!%p4467_p11), %v5305_v41 }
 0x1df   : > { %4517 = vmatprep.subr.bf16.mxu0 (!%p4467_p11), %v5306_v42  ;;  %4539 = vmatprep.subr.bf16.mxu1 (!%p4467_p11), %v5307_v43 }
 0x1e2   : > { %4518 = vmatpush3.bf16.msra.mxu0 (!%p4467_p11), %v5308_v44  ;;  %4540 = vmatpush3.bf16.msra.mxu1 (!%p4467_p11), %v5309_v46 }
 0x1e3   : > { %4519 = vmatprep.subr.bf16.mxu0 (!%p4467_p11), %v5310_v47  ;;  %4541 = vmatprep.subr.bf16.mxu1 (!%p4467_p11), %v5311_v48 }
 0x1e6   : > { %4520 = vmatpush3.bf16.msra.mxu0 (!%p4467_p11), %v5312_v49  ;;  %4542 = vmatpush3.bf16.msra.mxu1 (!%p4467_p11), %v5313_v51 }
 0x1e7   : > { %4521 = vmatprep.subr.bf16.mxu0 (!%p4467_p11), %v5314_v53  ;;  %4543 = vmatprep.subr.bf16.mxu1 (!%p4467_p11), %v5315_v55 }
 0x1ea   : > { %4522 = vmatpush3.bf16.msra.mxu0 (!%p4467_p11), %v5316_v57  ;;  %4544 = vmatpush3.bf16.msra.mxu1 (!%p4467_p11), %v5317_v58 }
 0x2a0   : > { %v3214_v1 = vpop.f32.mrb[0].mxu0  ;;  %v3515_v2 = vpop.f32.mrb[0].mxu1  ;;  %3543 = sbr.rel (%p4467_p11) target bundleno = 915 (0x393), region = 74 }
 0x2a1   : > { %v3524_v5 = vadd.f32 %v3214_v1, %v338_v61  ;;  %v3526_v6 = vadd.f32 %v3515_v2, %v340_v62  ;;  %v3216_v7 = vpop.f32.mrb[1].mxu0  ;;  %v3517_v8 = vpop.f32.mrb[1].mxu1  ;;  %v3552_v61 = vld [vmem:[%s6000_s2] ss:$8 sm:$0xf] (!%p4467_p11) }
 0x2a2   : > { %v3525_v11 = vadd.f32 %v3216_v7, %v339_v63  ;;  %v3527_v12 = vadd.f32 %v3517_v8, %v341_v0  ;;  %v3218_v13 = vpop.f32.mrb[2].mxu0  ;;  %v3519_v14 = vpop.f32.mrb[2].mxu1  ;;  %v3561_v62 = vrot.slane (!%p4467_p11), %v3552_v61, %v3560_v50  ;;  %v3569_v1 = vrot.slane (!%p4467_p11), %v3552_v61, %v3568_v52 }
 0x2a3   : > { %3532 = vst [vmem:[#allocation2] sm:$0xff] %v3524_v5  ;;  %3534 = vst [vmem:[#allocation2 + $0x10] sm:$0xff] %v3526_v6  ;;  %v3528_v15 = vadd.f32 %v3218_v13, %v342_v3  ;;  %v3530_v16 = vadd.f32 %v3519_v14, %v344_v4  ;;  %v3220_v17 = vpop.f32.mrb[3].mxu0  ;;  %v3521_v18 = vpop.f32.mrb[3].mxu1  ;;  %v3557_v3 = vrot.slane (!%p4467_p11), %v3552_v61, %v3556_v54 }
 0x2a4   : > { %3533 = vst [vmem:[#allocation2 + $0x8] sm:$0xff] %v3525_v11  ;;  %3535 = vst [vmem:[#allocation2 + $0x18] sm:$0xff] %v3527_v12  ;;  %v3529_v19 = vadd.f32 %v3220_v17, %v343_v9  ;;  %v3531_v20 = vadd.f32 %v3521_v18, %v345_v10  ;;  %v3565_v4 = vrot.slane (!%p4467_p11), %v3552_v61, %v3564_v56 }
 0x2a5   : > { %3536 = vst [vmem:[#allocation2 + $0x20] sm:$0xff] %v3528_v15  ;;  %3538 = vst [vmem:[#allocation2 + $0x30] sm:$0xff] %v3530_v16 }
 0x2a6   : > { %3537 = vst [vmem:[#allocation2 + $0x28] sm:$0xff] %v3529_v19  ;;  %3539 = vst [vmem:[#allocation2 + $0x38] sm:$0xff] %v3531_v20 }
 0x2aa   : > { %v3544_v2 = vld [vmem:[#allocation2] sm:$0xff]  ;;  %v3546_v6 = vld [vmem:[#allocation2 + $0x10] sm:$0xff] }
 0x2ab   : > { %v3545_v59 = vld [vmem:[#allocation2 + $0x8] sm:$0xff]  ;;  %v3547_v63 = vld [vmem:[#allocation2 + $0x18] sm:$0xff]  ;;  %v3574_v12 = vadd.f32 %v3557_v3, %v3544_v2  ;;  %v3576_v14 = vadd.f32 %v3565_v4, %v3546_v6 }
 0x2ac   : > { %v3548_v5 = vld [vmem:[#allocation2 + $0x20] sm:$0xff]  ;;  %v3550_v7 = vld [vmem:[#allocation2 + $0x30] sm:$0xff]  ;;  %v3575_v8 = vadd.f32 %v3561_v62, %v3545_v59  ;;  %v3577_v10 = vadd.f32 %v3569_v1, %v3547_v63 }
 0x2ad   : > { %v3549_v60 = vld [vmem:[#allocation2 + $0x28] sm:$0xff]  ;;  %v3551_v0 = vld [vmem:[#allocation2 + $0x38] sm:$0xff]  ;;  %v3578_v13 = vadd.f32 %v3557_v3, %v3548_v5  ;;  %v3580_v15 = vadd.f32 %v3565_v4, %v3550_v7  ;;  %v3582_v20 = vmax.f32 %v3574_v12, 0.0  ;;  %v3584_v22 = vmax.f32 %v3576_v14, 0.0 }
 0x2ae   : > { %v3579_v9 = vadd.f32 %v3561_v62, %v3549_v60  ;;  %v3581_v11 = vadd.f32 %v3569_v1, %v3551_v0  ;;  %v3583_v16 = vmax.f32 %v3575_v8, 0.0  ;;  %v3585_v18 = vmax.f32 %v3577_v10, 0.0 }
 0x2af   : > { %v3586_v21 = vmax.f32 %v3578_v13, 0.0  ;;  %v3588_v23 = vmax.f32 %v3580_v15, 0.0 }
 0x2b0   : > { %v3587_v17 = vmax.f32 %v3579_v9, 0.0  ;;  %v3589_v19 = vmax.f32 %v3581_v11, 0.0 }
 0x2b1   : > { %v3590_v26 = vpack.c.bf16 %v3586_v21, %v3582_v20  ;;  %v3592_v27 = vpack.c.bf16 %v3588_v23, %v3584_v22 }
 0x2b2   : > { %v3591_v24 = vpack.c.bf16 %v3587_v17, %v3583_v16  ;;  %v3593_v25 = vpack.c.bf16 %v3589_v19, %v3585_v18 }
 0x2b4   : > { %3887 = vmatprep.mubr.bf16.mxu0 %v3591_v24  ;;  %3928 = vmatprep.mubr.bf16.mxu1 %v3593_v25 }
 0x2b5   : > { %3888 = vmatmul.mubr.bf16.vlgmr.msra.gmra.mrb[0].mxu0 %v3590_v26  ;;  %3929 = vmatmul.mubr.bf16.vlgmr.msra.gmra.mrb[0].mxu1 %v3592_v27 }
 0x388   : > { %v4523_v28 = vpop.f32.mrb[0].mxu0  ;;  %v4545_v29 = vpop.f32.mrb[0].mxu1 }
 0x389   : > { %v4524_v31 = vpop.f32.mrb[1].mxu0  ;;  %v4546_v32 = vpop.f32.mrb[1].mxu1 }
 0x38a   : > { %v4525_v33 = vadd.f32 %v4524_v31, %v4523_v28  ;;  %v4547_v34 = vadd.f32 %v4546_v32, %v4545_v29  ;;  %v4526_v35 = vpop.f32.mrb[2].mxu0  ;;  %v4548_v36 = vpop.f32.mrb[2].mxu1 }
 0x38b   : > { %v4527_v37 = vpop.f32.mrb[3].mxu0  ;;  %v4549_v38 = vpop.f32.mrb[3].mxu1 }
 0x38c   : > { %v3890_v39 = vadd.f32 %v4525_v33, %v4468_v30  ;;  %v4528_v40 = vadd.f32 %v4527_v37, %v4526_v35  ;;  %v4550_v41 = vadd.f32 %v4549_v38, %v4548_v36 }
 0x38e   : > { %v3931_v42 = vadd.f32 %v4547_v34, %v3890_v39  ;;  %v3893_v43 = vadd.f32 %v4528_v40, %v4468_v30 }
 0x390   : > { %3937 = vst [vmem:[%s6003_s5] sm:$0xff] %v3931_v42  ;;  %v3934_v44 = vadd.f32 %v4550_v41, %v3893_v43 }
 0x392   : > { %3938 = vst [vmem:[%s6003_s5 + $0x8] sm:$0xff] %v3934_v44 }
 0x393 PF: > { %s15_s22 = sadd.s32 1, %s5356_s22   ;;  %s6004_s18 = smov %s5344_s19 }
 0x394   : > { %p12_p12 = scmp.ge.s32.totalorder %s15_s22, 4   ;;  %s6005_s19 = smov %s5425_s26 }
 0x395   : > { %s6006_s20 = smov %s5352_s21  ;;  %s6007_s21 = smov %s6009_s23 }
 0x396   :  { %14 = sbr.rel (!%p12_p12) target bundleno = 3 (0x3), region = 118 }

</bundles_post_ra>
